<compile_context>
chip_gen: v5e
topology: v5e:2x2
jax: 0.10.0
libtpu: 0.0.40
codegen_flags: <defaults>
</compile_context>

<pallas_src>
import functools

import jax
import jax.numpy as jnp
import numpy as np
from jax import lax
from jax.experimental import pallas as pl
from jax.experimental.pallas import tpu as pltpu


def _sigmoid(x):
    # exp lowers to the EUP; approx reciprocal also goes to the EUP slot.
    return pl.reciprocal(1.0 + jnp.exp(-x), approx=True)


def block2_kernel(xe_ref, xo_ref, w1b_ref, w2b_ref, bnb_ref, wca1_ref, wca2_ref,
                  wsab_ref, o_ref, pad2_ref, sapad_ref):
    # xe_ref   : (Bt, H2+1, (W+2)*C)   even padded input rows (padded rows 0,2,...,H)
    # xo_ref   : (Bt, H2,   (W+2)*C)   odd  padded input rows (padded rows 1,3,...,H-1)
    # w1b_ref  : (3, (W+2)*C, 2*NL)    banded conv1 weight per ki; ki=1 also carries the
    #                                  1x1-stride-2 residual conv in its last NL columns
    # w2b_ref  : (3, NL, NL)           banded conv2 weight per ki (NL = W2*C2)
    # bnb_ref  : (3, NL)               lane-tiled folded BN biases [bn1, bn2, bn3] (f32)
    # wca1_ref : (C2, CH)              channel-attention fc1 (f32)
    # wca2_ref : (CH, NL)              channel-attention fc2, lane-tiled (f32)
    # wsab_ref : (14*(W2+6), NL)       banded 7x7 SA weight (mean/max lane-interleaved,
    #                                  output columns replicated over C2)
    # o_ref    : (Bt, H2, NL)          lane-dense output (f32)
    # pad2_ref : (Bt, H2+2, NL)        conv2 row-pad scratch (f32)
    # sapad_ref: (Bt, H2+6, 2*(W2+6))  SA pad scratch; lane index = w_pad*2 + {mean,max}
    f32 = jnp.float32
    Bt, H2, KW = xo_ref.shape
    NL = o_ref.shape[-1]
    C2, CH = wca1_ref.shape
    W2 = NL // C2
    M1 = Bt * H2
    mdt = w2b_ref.dtype                     # MXU operand dtype (bf16 or f32)

    # ---- conv1 (3x3 s2 p1) + fused residual (1x1 s2): three banded MXU matmuls ----
    s0 = xe_ref[:, 0:H2, :].reshape(M1, KW)          # tap row ki=0 (padded row 2*h2)
    s1 = xo_ref[...].reshape(M1, KW)                 # tap row ki=1 (center / residual)
    s2 = xe_ref[:, 1:H2 + 1, :].reshape(M1, KW)      # tap row ki=2
    acc = (jnp.dot(s0, w1b_ref[0], preferred_element_type=f32)
           + jnp.dot(s1, w1b_ref[1], preferred_element_type=f32)
           + jnp.dot(s2, w1b_ref[2], preferred_element_type=f32))      # (M1, 2*NL)
    out1 = jnp.maximum(acc[:, :NL] + bnb_ref[0:1, :], 0.0)             # bn1 + relu
    res = acc[:, NL:] + bnb_ref[2:3, :]                                # bn3(conv3)

    # ---- conv2 (3x3 s1 p1): row-padded lane-dense scratch + three banded matmuls ----
    zrow = jnp.zeros((Bt, 1, NL), f32)
    pad2_ref[:, 0:1, :] = zrow                                          # full-lane rows
    pad2_ref[:, H2 + 1:H2 + 2, :] = zrow
    pad2_ref[:, 1:H2 + 1, :] = out1.reshape(Bt, H2, NL)
    c20 = jnp.dot(pad2_ref[:, 0:H2, :].astype(mdt).reshape(M1, NL), w2b_ref[0],
                  preferred_element_type=f32)
    c21 = jnp.dot(pad2_ref[:, 1:H2 + 1, :].astype(mdt).reshape(M1, NL), w2b_ref[1],
                  preferred_element_type=f32)
    c22 = jnp.dot(pad2_ref[:, 2:H2 + 2, :].astype(mdt).reshape(M1, NL), w2b_ref[2],
                  preferred_element_type=f32)
    out2 = c20 + c21 + c22 + bnb_ref[1:2, :]                            # (M1, NL) f32

    # ---- channel attention: global avg/max pool -> fc1 -> relu -> fc2 -> sigmoid ----
    o4 = out2.reshape(Bt, H2, W2, C2)
    pooled = jnp.concatenate([jnp.mean(o4, axis=(1, 2)), jnp.max(o4, axis=(1, 2))],
                             axis=0)                                    # (2*Bt, C2)
    h = jnp.maximum(jnp.dot(pooled, wca1_ref[...], preferred_element_type=f32), 0.0)
    ca = _sigmoid(jnp.dot(h[:Bt] + h[Bt:], wca2_ref[...],
                          preferred_element_type=f32))                  # (Bt, NL)
    o_ca = out2.reshape(Bt, H2, NL) * ca[:, None, :]

    # ---- spatial attention: [mean_c, max_c] -> 7x7 conv (banded matmul) -> sigmoid --
    oc4 = o_ca.reshape(Bt, H2, W2, C2)
    mm = jnp.stack([jnp.mean(oc4, axis=3), jnp.max(oc4, axis=3)],
                   axis=-1).reshape(Bt, H2, 2 * W2)                     # lane-interleave
    sapad_ref[...] = jnp.zeros(sapad_ref.shape, f32)
    sapad_ref[:, 3:3 + H2, 6:6 + 2 * W2] = mm
    LW = sapad_ref.shape[-1]                                            # 2*(W2+6)
    sa_in = jnp.concatenate([sapad_ref[:, ki:ki + H2, :] for ki in range(7)],
                            axis=-1).reshape(M1, 7 * LW).astype(mdt)
    sa = _sigmoid(jnp.dot(sa_in, wsab_ref[...], preferred_element_type=f32))  # (M1,NL)

    out = jnp.maximum(o_ca * sa.reshape(Bt, H2, NL) + res.reshape(Bt, H2, NL), 0.0)
    o_ref[...] = out.astype(o_ref.dtype)


def _pick_bt(B):
    # >=2 grid steps so v7x's two TensorCores both get work on the "parallel" batch
    # axis; >=4 steps (when B allows) so the next input block's DMA overlaps compute.
    target = 4 if B >= 4 else min(B, 2)
    cands = [d for d in range(1, B + 1) if B % d == 0 and B // d >= target]
    return max(cands) if cands else 1


def _vmem_limit_bytes(Bt, H2, W2, C, C2, CH, KW, NL, mxu_bytes):
    # Re-derived per-step live set (double-buffered inputs/weights/output, scratches,
    # and a rough allowance for in-kernel intermediates); clamped to the chip's VMEM.
    inp = 2 * mxu_bytes * Bt * ((H2 + 1) + H2) * KW
    wgt = 2 * (mxu_bytes * (3 * KW * 2 * NL + 3 * NL * NL + 14 * (W2 + 6) * NL)
               + 4 * (3 * NL + C2 * CH + CH * NL))
    out = 2 * 4 * Bt * H2 * NL
    scr = 4 * (Bt * (H2 + 2) * NL + Bt * (H2 + 6) * 2 * (W2 + 6))
    live = 12 * 4 * Bt * H2 * NL
    need = inp + wgt + out + scr + live
    try:
        phys = pltpu.get_tpu_info().vmem_capacity_bytes
    except Exception:
        phys = 64 * 1024 * 1024          # v7x floor
    return int(min(int(0.85 * phys), max(32 * 1024 * 1024, 3 * need)))


def block2_forward(x_nchw, params, use_bf16=True):
    """x_nchw: (B, C, H, W) float32; params hold PyTorch-layout weights (eval-mode BN)."""
    (w1, w2, w3, bn1, bn2, bn3, wca1_t, wca2_t, wsa) = params
    B, C, H, W = x_nchw.shape
    assert H % 2 == 0 and W % 2 == 0
    C2, H2, W2 = 2 * C, H // 2, W // 2
    CH = wca1_t.shape[0]
    KW = (W + 2) * C
    NL = W2 * C2                 # lane-dense activation width (ideally a multiple of 128)
    eps = 1e-5
    f32 = jnp.float32
    mdt = jnp.bfloat16 if use_bf16 else f32

    Bt = _pick_bt(B)

    # ---- input prep: zero-pad + even/odd padded-row split, lane-merged (w, c) ----
    x = jnp.transpose(x_nchw, (0, 2, 3, 1)).astype(f32)                  # NHWC
    x_pad = jnp.pad(x, ((0, 0), (1, 1), (1, 1), (0, 0)))                 # (B,H+2,W+2,C)
    xe = x_pad[:, 0:H + 2:2].reshape(B, H2 + 1, KW).astype(mdt)          # rows 0,2,..,H
    xo = x_pad[:, 1:H + 1:2].reshape(B, H2, KW).astype(mdt)              # rows 1,3,..,H-1

    # ---- BN folding (eval mode): scales into conv weights, biases lane-tiled ----
    def fold_bn(p):
        g, b, m, v = p
        s = g / jnp.sqrt(v + eps)
        return s, b - m * s

    bn1_s, bn1_b = fold_bn(bn1)
    bn2_s, bn2_b = fold_bn(bn2)
    bn3_s, bn3_b = fold_bn(bn3)
    bnb = jnp.stack([jnp.tile(bn1_b, W2), jnp.tile(bn2_b, W2), jnp.tile(bn3_b, W2)],
                    axis=0).astype(f32)                                  # (3, NL)

    kj3 = jnp.arange(3)
    # conv1 band: row w_in*C+ci -> col w2*C2+co, active where w_in == 2*w2 + kj
    sel3 = (jnp.arange(W + 2)[None, :, None]
            == (2 * jnp.arange(W2)[None, None, :] + kj3[:, None, None])).astype(f32)
    w1s = w1.astype(f32) * bn1_s[:, None, None, None]                    # (C2,C,3,3)
    w1band = jnp.einsum('oikj,jpq->kpiqo', w1s, sel3).reshape(3, KW, NL)
    # residual 1x1 stride-2 conv fused on the center-row (ki=1) matmul, extra NL cols
    w3s = w3.astype(f32).reshape(C2, C) * bn3_s[:, None]                 # (C2, C)
    w3band = jnp.einsum('oi,pq->piqo', w3s, sel3[1]).reshape(KW, NL)
    zcols = jnp.zeros((KW, NL), f32)
    w1b = jnp.stack([jnp.concatenate([w1band[0], zcols], axis=1),
                     jnp.concatenate([w1band[1], w3band], axis=1),
                     jnp.concatenate([w1band[2], zcols], axis=1)], axis=0).astype(mdt)

    # conv2 band: active where w_in == w2 + kj - 1 (column zero-pad handled by the band)
    sel1 = (jnp.arange(W2)[None, :, None]
            == (jnp.arange(W2)[None, None, :] + kj3[:, None, None] - 1)).astype(f32)
    w2s = w2.astype(f32) * bn2_s[:, None, None, None]                    # (C2,C2,3,3)
    w2b = jnp.einsum('oikj,jpq->kpiqo', w2s, sel1).reshape(3, NL, NL).astype(mdt)

    # channel attention weights (fc2 lane-tiled so its output matches the NL layout)
    wca1_k = jnp.transpose(wca1_t.astype(f32).reshape(CH, C2))           # (C2, CH)
    wca2_k = jnp.tile(jnp.transpose(wca2_t.astype(f32).reshape(C2, CH)), (1, W2))

    # spatial-attention 7x7 band over lane-interleaved (w_pad, {mean,max}) inputs,
    # output columns replicated over C2 so `sa` lands lane-aligned with activations.
    kj7 = jnp.arange(7)
    sel7 = (jnp.arange(W2 + 6)[None, :, None]
            == (jnp.arange(W2)[None, None, :] + kj7[:, None, None])).astype(f32)
    band_sa = jnp.einsum('ckj,jpq->kpcq', wsa[0].astype(f32), sel7)      # (7,W2+6,2,W2)
    wsab = jnp.broadcast_to(band_sa[..., None],
                            (7, W2 + 6, 2, W2, C2)).reshape(14 * (W2 + 6), NL).astype(mdt)

    vmem_limit = _vmem_limit_bytes(Bt, H2, W2, C, C2, CH, KW, NL,
                                   2 if use_bf16 else 4)

    # NOTE: NL = W2*C2 is 128 here (fully lane-dense output stores); other shapes still
    # work but the final store becomes masked/partial (perf, not correctness).
    out2d = pl.pallas_call(
        block2_kernel,
        out_shape=jax.ShapeDtypeStruct((B, H2, NL), f32),
        grid=(B // Bt,),
        in_specs=[
            pl.BlockSpec((Bt, H2 + 1, KW), lambda b: (b, 0, 0)),         # xe
            pl.BlockSpec((Bt, H2, KW), lambda b: (b, 0, 0)),             # xo
            pl.BlockSpec((3, KW, 2 * NL), lambda b: (0, 0, 0)),          # w1b (+res)
            pl.BlockSpec((3, NL, NL), lambda b: (0, 0, 0)),              # w2b
            pl.BlockSpec((3, NL), lambda b: (0, 0)),                     # bn biases
            pl.BlockSpec((C2, CH), lambda b: (0, 0)),                    # CA fc1
            pl.BlockSpec((CH, NL), lambda b: (0, 0)),                    # CA fc2 (tiled)
            pl.BlockSpec((14 * (W2 + 6), NL), lambda b: (0, 0)),         # SA band
        ],
        out_specs=pl.BlockSpec((Bt, H2, NL), lambda b: (b, 0, 0)),
        scratch_shapes=[
            pltpu.VMEM((Bt, H2 + 2, NL), jnp.float32),                   # conv2 row pad
            pltpu.VMEM((Bt, H2 + 6, 2 * (W2 + 6)), jnp.float32),         # SA pad
        ],
        compiler_params=pltpu.CompilerParams(
            dimension_semantics=("parallel",),
            vmem_limit_bytes=vmem_limit),
    )(xe, xo, w1b, w2b, bnb, wca1_k, wca2_k, wsab)

    out_nhwc = out2d.reshape(B, H2, W2, C2)
    return jnp.transpose(out_nhwc, (0, 3, 1, 2))                         # back to NCHW


# ----------------------- pure-JAX reference (for verification) -----------------------
def block2_ref(x_nchw, params):
    (w1, w2, w3, bn1, bn2, bn3, wca1_t, wca2_t, wsa) = params
    eps = 1e-5
    x = jnp.transpose(x_nchw, (0, 2, 3, 1))

    def conv(inp, w_oihw, stride, pad):
        w = jnp.transpose(w_oihw, (2, 3, 1, 0))  # OIHW -> HWIO
        return lax.conv_general_dilated(
            inp, w, (stride, stride), [(pad, pad), (pad, pad)],
            dimension_numbers=('NHWC', 'HWIO', 'NHWC'),
            precision=lax.Precision.HIGHEST)

    def bn(v, p):
        g, b, m, var = p
        return (v - m) / jnp.sqrt(var + eps) * g + b

    res = bn(conv(x, w3, 2, 0), bn3)
    o = jax.nn.relu(bn(conv(x, w1, 2, 1), bn1))
    o = bn(conv(o, w2, 1, 1), bn2)

    CH = wca1_t.shape[0]
    C2 = wca2_t.shape[0]
    wca1 = jnp.transpose(wca1_t.reshape(CH, C2), (1, 0))
    wca2 = jnp.transpose(wca2_t.reshape(C2, CH), (1, 0))
    avg = jnp.mean(o, axis=(1, 2), keepdims=True)
    mx = jnp.max(o, axis=(1, 2), keepdims=True)

    def mlp(v):
        return jnp.maximum(v @ wca1, 0.0) @ wca2

    ca = jax.nn.sigmoid(mlp(avg) + mlp(mx))
    o = o * ca

    s = jnp.concatenate([jnp.mean(o, axis=3, keepdims=True),
                         jnp.max(o, axis=3, keepdims=True)], axis=3)
    sa = jax.nn.sigmoid(conv(s, wsa, 1, 3))
    o = o * sa

    out = jax.nn.relu(o + res)
    return jnp.transpose(out, (0, 3, 1, 2))


if __name__ == "__main__":
    key = jax.random.PRNGKey(0)
    B, C, H, W = 2, 8, 16, 16          # input_nc = 8  ->  2*input_nc = 16
    C2 = 2 * C
    CH = C2 // 8                       # ChannelAttention hidden dim (ratio=8)
    ks = jax.random.split(key, 10)

    x = jax.random.normal(ks[0], (B, C, H, W), jnp.float32)
    w1 = 0.2 * jax.random.normal(ks[1], (C2, C, 3, 3), jnp.float32)
    w2 = 0.2 * jax.random.normal(ks[2], (C2, C2, 3, 3), jnp.float32)
    w3 = 0.2 * jax.random.normal(ks[3], (C2, C, 1, 1), jnp.float32)

    def bn_params(k):
        k1, k2, k3, k4 = jax.random.split(k, 4)
        gamma = 1.0 + 0.1 * jax.random.normal(k1, (C2,), jnp.float32)
        beta = 0.1 * jax.random.normal(k2, (C2,), jnp.float32)
        mean = 0.1 * jax.random.normal(k3, (C2,), jnp.float32)
        var = 1.0 + 0.2 * jax.random.uniform(k4, (C2,), jnp.float32)
        return (gamma, beta, mean, var)

    bn1 = bn_params(ks[4])
    bn2 = bn_params(ks[5])
    bn3 = bn_params(ks[6])
    wca1 = 0.3 * jax.random.normal(ks[7], (CH, C2, 1, 1), jnp.float32)
    wca2 = 0.3 * jax.random.normal(ks[8], (C2, CH, 1, 1), jnp.float32)
    wsa = 0.2 * jax.random.normal(ks[9], (1, 2, 7, 7), jnp.float32)
    params = (w1, w2, w3, bn1, bn2, bn3, wca1, wca2, wsa)

    fwd_bf16 = jax.jit(functools.partial(block2_forward, use_bf16=True))
    fwd_f32 = jax.jit(functools.partial(block2_forward, use_bf16=False))

    out = jax.block_until_ready(fwd_bf16(x, params))
    ref = jax.block_until_ready(block2_ref(x, params))
    assert out.shape == (B, C2, H // 2, W // 2), out.shape
    # bf16 MXU operands (f32 accumulation) vs. the f32 Precision.HIGHEST reference.
    np.testing.assert_allclose(np.asarray(out), np.asarray(ref), rtol=2e-2, atol=5e-2)

    # Exact f32-operand path: structural check against the same reference at 1e-2.
    out32 = jax.block_until_ready(fwd_f32(x, params))
    np.testing.assert_allclose(np.asarray(out32), np.asarray(ref), rtol=1e-2, atol=1e-2)

    print("KERNEL_OK")
</pallas_src>

<mosaic_0001>
module attributes {stable_mosaic.version = 11 : i64} {
  func.func @block2_kernel(%arg0: i32, %arg1: memref<1x9x144xbf16, #tpu.memory_space<vmem>>, %arg2: memref<1x8x144xbf16, #tpu.memory_space<vmem>>, %arg3: memref<3x144x256xbf16, #tpu.memory_space<vmem>>, %arg4: memref<3x128x128xbf16, #tpu.memory_space<vmem>>, %arg5: memref<3x128xf32, #tpu.memory_space<vmem>>, %arg6: memref<16x2xf32, #tpu.memory_space<vmem>>, %arg7: memref<2x128xf32, #tpu.memory_space<vmem>>, %arg8: memref<196x128xbf16, #tpu.memory_space<vmem>>, %arg9: memref<1x8x128xf32, #tpu.memory_space<vmem>>, %arg10: memref<1x10x128xf32, #tpu.memory_space<vmem>>, %arg11: memref<1x14x28xf32, #tpu.memory_space<vmem>>) attributes {dimension_semantics = [#tpu.dimension_semantics<parallel>], iteration_bounds = array<i64: 2>, scalar_prefetch = 0 : i64, scratch_operands = 2 : i64, tpu.core_type = #tpu.core_type<tc>, window_params = [{transform_indices = @transform_0, window_bounds = array<i64: 1, 9, 144>}, {transform_indices = @transform_1, window_bounds = array<i64: 1, 8, 144>}, {pipeline_mode = #tpu.pipeline_mode<synchronous>, transform_indices = @transform_2, window_bounds = array<i64: 3, 144, 256>}, {pipeline_mode = #tpu.pipeline_mode<synchronous>, transform_indices = @transform_3, window_bounds = array<i64: 3, 128, 128>}, {pipeline_mode = #tpu.pipeline_mode<synchronous>, transform_indices = @transform_4, window_bounds = array<i64: 3, 128>}, {pipeline_mode = #tpu.pipeline_mode<synchronous>, transform_indices = @transform_5, window_bounds = array<i64: 16, 2>}, {pipeline_mode = #tpu.pipeline_mode<synchronous>, transform_indices = @transform_6, window_bounds = array<i64: 2, 128>}, {pipeline_mode = #tpu.pipeline_mode<synchronous>, transform_indices = @transform_7, window_bounds = array<i64: 196, 128>}, {transform_indices = @transform_8, window_bounds = array<i64: 1, 8, 128>}]} {
    %c0 = arith.constant 0 : index
    %c0_0 = arith.constant 0 : index
    %c0_1 = arith.constant 0 : index
    %0 = vector.load %arg1[%c0, %c0_0, %c0_1] : memref<1x9x144xbf16, #tpu.memory_space<vmem>>, vector<1x8x144xbf16>
    %1 = vector.shape_cast %0 : vector<1x8x144xbf16> to vector<8x144xbf16>
    %c0_2 = arith.constant 0 : index
    %c0_3 = arith.constant 0 : index
    %c0_4 = arith.constant 0 : index
    %2 = vector.load %arg2[%c0_2, %c0_3, %c0_4] : memref<1x8x144xbf16, #tpu.memory_space<vmem>>, vector<1x8x144xbf16>
    %3 = vector.shape_cast %2 : vector<1x8x144xbf16> to vector<8x144xbf16>
    %c0_5 = arith.constant 0 : index
    %c1 = arith.constant 1 : index
    %c0_6 = arith.constant 0 : index
    %4 = vector.load %arg1[%c0_5, %c1, %c0_6] : memref<1x9x144xbf16, #tpu.memory_space<vmem>>, vector<1x8x144xbf16>
    %5 = vector.shape_cast %4 : vector<1x8x144xbf16> to vector<8x144xbf16>
    %c0_7 = arith.constant 0 : index
    %c0_8 = arith.constant 0 : index
    %c0_9 = arith.constant 0 : index
    %6 = vector.load %arg3[%c0_7, %c0_8, %c0_9] : memref<3x144x256xbf16, #tpu.memory_space<vmem>>, vector<1x144x256xbf16>
    %7 = vector.shape_cast %6 : vector<1x144x256xbf16> to vector<144x256xbf16>
    %cst = arith.constant dense<0.000000e+00> : vector<8x256xf32>
    %8 = tpu.matmul %1, %7, %cst {dimension_numbers = #tpu.dot_dimension_numbers<[1], [0], [0], [1], [0, 0, 1, 1], [], []>} : vector<8x144xbf16>, vector<144x256xbf16>, vector<8x256xf32> -> vector<8x256xf32>
    %c1_10 = arith.constant 1 : index
    %c0_11 = arith.constant 0 : index
    %c0_12 = arith.constant 0 : index
    %9 = vector.load %arg3[%c1_10, %c0_11, %c0_12] : memref<3x144x256xbf16, #tpu.memory_space<vmem>>, vector<1x144x256xbf16>
    %10 = vector.shape_cast %9 : vector<1x144x256xbf16> to vector<144x256xbf16>
    %cst_13 = arith.constant dense<0.000000e+00> : vector<8x256xf32>
    %11 = tpu.matmul %3, %10, %cst_13 {dimension_numbers = #tpu.dot_dimension_numbers<[1], [0], [0], [1], [0, 0, 1, 1], [], []>} : vector<8x144xbf16>, vector<144x256xbf16>, vector<8x256xf32> -> vector<8x256xf32>
    %12 = arith.addf %8, %11 : vector<8x256xf32>
    %c2 = arith.constant 2 : index
    %c0_14 = arith.constant 0 : index
    %c0_15 = arith.constant 0 : index
    %13 = vector.load %arg3[%c2, %c0_14, %c0_15] : memref<3x144x256xbf16, #tpu.memory_space<vmem>>, vector<1x144x256xbf16>
    %14 = vector.shape_cast %13 : vector<1x144x256xbf16> to vector<144x256xbf16>
    %cst_16 = arith.constant dense<0.000000e+00> : vector<8x256xf32>
    %15 = tpu.matmul %5, %14, %cst_16 {dimension_numbers = #tpu.dot_dimension_numbers<[1], [0], [0], [1], [0, 0, 1, 1], [], []>} : vector<8x144xbf16>, vector<144x256xbf16>, vector<8x256xf32> -> vector<8x256xf32>
    %16 = arith.addf %12, %15 : vector<8x256xf32>
    %17 = vector.extract_strided_slice %16 {offsets = [0, 0], sizes = [8, 128], strides = [1, 1]} : vector<8x256xf32> to vector<8x128xf32>
    %c0_17 = arith.constant 0 : index
    %c0_18 = arith.constant 0 : index
    %18 = vector.load %arg5[%c0_17, %c0_18] : memref<3x128xf32, #tpu.memory_space<vmem>>, vector<1x128xf32>
    %19 = vector.broadcast %18 : vector<1x128xf32> to vector<8x128xf32>
    %20 = arith.addf %17, %19 : vector<8x128xf32>
    %cst_19 = arith.constant 0.000000e+00 : f32
    %21 = vector.broadcast %cst_19 : f32 to vector<8x128xf32>
    %22 = arith.maximumf %20, %21 : vector<8x128xf32>
    %23 = vector.extract_strided_slice %16 {offsets = [0, 128], sizes = [8, 128], strides = [1, 1]} : vector<8x256xf32> to vector<8x128xf32>
    %c2_20 = arith.constant 2 : index
    %c0_21 = arith.constant 0 : index
    %24 = vector.load %arg5[%c2_20, %c0_21] : memref<3x128xf32, #tpu.memory_space<vmem>>, vector<1x128xf32>
    %25 = vector.broadcast %24 : vector<1x128xf32> to vector<8x128xf32>
    %26 = arith.addf %23, %25 : vector<8x128xf32>
    %cst_22 = arith.constant 0.000000e+00 : f32
    %27 = vector.broadcast %cst_22 : f32 to vector<1x1x128xf32>
    %c0_23 = arith.constant 0 : index
    %c0_24 = arith.constant 0 : index
    %c0_25 = arith.constant 0 : index
    %28 = vector.load %arg10[%c0_23, %c0_24, %c0_25] : memref<1x10x128xf32, #tpu.memory_space<vmem>>, vector<1x1x128xf32>
    tpu.vector_store %arg10[%c0_23, %c0_24, %c0_25], %27 {strides = array<i32>} : memref<1x10x128xf32, #tpu.memory_space<vmem>>, vector<1x1x128xf32>,
    %c0_26 = arith.constant 0 : index
    %c9 = arith.constant 9 : index
    %c0_27 = arith.constant 0 : index
    %29 = vector.load %arg10[%c0_26, %c9, %c0_27] : memref<1x10x128xf32, #tpu.memory_space<vmem>>, vector<1x1x128xf32>
    tpu.vector_store %arg10[%c0_26, %c9, %c0_27], %27 {strides = array<i32>} : memref<1x10x128xf32, #tpu.memory_space<vmem>>, vector<1x1x128xf32>,
    %30 = vector.shape_cast %22 : vector<8x128xf32> to vector<1x8x128xf32>
    %c0_28 = arith.constant 0 : index
    %c1_29 = arith.constant 1 : index
    %c0_30 = arith.constant 0 : index
    %31 = vector.load %arg10[%c0_28, %c1_29, %c0_30] : memref<1x10x128xf32, #tpu.memory_space<vmem>>, vector<1x8x128xf32>
    tpu.vector_store %arg10[%c0_28, %c1_29, %c0_30], %30 {strides = array<i32>} : memref<1x10x128xf32, #tpu.memory_space<vmem>>, vector<1x8x128xf32>,
    %c0_31 = arith.constant 0 : index
    %c0_32 = arith.constant 0 : index
    %c0_33 = arith.constant 0 : index
    %32 = vector.load %arg10[%c0_31, %c0_32, %c0_33] : memref<1x10x128xf32, #tpu.memory_space<vmem>>, vector<1x8x128xf32>
    %33 = arith.truncf %32 : vector<1x8x128xf32> to vector<1x8x128xbf16>
    %34 = vector.shape_cast %33 : vector<1x8x128xbf16> to vector<8x128xbf16>
    %c0_34 = arith.constant 0 : index
    %c0_35 = arith.constant 0 : index
    %c0_36 = arith.constant 0 : index
    %35 = vector.load %arg4[%c0_34, %c0_35, %c0_36] : memref<3x128x128xbf16, #tpu.memory_space<vmem>>, vector<1x128x128xbf16>
    %36 = vector.shape_cast %35 : vector<1x128x128xbf16> to vector<128x128xbf16>
    %cst_37 = arith.constant dense<0.000000e+00> : vector<8x128xf32>
    %37 = tpu.matmul %34, %36, %cst_37 {dimension_numbers = #tpu.dot_dimension_numbers<[1], [0], [0], [1], [0, 0, 1, 1], [], []>} : vector<8x128xbf16>, vector<128x128xbf16>, vector<8x128xf32> -> vector<8x128xf32>
    %c0_38 = arith.constant 0 : index
    %c1_39 = arith.constant 1 : index
    %c0_40 = arith.constant 0 : index
    %38 = vector.load %arg10[%c0_38, %c1_39, %c0_40] : memref<1x10x128xf32, #tpu.memory_space<vmem>>, vector<1x8x128xf32>
    %39 = arith.truncf %38 : vector<1x8x128xf32> to vector<1x8x128xbf16>
    %40 = vector.shape_cast %39 : vector<1x8x128xbf16> to vector<8x128xbf16>
    %c1_41 = arith.constant 1 : index
    %c0_42 = arith.constant 0 : index
    %c0_43 = arith.constant 0 : index
    %41 = vector.load %arg4[%c1_41, %c0_42, %c0_43] : memref<3x128x128xbf16, #tpu.memory_space<vmem>>, vector<1x128x128xbf16>
    %42 = vector.shape_cast %41 : vector<1x128x128xbf16> to vector<128x128xbf16>
    %cst_44 = arith.constant dense<0.000000e+00> : vector<8x128xf32>
    %43 = tpu.matmul %40, %42, %cst_44 {dimension_numbers = #tpu.dot_dimension_numbers<[1], [0], [0], [1], [0, 0, 1, 1], [], []>} : vector<8x128xbf16>, vector<128x128xbf16>, vector<8x128xf32> -> vector<8x128xf32>
    %c0_45 = arith.constant 0 : index
    %c2_46 = arith.constant 2 : index
    %c0_47 = arith.constant 0 : index
    %44 = vector.load %arg10[%c0_45, %c2_46, %c0_47] : memref<1x10x128xf32, #tpu.memory_space<vmem>>, vector<1x8x128xf32>
    %45 = arith.truncf %44 : vector<1x8x128xf32> to vector<1x8x128xbf16>
    %46 = vector.shape_cast %45 : vector<1x8x128xbf16> to vector<8x128xbf16>
    %c2_48 = arith.constant 2 : index
    %c0_49 = arith.constant 0 : index
    %c0_50 = arith.constant 0 : index
    %47 = vector.load %arg4[%c2_48, %c0_49, %c0_50] : memref<3x128x128xbf16, #tpu.memory_space<vmem>>, vector<1x128x128xbf16>
    %48 = vector.shape_cast %47 : vector<1x128x128xbf16> to vector<128x128xbf16>
    %cst_51 = arith.constant dense<0.000000e+00> : vector<8x128xf32>
    %49 = tpu.matmul %46, %48, %cst_51 {dimension_numbers = #tpu.dot_dimension_numbers<[1], [0], [0], [1], [0, 0, 1, 1], [], []>} : vector<8x128xbf16>, vector<128x128xbf16>, vector<8x128xf32> -> vector<8x128xf32>
    %50 = arith.addf %37, %43 : vector<8x128xf32>
    %51 = arith.addf %50, %49 : vector<8x128xf32>
    %c1_52 = arith.constant 1 : index
    %c0_53 = arith.constant 0 : index
    %52 = vector.load %arg5[%c1_52, %c0_53] : memref<3x128xf32, #tpu.memory_space<vmem>>, vector<1x128xf32>
    %53 = vector.broadcast %52 : vector<1x128xf32> to vector<8x128xf32>
    %54 = arith.addf %51, %53 : vector<8x128xf32>
    %55 = vector.shape_cast %54 : vector<8x128xf32> to vector<1x8x8x16xf32>
    %cst_54 = arith.constant dense<0.000000e+00> : vector<1x16xf32>
    %56 = vector.multi_reduction <add>, %55, %cst_54 [1, 2] : vector<1x8x8x16xf32> to vector<1x16xf32>
    %cst_55 = arith.constant 6.400000e+01 : f32
    %57 = vector.broadcast %cst_55 : f32 to vector<1x16xf32>
    %58 = arith.divf %56, %57 : vector<1x16xf32>
    %cst_56 = arith.constant dense<0xFF800000> : vector<1x16xf32>
    %59 = vector.multi_reduction <maximumf>, %55, %cst_56 [1, 2] : vector<1x8x8x16xf32> to vector<1x16xf32>
    %60 = tpu.concatenate %58, %59 in 0 : vector<1x16xf32>, vector<1x16xf32> -> vector<2x16xf32>
    %c0_57 = arith.constant 0 : index
    %c0_58 = arith.constant 0 : index
    %61 = vector.load %arg6[%c0_57, %c0_58] : memref<16x2xf32, #tpu.memory_space<vmem>>, vector<16x2xf32>
    %cst_59 = arith.constant dense<0.000000e+00> : vector<2x2xf32>
    %62 = tpu.matmul %60, %61, %cst_59 {dimension_numbers = #tpu.dot_dimension_numbers<[1], [0], [0], [1], [0, 0, 1, 1], [], []>} : vector<2x16xf32>, vector<16x2xf32>, vector<2x2xf32> -> vector<2x2xf32>
    %cst_60 = arith.constant 0.000000e+00 : f32
    %63 = vector.broadcast %cst_60 : f32 to vector<2x2xf32>
    %64 = arith.maximumf %62, %63 : vector<2x2xf32>
    %65 = vector.extract_strided_slice %64 {offsets = [0, 0], sizes = [1, 2], strides = [1, 1]} : vector<2x2xf32> to vector<1x2xf32>
    %66 = vector.extract_strided_slice %64 {offsets = [1, 0], sizes = [1, 2], strides = [1, 1]} : vector<2x2xf32> to vector<1x2xf32>
    %67 = arith.addf %65, %66 : vector<1x2xf32>
    %c0_61 = arith.constant 0 : index
    %c0_62 = arith.constant 0 : index
    %68 = vector.load %arg7[%c0_61, %c0_62] : memref<2x128xf32, #tpu.memory_space<vmem>>, vector<2x128xf32>
    %cst_63 = arith.constant dense<0.000000e+00> : vector<1x128xf32>
    %69 = tpu.matmul %67, %68, %cst_63 {dimension_numbers = #tpu.dot_dimension_numbers<[1], [0], [0], [1], [0, 0, 1, 1], [], []>} : vector<1x2xf32>, vector<2x128xf32>, vector<1x128xf32> -> vector<1x128xf32>
    %cst_64 = arith.constant 0.000000e+00 : f32
    %70 = vector.broadcast %cst_64 : f32 to vector<1x128xf32>
    %71 = arith.subf %70, %69 : vector<1x128xf32>
    %72 = math.exp %71 : vector<1x128xf32>
    %cst_65 = arith.constant 1.000000e+00 : f32
    %73 = vector.broadcast %cst_65 : f32 to vector<1x128xf32>
    %74 = arith.addf %73, %72 : vector<1x128xf32>
    %75 = tpu.reciprocal %74 {approx = true} : vector<1x128xf32> -> vector<1x128xf32>
    %76 = vector.shape_cast %54 : vector<8x128xf32> to vector<1x8x128xf32>
    %77 = vector.shape_cast %75 : vector<1x128xf32> to vector<1x1x128xf32>
    %78 = vector.broadcast %77 : vector<1x1x128xf32> to vector<1x8x128xf32>
    %79 = arith.mulf %76, %78 : vector<1x8x128xf32>
    %80 = vector.shape_cast %79 : vector<1x8x128xf32> to vector<1x8x8x16xf32>
    %cst_66 = arith.constant dense<0.000000e+00> : vector<1x8x8xf32>
    %81 = vector.multi_reduction <add>, %80, %cst_66 [3] : vector<1x8x8x16xf32> to vector<1x8x8xf32>
    %cst_67 = arith.constant 1.600000e+01 : f32
    %82 = vector.broadcast %cst_67 : f32 to vector<1x8x8xf32>
    %83 = arith.divf %81, %82 : vector<1x8x8xf32>
    %cst_68 = arith.constant dense<0xFF800000> : vector<1x8x8xf32>
    %84 = vector.multi_reduction <maximumf>, %80, %cst_68 [3] : vector<1x8x8x16xf32> to vector<1x8x8xf32>
    %85 = vector.shape_cast %83 : vector<1x8x8xf32> to vector<1x8x8x1xf32>
    %86 = vector.shape_cast %84 : vector<1x8x8xf32> to vector<1x8x8x1xf32>
    %87 = tpu.concatenate %85, %86 in 3 : vector<1x8x8x1xf32>, vector<1x8x8x1xf32> -> vector<1x8x8x2xf32>
    %88 = vector.shape_cast %87 : vector<1x8x8x2xf32> to vector<1x8x16xf32>
    %cst_69 = arith.constant 0.000000e+00 : f32
    %89 = vector.broadcast %cst_69 : f32 to vector<1x14x28xf32>
    %c0_70 = arith.constant 0 : index
    %c0_71 = arith.constant 0 : index
    %c0_72 = arith.constant 0 : index
    %90 = vector.load %arg11[%c0_70, %c0_71, %c0_72] : memref<1x14x28xf32, #tpu.memory_space<vmem>>, vector<1x14x28xf32>
    tpu.vector_store %arg11[%c0_70, %c0_71, %c0_72], %89 {strides = array<i32>} : memref<1x14x28xf32, #tpu.memory_space<vmem>>, vector<1x14x28xf32>,
    %c0_73 = arith.constant 0 : index
    %c3 = arith.constant 3 : index
    %c6 = arith.constant 6 : index
    %91 = vector.load %arg11[%c0_73, %c3, %c6] : memref<1x14x28xf32, #tpu.memory_space<vmem>>, vector<1x8x16xf32>
    tpu.vector_store %arg11[%c0_73, %c3, %c6], %88 {strides = array<i32>} : memref<1x14x28xf32, #tpu.memory_space<vmem>>, vector<1x8x16xf32>,
    %c0_74 = arith.constant 0 : index
    %c0_75 = arith.constant 0 : index
    %c0_76 = arith.constant 0 : index
    %92 = vector.load %arg11[%c0_74, %c0_75, %c0_76] : memref<1x14x28xf32, #tpu.memory_space<vmem>>, vector<1x8x28xf32>
    %c0_77 = arith.constant 0 : index
    %c1_78 = arith.constant 1 : index
    %c0_79 = arith.constant 0 : index
    %93 = vector.load %arg11[%c0_77, %c1_78, %c0_79] : memref<1x14x28xf32, #tpu.memory_space<vmem>>, vector<1x8x28xf32>
    %c0_80 = arith.constant 0 : index
    %c2_81 = arith.constant 2 : index
    %c0_82 = arith.constant 0 : index
    %94 = vector.load %arg11[%c0_80, %c2_81, %c0_82] : memref<1x14x28xf32, #tpu.memory_space<vmem>>, vector<1x8x28xf32>
    %c0_83 = arith.constant 0 : index
    %c3_84 = arith.constant 3 : index
    %c0_85 = arith.constant 0 : index
    %95 = vector.load %arg11[%c0_83, %c3_84, %c0_85] : memref<1x14x28xf32, #tpu.memory_space<vmem>>, vector<1x8x28xf32>
    %c0_86 = arith.constant 0 : index
    %c4 = arith.constant 4 : index
    %c0_87 = arith.constant 0 : index
    %96 = vector.load %arg11[%c0_86, %c4, %c0_87] : memref<1x14x28xf32, #tpu.memory_space<vmem>>, vector<1x8x28xf32>
    %c0_88 = arith.constant 0 : index
    %c5 = arith.constant 5 : index
    %c0_89 = arith.constant 0 : index
    %97 = vector.load %arg11[%c0_88, %c5, %c0_89] : memref<1x14x28xf32, #tpu.memory_space<vmem>>, vector<1x8x28xf32>
    %c0_90 = arith.constant 0 : index
    %c6_91 = arith.constant 6 : index
    %c0_92 = arith.constant 0 : index
    %98 = vector.load %arg11[%c0_90, %c6_91, %c0_92] : memref<1x14x28xf32, #tpu.memory_space<vmem>>, vector<1x8x28xf32>
    %99 = tpu.concatenate %92, %93, %94, %95, %96, %97, %98 in 2 : vector<1x8x28xf32>, vector<1x8x28xf32>, vector<1x8x28xf32>, vector<1x8x28xf32>, vector<1x8x28xf32>, vector<1x8x28xf32>, vector<1x8x28xf32> -> vector<1x8x196xf32>
    %100 = vector.shape_cast %99 : vector<1x8x196xf32> to vector<8x196xf32>
    %101 = arith.truncf %100 : vector<8x196xf32> to vector<8x196xbf16>
    %c0_93 = arith.constant 0 : index
    %c0_94 = arith.constant 0 : index
    %102 = vector.load %arg8[%c0_93, %c0_94] : memref<196x128xbf16, #tpu.memory_space<vmem>>, vector<196x128xbf16>
    %cst_95 = arith.constant dense<0.000000e+00> : vector<8x128xf32>
    %103 = tpu.matmul %101, %102, %cst_95 {dimension_numbers = #tpu.dot_dimension_numbers<[1], [0], [0], [1], [0, 0, 1, 1], [], []>} : vector<8x196xbf16>, vector<196x128xbf16>, vector<8x128xf32> -> vector<8x128xf32>
    %cst_96 = arith.constant 0.000000e+00 : f32
    %104 = vector.broadcast %cst_96 : f32 to vector<8x128xf32>
    %105 = arith.subf %104, %103 : vector<8x128xf32>
    %106 = math.exp %105 : vector<8x128xf32>
    %cst_97 = arith.constant 1.000000e+00 : f32
    %107 = vector.broadcast %cst_97 : f32 to vector<8x128xf32>
    %108 = arith.addf %107, %106 : vector<8x128xf32>
    %109 = tpu.reciprocal %108 {approx = true} : vector<8x128xf32> -> vector<8x128xf32>
    %110 = vector.shape_cast %109 : vector<8x128xf32> to vector<1x8x128xf32>
    %111 = arith.mulf %79, %110 : vector<1x8x128xf32>
    %112 = vector.shape_cast %26 : vector<8x128xf32> to vector<1x8x128xf32>
    %113 = arith.addf %111, %112 : vector<1x8x128xf32>
    %cst_98 = arith.constant 0.000000e+00 : f32
    %114 = vector.broadcast %cst_98 : f32 to vector<1x8x128xf32>
    %115 = arith.maximumf %113, %114 : vector<1x8x128xf32>
    %c0_99 = arith.constant 0 : index
    %c0_100 = arith.constant 0 : index
    %c0_101 = arith.constant 0 : index
    %116 = vector.load %arg9[%c0_99, %c0_100, %c0_101] : memref<1x8x128xf32, #tpu.memory_space<vmem>>, vector<1x8x128xf32>
    tpu.vector_store %arg9[%c0_99, %c0_100, %c0_101], %115 {strides = array<i32>} : memref<1x8x128xf32, #tpu.memory_space<vmem>>, vector<1x8x128xf32>,
    return
  }
  func.func @transform_0(%arg0: i32) -> (i32, i32, i32) {
    %c0_i32 = arith.constant 0 : i32
    %c0_i32_0 = arith.constant 0 : i32
    %c0_i32_1 = arith.constant 0 : i32
    return %arg0, %c0_i32, %c0_i32_0 : i32, i32, i32
  }
  func.func @transform_1(%arg0: i32) -> (i32, i32, i32) {
    %c0_i32 = arith.constant 0 : i32
    %c0_i32_0 = arith.constant 0 : i32
    %c0_i32_1 = arith.constant 0 : i32
    return %arg0, %c0_i32, %c0_i32_0 : i32, i32, i32
  }
  func.func @transform_2(%arg0: i32) -> (i32, i32, i32) {
    %c0_i32 = arith.constant 0 : i32
    %c0_i32_0 = arith.constant 0 : i32
    %c0_i32_1 = arith.constant 0 : i32
    %c0_i32_2 = arith.constant 0 : i32
    return %c0_i32, %c0_i32_0, %c0_i32_1 : i32, i32, i32
  }
  func.func @transform_3(%arg0: i32) -> (i32, i32, i32) {
    %c0_i32 = arith.constant 0 : i32
    %c0_i32_0 = arith.constant 0 : i32
    %c0_i32_1 = arith.constant 0 : i32
    %c0_i32_2 = arith.constant 0 : i32
    return %c0_i32, %c0_i32_0, %c0_i32_1 : i32, i32, i32
  }
  func.func @transform_4(%arg0: i32) -> (i32, i32) {
    %c0_i32 = arith.constant 0 : i32
    %c0_i32_0 = arith.constant 0 : i32
    %c0_i32_1 = arith.constant 0 : i32
    return %c0_i32, %c0_i32_0 : i32, i32
  }
  func.func @transform_5(%arg0: i32) -> (i32, i32) {
    %c0_i32 = arith.constant 0 : i32
    %c0_i32_0 = arith.constant 0 : i32
    %c0_i32_1 = arith.constant 0 : i32
    return %c0_i32, %c0_i32_0 : i32, i32
  }
  func.func @transform_6(%arg0: i32) -> (i32, i32) {
    %c0_i32 = arith.constant 0 : i32
    %c0_i32_0 = arith.constant 0 : i32
    %c0_i32_1 = arith.constant 0 : i32
    return %c0_i32, %c0_i32_0 : i32, i32
  }
  func.func @transform_7(%arg0: i32) -> (i32, i32) {
    %c0_i32 = arith.constant 0 : i32
    %c0_i32_0 = arith.constant 0 : i32
    %c0_i32_1 = arith.constant 0 : i32
    return %c0_i32, %c0_i32_0 : i32, i32
  }
  func.func @transform_8(%arg0: i32) -> (i32, i32, i32) {
    %c0_i32 = arith.constant 0 : i32
    %c0_i32_0 = arith.constant 0 : i32
    %c0_i32_1 = arith.constant 0 : i32
    return %arg0, %c0_i32, %c0_i32_0 : i32, i32, i32
  }
}

</mosaic_0001>

<bundles_post_ra>
// kernel: squeeze.2
= control target key start
LH: loop header
LB: loop body
LE: loop exit
PB: predicated region body
PF: predicated region fallthrough
CT: control target
= control target key end

     0   :  { %vm2164_vm0 = vcmask 1047556   ;;  %s4720_s11 = smov 112   ;;  %s4721_s28 = smov 96   ;;  %vm2166_vm1 = vcmask 130048   ;;  %vm2329_vm2 = vcmask 1048448   ;;  %vm2526_vm3 = vcmask 917248   ;;  %s5399_s0 = inlined_call_operand.vmem [shape: bf16[1,18,8,8,16], index: 0, kind: input, shape index: {}]   ;;  %s5400_s1 = inlined_call_operand.vmem [shape: bf16[144,128], index: 1, kind: output, shape index: {}]  }
   0x1   :  { %v4371_v0 = vld [vmem:[%s5399_s0 + $0x98] sm:$0xff]   ;;  %v4372_v1 = vld [vmem:[%s5399_s0 + $0x90] sm:$0xff]   ;;  %v4373_v2 = vld [vmem:[%s5399_s0 + $0x88] sm:$0xff]   ;;  %s4722_s5 = smov 80   ;;  %s4726_s13 = smov 16   ;;  %vm2723_vm4 = vcmask 786048  }
   0x2   :  { %v4196_v3 = vunpack.c.l.bf16 %v4371_v0  ;;  %v4197_v4 = vunpack.c.h.bf16 %v4371_v0  ;;  %v4201_v5 = vunpack.c.h.bf16 %v4372_v1  ;;  %v4200_v6 = vunpack.c.l.bf16 %v4372_v1  ;;  %v4374_v7 = vld [vmem:[%s5399_s0 + $0x80] sm:$0xff]   ;;  %v4387_v10 = vld [vmem:[%s5399_s0 + $0x18] sm:$0xff]   ;;  %v4388_v13 = vld [vmem:[%s5399_s0 + $0x10] sm:$0xff]  }
   0x3   :  { %v4205_v8 = vunpack.c.h.bf16 %v4373_v2  ;;  %v4204_v9 = vunpack.c.l.bf16 %v4373_v2  ;;  %v4209_v11 = vunpack.c.h.bf16 %v4374_v7  ;;  %v4208_v12 = vunpack.c.l.bf16 %v4374_v7  ;;  %v4389_v16 = vld [vmem:[%s5399_s0 + $0x8] sm:$0xff]   ;;  %v4271_v19 = vld [vmem:[%s5399_s0] sm:$0xff]   ;;  %v4323_v22 = vld [vmem:[%s5399_s0 + $0x218] sm:$0xff]  }
   0x4   :  { %1578 = vst [vmem:[#allocation1 + $0x138] sm:$0xff] %v4197_v4  ;;  %v4261_v14 = vunpack.c.h.bf16 %v4387_v10  ;;  %v4260_v15 = vunpack.c.l.bf16 %v4387_v10  ;;  %v4265_v17 = vunpack.c.h.bf16 %v4388_v13  ;;  %v4264_v18 = vunpack.c.l.bf16 %v4388_v13  ;;  %v4324_v25 = vld [vmem:[%s5399_s0 + $0x210] sm:$0xff]   ;;  %v4325_v28 = vld [vmem:[%s5399_s0 + $0x208] sm:$0xff]   ;;  %v4326_v31 = vld [vmem:[%s5399_s0 + $0x200] sm:$0xff]  }
   0x5   :  { %1593 = vst [vmem:[#allocation1 + $0x130] sm:$0xff] %v4196_v3  ;;  %v4269_v20 = vunpack.c.h.bf16 %v4389_v16  ;;  %v4268_v21 = vunpack.c.l.bf16 %v4389_v16  ;;  %v4273_v23 = vunpack.c.h.bf16 %v4271_v19  ;;  %v4272_v24 = vunpack.c.l.bf16 %v4271_v19  ;;  %v4383_v35 = vld [vmem:[%s5399_s0 + $0x38] sm:$0xff]   ;;  %v4384_v39 = vld [vmem:[%s5399_s0 + $0x30] sm:$0xff]   ;;  %v4385_v44 = vld [vmem:[%s5399_s0 + $0x28] sm:$0xff]  }
   0x6   :  { %1608 = vst [vmem:[#allocation1 + $0x128] sm:$0xff] %v4201_v5  ;;  %v4005_v26 = vunpack.c.h.bf16 %v4323_v22  ;;  %v4004_v27 = vunpack.c.l.bf16 %v4323_v22  ;;  %v4009_v29 = vunpack.c.h.bf16 %v4324_v25  ;;  %v4008_v30 = vunpack.c.l.bf16 %v4324_v25  ;;  %v4386_v49 = vld [vmem:[%s5399_s0 + $0x20] sm:$0xff]   ;;  %v4339_v53 = vld [vmem:[%s5399_s0 + $0x198] sm:$0xff]   ;;  %v4340_v56 = vld [vmem:[%s5399_s0 + $0x190] sm:$0xff]  }
   0x7   :  { %1623 = vst [vmem:[#allocation1 + $0x120] sm:$0xff] %v4200_v6  ;;  %v4013_v32 = vunpack.c.h.bf16 %v4325_v28  ;;  %v4012_v34 = vunpack.c.l.bf16 %v4325_v28  ;;  %v4017_v37 = vunpack.c.h.bf16 %v4326_v31  ;;  %v4016_v38 = vunpack.c.l.bf16 %v4326_v31  ;;  %v4341_v59 = vld [vmem:[%s5399_s0 + $0x188] sm:$0xff]   ;;  %v4342_v62 = vld [vmem:[%s5399_s0 + $0x180] sm:$0xff]   ;;  %v4355_v2 = vld [vmem:[%s5399_s0 + $0x118] sm:$0xff]  }
   0x8   :  { %1638 = vst [vmem:[#allocation1 + $0x118] sm:$0xff] %v4205_v8  ;;  %v4245_v41 = vunpack.c.h.bf16 %v4383_v35  ;;  %v4244_v43 = vunpack.c.l.bf16 %v4383_v35  ;;  %v4249_v46 = vunpack.c.h.bf16 %v4384_v39  ;;  %v4248_v48 = vunpack.c.l.bf16 %v4384_v39  ;;  %v4356_v6 = vld [vmem:[%s5399_s0 + $0x110] sm:$0xff]   ;;  %v4358_v16 = vld [vmem:[%s5399_s0 + $0x100] sm:$0xff]  }
   0x9   :  { %1653 = vst [vmem:[#allocation1 + $0x110] sm:$0xff] %v4204_v9  ;;  %v4253_v51 = vunpack.c.h.bf16 %v4385_v44  ;;  %v4252_v52 = vunpack.c.l.bf16 %v4385_v44  ;;  %v4257_v54 = vunpack.c.h.bf16 %v4386_v49  ;;  %v4256_v55 = vunpack.c.l.bf16 %v4386_v49 }
   0xa   :  { %1668 = vst [vmem:[#allocation1 + $0x108] sm:$0xff] %v4209_v11  ;;  %v4069_v57 = vunpack.c.h.bf16 %v4339_v53  ;;  %v4068_v58 = vunpack.c.l.bf16 %v4339_v53  ;;  %v4073_v60 = vunpack.c.h.bf16 %v4340_v56  ;;  %v4072_v61 = vunpack.c.l.bf16 %v4340_v56  ;;  %v4357_v11 = vld [vmem:[%s5399_s0 + $0x108] sm:$0xff]  }
   0xb   :  { %1683 = vst [vmem:[#allocation1 + $0x100] sm:$0xff] %v4208_v12  ;;  %v4077_v63 = vunpack.c.h.bf16 %v4341_v59  ;;  %v4076_v1 = vunpack.c.l.bf16 %v4341_v59  ;;  %v4081_v4 = vunpack.c.h.bf16 %v4342_v62  ;;  %v4080_v5 = vunpack.c.l.bf16 %v4342_v62 }
   0xc   :  { %2058 = vst [vmem:[#allocation1 + $0x38] sm:$0xff] %v4261_v14  ;;  %v4133_v8 = vunpack.c.h.bf16 %v4355_v2  ;;  %v4132_v10 = vunpack.c.l.bf16 %v4355_v2  ;;  %v4137_v13 = vunpack.c.h.bf16 %v4356_v6  ;;  %v4140_v19 = vunpack.c.l.bf16 %v4357_v11 }
   0xd   :  { %2073 = vst [vmem:[#allocation1 + $0x30] sm:$0xff] %v4260_v15  ;;  %v4136_v15 = vunpack.c.l.bf16 %v4356_v6  ;;  %v4144_v22 = vunpack.c.l.bf16 %v4358_v16  ;;  %vm2920_vm5 = vcmask 654848   ;;  %vm3117_vm6 = vcmask 523648  }
   0xe   :  { %2088 = vst [vmem:[#allocation1 + $0x28] sm:$0xff] %v4265_v17  ;;  %v2334_v33 = vld [vmem:[#allocation1 + $0x107] ss:$8 sm:$0xf0]   ;;  %vm3314_vm7 = vcmask 392448   ;;  %vm3511_vm8 = vcmask 261248  }
   0xf   :  { %2103 = vst [vmem:[#allocation1 + $0x20] sm:$0xff] %v4264_v18  ;;  %v4141_v18 = vunpack.c.h.bf16 %v4357_v11 }
  0x10   :  { %2118 = vst [vmem:[#allocation1 + $0x18] sm:$0xff] %v4269_v20  ;;  %v4351_v20 = vld [vmem:[%s5399_s0 + $0x138] sm:$0xff]  }
  0x11   :  { %2133 = vst [vmem:[#allocation1 + $0x10] sm:$0xff] %v4268_v21  ;;  %v4145_v21 = vunpack.c.h.bf16 %v4358_v16  ;;  %v4116_v25 = vunpack.c.l.bf16 %v4351_v20 }
  0x12   :  { %2148 = vst [vmem:[#allocation1 + $0x8] sm:$0xff] %v4273_v23  ;;  %v2332_v36 = vld [vmem:[#allocation1 + $0x107] ss:$8 sm:$0xf]  }
  0x13   :  { %2161 = vst [vmem:[#allocation1] sm:$0xff] %v4272_v24  ;;  %v2336_v42 = vsel %vm2164_vm0, %v2334_v33, %v2332_v36  ;;  %v4352_v23 = vld [vmem:[%s5399_s0 + $0x130] sm:$0xff]   ;;  %v4117_v24 = vunpack.c.h.bf16 %v4351_v20  ;;  %v4367_v33 = vld [vmem:[%s5399_s0 + $0xb8] sm:$0xff]  }
  0x14   :  { %138 = vst [vmem:[#allocation1 + $0x438] sm:$0xff] %v4005_v26  ;;  %v4353_v26 = vld [vmem:[%s5399_s0 + $0x128] sm:$0xff]   ;;  %v4120_v28 = vunpack.c.l.bf16 %v4352_v23  ;;  %v4181_v39 = vunpack.c.h.bf16 %v4367_v33 }
  0x15   :  { %153 = vst [vmem:[#allocation1 + $0x430] sm:$0xff] %v4004_v27  ;;  %v4121_v27 = vunpack.c.h.bf16 %v4352_v23 }
  0x16   :  { %168 = vst [vmem:[#allocation1 + $0x428] sm:$0xff] %v4009_v29  ;;  %v2324_v40 = vld [vmem:[#allocation1 + $0x7] ss:$8 sm:$0xf0]  }
  0x17   :  { %183 = vst [vmem:[#allocation1 + $0x420] sm:$0xff] %v4008_v30  ;;  %v4354_v29 = vld [vmem:[%s5399_s0 + $0x120] sm:$0xff]   ;;  %v4125_v30 = vunpack.c.h.bf16 %v4353_v26 }
  0x18   :  { %198 = vst [vmem:[#allocation1 + $0x418] sm:$0xff] %v4013_v32  ;;  %v4124_v32 = vunpack.c.l.bf16 %v4353_v26  ;;  %v4129_v35 = vunpack.c.h.bf16 %v4354_v29  ;;  %v4128_v36 = vunpack.c.l.bf16 %v4354_v29 }
  0x19   :  { %213 = vst [vmem:[#allocation1 + $0x410] sm:$0xff] %v4012_v34 }
  0x1a   :  { %v2322_v45 = vld [vmem:[#allocation1 + $0x7] ss:$8 sm:$0xf]   ;;  %228 = vst [vmem:[#allocation1 + $0x408] sm:$0xff] %v4017_v37 }
  0x1b   :  { %v2326_v47 = vsel %vm2164_vm0, %v2324_v40, %v2322_v45  ;;  %243 = vst [vmem:[#allocation1 + $0x400] sm:$0xff] %v4016_v38  ;;  %v4368_v37 = vld [vmem:[%s5399_s0 + $0xb0] sm:$0xff]  }
  0x1c   :  { %v4405_v50 = vpack.i.bf16 %v2336_v42, %v2326_v47  ;;  %1938 = vst [vmem:[#allocation1 + $0x78] sm:$0xff] %v4245_v41  ;;  %v4180_v41 = vunpack.c.l.bf16 %v4367_v33  ;;  %v4369_v42 = vld [vmem:[%s5399_s0 + $0xa8] sm:$0xff]   ;;  %v4185_v44 = vunpack.c.h.bf16 %v4368_v37  ;;  %v4370_v47 = vld [vmem:[%s5399_s0 + $0xa0] sm:$0xff]  }
  0x1d   :  { %1953 = vst [vmem:[#allocation1 + $0x70] sm:$0xff] %v4244_v43  ;;  %v4189_v49 = vunpack.c.h.bf16 %v4369_v42  ;;  %v4192_v53 = vunpack.c.l.bf16 %v4370_v47 }
  0x1e   :  { %4406 = vrot.lane.b32.xlu0 %v4405_v50, %s4720_s11  ;;  %1968 = vst [vmem:[#allocation1 + $0x68] sm:$0xff] %v4249_v46  ;;  %v2367_v0 = vld [vmem:[#allocation1 + $0x407] ss:$8 sm:$0xf0]   ;;  %v4184_v46 = vunpack.c.l.bf16 %v4368_v37  ;;  %v4188_v50 = vunpack.c.l.bf16 %v4369_v42 }
  0x1f   :  { %1983 = vst [vmem:[#allocation1 + $0x60] sm:$0xff] %v4248_v48 }
  0x20   :  { %1998 = vst [vmem:[#allocation1 + $0x58] sm:$0xff] %v4253_v51  ;;  %v4331_v51 = vld [vmem:[%s5399_s0 + $0x1d8] sm:$0xff]  }
  0x21   :  { %2013 = vst [vmem:[#allocation1 + $0x50] sm:$0xff] %v4252_v52  ;;  %v4193_v52 = vunpack.c.h.bf16 %v4370_v47  ;;  %v4036_v56 = vunpack.c.l.bf16 %v4331_v51  ;;  %v4378_v47 = vld [vmem:[%s5399_s0 + $0x60] sm:$0xff]  }
  0x22   :  { %2028 = vst [vmem:[#allocation1 + $0x48] sm:$0xff] %v4257_v54  ;;  %v2365_v3 = vld [vmem:[#allocation1 + $0x407] ss:$8 sm:$0xf]  }
  0x23   :  { %2043 = vst [vmem:[#allocation1 + $0x40] sm:$0xff] %v4256_v55  ;;  %v2369_v9 = vsel %vm2164_vm0, %v2367_v0, %v2365_v3  ;;  %v4332_v54 = vld [vmem:[%s5399_s0 + $0x1d0] sm:$0xff]   ;;  %v4037_v55 = vunpack.c.h.bf16 %v4331_v51  ;;  %v4347_v0 = vld [vmem:[%s5399_s0 + $0x158] sm:$0xff]  }
  0x24   :  { %618 = vst [vmem:[#allocation1 + $0x338] sm:$0xff] %v4069_v57  ;;  %v4333_v57 = vld [vmem:[%s5399_s0 + $0x1c8] sm:$0xff]   ;;  %v4040_v59 = vunpack.c.l.bf16 %v4332_v54  ;;  %v4101_v6 = vunpack.c.h.bf16 %v4347_v0 }
  0x25   :  { %633 = vst [vmem:[#allocation1 + $0x330] sm:$0xff] %v4068_v58  ;;  %v4041_v58 = vunpack.c.h.bf16 %v4332_v54  ;;  %v2531_v51 = vld [vmem:[#allocation1 + $0x106] ss:$8 sm:$0xf0]   ;;  %v4225_v54 = vunpack.c.h.bf16 %v4378_v47 }
  0x26   :  { %648 = vst [vmem:[#allocation1 + $0x328] sm:$0xff] %v4073_v60  ;;  %v2378_v7 = vld [vmem:[#allocation1 + $0x47] ss:$8 sm:$0xf0]  }
  0x27   :  { %663 = vst [vmem:[#allocation1 + $0x320] sm:$0xff] %v4072_v61  ;;  %v4334_v60 = vld [vmem:[%s5399_s0 + $0x1c0] sm:$0xff]   ;;  %v4045_v61 = vunpack.c.h.bf16 %v4333_v57 }
  0x28   :  { %678 = vst [vmem:[#allocation1 + $0x318] sm:$0xff] %v4077_v63  ;;  %v4044_v63 = vunpack.c.l.bf16 %v4333_v57  ;;  %v4049_v2 = vunpack.c.h.bf16 %v4334_v60  ;;  %v4048_v3 = vunpack.c.l.bf16 %v4334_v60 }
  0x29   :  { %693 = vst [vmem:[#allocation1 + $0x310] sm:$0xff] %v4076_v1 }
  0x2a   :  { %v2376_v12 = vld [vmem:[#allocation1 + $0x47] ss:$8 sm:$0xf]   ;;  %708 = vst [vmem:[#allocation1 + $0x308] sm:$0xff] %v4081_v4 }
  0x2b   :  { %v2380_v14 = vsel %vm2164_vm0, %v2378_v7, %v2376_v12  ;;  %723 = vst [vmem:[#allocation1 + $0x300] sm:$0xff] %v4080_v5  ;;  %v4348_v4 = vld [vmem:[%s5399_s0 + $0x150] sm:$0xff]  }
  0x2c   :  { %v4415_v17 = vpack.i.bf16 %v2380_v14, %v2369_v9  ;;  %1098 = vst [vmem:[#allocation1 + $0x238] sm:$0xff] %v4133_v8  ;;  %v4100_v8 = vunpack.c.l.bf16 %v4347_v0  ;;  %v4349_v9 = vld [vmem:[%s5399_s0 + $0x148] sm:$0xff]   ;;  %v4105_v11 = vunpack.c.h.bf16 %v4348_v4  ;;  %v4350_v14 = vld [vmem:[%s5399_s0 + $0x140] sm:$0xff]  }
  0x2d   :  { %1113 = vst [vmem:[#allocation1 + $0x230] sm:$0xff] %v4132_v10  ;;  %v4109_v16 = vunpack.c.h.bf16 %v4349_v9  ;;  %v4112_v20 = vunpack.c.l.bf16 %v4350_v14 }
  0x2e   :  { %4416 = vrot.lane.b32.xlu1 %v4415_v17, %s4720_s11  ;;  %1128 = vst [vmem:[#allocation1 + $0x228] sm:$0xff] %v4137_v13  ;;  %v2356_v31 = vld [vmem:[#allocation1 + $0x307] ss:$8 sm:$0xf0]   ;;  %v4104_v13 = vunpack.c.l.bf16 %v4348_v4  ;;  %v4108_v17 = vunpack.c.l.bf16 %v4349_v9 }
  0x2f   :  { %1143 = vst [vmem:[#allocation1 + $0x220] sm:$0xff] %v4136_v15  ;;  %v4335_v9 = vld [vmem:[%s5399_s0 + $0x1b8] sm:$0xff]  }
  0x30   :  { %1158 = vst [vmem:[#allocation1 + $0x218] sm:$0xff] %v4141_v18  ;;  %v4359_v18 = vld [vmem:[%s5399_s0 + $0xf8] sm:$0xff]  }
  0x31   :  { %1173 = vst [vmem:[#allocation1 + $0x210] sm:$0xff] %v4140_v19  ;;  %v4113_v19 = vunpack.c.h.bf16 %v4350_v14  ;;  %v4148_v23 = vunpack.c.l.bf16 %v4359_v18 }
  0x32   :  { %1188 = vst [vmem:[#allocation1 + $0x208] sm:$0xff] %v4145_v21  ;;  %v2354_v34 = vld [vmem:[#allocation1 + $0x307] ss:$8 sm:$0xf]  }
  0x33   :  { %1203 = vst [vmem:[#allocation1 + $0x200] sm:$0xff] %v4144_v22  ;;  %v2358_v40 = vsel %vm2164_vm0, %v2356_v31, %v2354_v34  ;;  %v4360_v21 = vld [vmem:[%s5399_s0 + $0xf0] sm:$0xff]   ;;  %v4149_v22 = vunpack.c.h.bf16 %v4359_v18  ;;  %v4375_v31 = vld [vmem:[%s5399_s0 + $0x78] sm:$0xff]  }
  0x34   :  { %978 = vst [vmem:[#allocation1 + $0x278] sm:$0xff] %v4117_v24  ;;  %v4361_v24 = vld [vmem:[%s5399_s0 + $0xe8] sm:$0xff]   ;;  %v4152_v26 = vunpack.c.l.bf16 %v4360_v21  ;;  %v4213_v37 = vunpack.c.h.bf16 %v4375_v31 }
  0x35   :  { %993 = vst [vmem:[#allocation1 + $0x270] sm:$0xff] %v4116_v25  ;;  %v4153_v25 = vunpack.c.h.bf16 %v4360_v21 }
  0x36   :  { %1008 = vst [vmem:[#allocation1 + $0x268] sm:$0xff] %v4121_v27  ;;  %v2345_v38 = vld [vmem:[#allocation1 + $0x207] ss:$8 sm:$0xf0]  }
  0x37   :  { %1023 = vst [vmem:[#allocation1 + $0x260] sm:$0xff] %v4120_v28  ;;  %v4362_v27 = vld [vmem:[%s5399_s0 + $0xe0] sm:$0xff]   ;;  %v4157_v28 = vunpack.c.h.bf16 %v4361_v24 }
  0x38   :  { %1038 = vst [vmem:[#allocation1 + $0x258] sm:$0xff] %v4125_v30  ;;  %v4156_v30 = vunpack.c.l.bf16 %v4361_v24  ;;  %v4161_v33 = vunpack.c.h.bf16 %v4362_v27  ;;  %v4160_v34 = vunpack.c.l.bf16 %v4362_v27  ;;  %v2551_v27 = vld [vmem:[#allocation1 + $0x306] ss:$8 sm:$0xf]  }
  0x39   :  { %1053 = vst [vmem:[#allocation1 + $0x250] sm:$0xff] %v4124_v32 }
  0x3a   :  { %v2343_v43 = vld [vmem:[#allocation1 + $0x207] ss:$8 sm:$0xf]   ;;  %1068 = vst [vmem:[#allocation1 + $0x248] sm:$0xff] %v4129_v35 }
  0x3b   :  { %v2347_v45 = vsel %vm2164_vm0, %v2345_v38, %v2343_v43  ;;  %1083 = vst [vmem:[#allocation1 + $0x240] sm:$0xff] %v4128_v36  ;;  %v4376_v35 = vld [vmem:[%s5399_s0 + $0x70] sm:$0xff]  }
  0x3c   :  { %v4410_v48 = vpack.i.bf16 %v2358_v40, %v2347_v45  ;;  %1458 = vst [vmem:[#allocation1 + $0x178] sm:$0xff] %v4181_v39  ;;  %v4212_v39 = vunpack.c.l.bf16 %v4375_v31  ;;  %v4377_v40 = vld [vmem:[%s5399_s0 + $0x68] sm:$0xff]   ;;  %v4217_v42 = vunpack.c.h.bf16 %v4376_v35 }
  0x3d   :  { %1473 = vst [vmem:[#allocation1 + $0x170] sm:$0xff] %v4180_v41  ;;  %v2519_v43 = vld [vmem:[#allocation1 + $0x6] ss:$8 sm:$0xf]  }
  0x3e   :  { %4411 = vrot.lane.b32.xlu0 %v4410_v48, %s4720_s11  ;;  %1488 = vst [vmem:[#allocation1 + $0x168] sm:$0xff] %v4185_v44  ;;  %v2400_v62 = vld [vmem:[#allocation1 + $0x247] ss:$8 sm:$0xf0]  }
  0x3f   :  { %1503 = vst [vmem:[#allocation1 + $0x160] sm:$0xff] %v4184_v46  ;;  %v2521_v44 = vld [vmem:[#allocation1 + $0x6] ss:$8 sm:$0xf0]   ;;  %v4216_v46 = vunpack.c.l.bf16 %v4376_v35 }
  0x40   :  { %1518 = vst [vmem:[#allocation1 + $0x158] sm:$0xff] %v4189_v49  ;;  %v2529_v48 = vld [vmem:[#allocation1 + $0x106] ss:$8 sm:$0xf]  }
  0x41   :  { %1533 = vst [vmem:[#allocation1 + $0x150] sm:$0xff] %v4188_v50  ;;  %v4221_v50 = vunpack.c.h.bf16 %v4377_v40  ;;  %v2533_v57 = vsel %vm2164_vm0, %v2531_v51, %v2529_v48  ;;  %v2553_v31 = vld [vmem:[#allocation1 + $0x306] ss:$8 sm:$0xf0]  }
  0x42   :  { %1548 = vst [vmem:[#allocation1 + $0x148] sm:$0xff] %v4193_v52  ;;  %v2398_v1 = vld [vmem:[#allocation1 + $0x247] ss:$8 sm:$0xf]   ;;  %v4220_v52 = vunpack.c.l.bf16 %v4377_v40 }
  0x43   :  { %1563 = vst [vmem:[#allocation1 + $0x140] sm:$0xff] %v4192_v53  ;;  %v2402_v7 = vsel %vm2164_vm0, %v2400_v62, %v2398_v1  ;;  %v4319_v53 = vld [vmem:[%s5399_s0 + $0x238] sm:$0xff]   ;;  %v4364_v40 = vld [vmem:[%s5399_s0 + $0xd0] sm:$0xff]  }
  0x44   :  { %378 = vst [vmem:[#allocation1 + $0x3b8] sm:$0xff] %v4037_v55  ;;  %v4224_v55 = vunpack.c.l.bf16 %v4378_v47  ;;  %v3988_v60 = vunpack.c.l.bf16 %v4319_v53  ;;  %v2595_v4 = vld [vmem:[#allocation1 + $0x246] ss:$8 sm:$0xf]  }
  0x45   :  { %393 = vst [vmem:[#allocation1 + $0x3b0] sm:$0xff] %v4036_v56  ;;  %v2523_v56 = vsel %vm2164_vm0, %v2521_v44, %v2519_v43 }
  0x46   :  { %408 = vst [vmem:[#allocation1 + $0x3a8] sm:$0xff] %v4041_v58  ;;  %v2389_v5 = vld [vmem:[#allocation1 + $0x147] ss:$8 sm:$0xf0]   ;;  %v4450_v62 = vpack.i.bf16 %v2533_v57, %v2523_v56 }
  0x47   :  { %423 = vst [vmem:[#allocation1 + $0x3a0] sm:$0xff] %v4040_v59  ;;  %v4320_v58 = vld [vmem:[%s5399_s0 + $0x230] sm:$0xff]   ;;  %v3989_v59 = vunpack.c.h.bf16 %v4319_v53  ;;  %v4366_v53 = vld [vmem:[%s5399_s0 + $0xc0] sm:$0xff]  }
  0x48   :  { %438 = vst [vmem:[#allocation1 + $0x398] sm:$0xff] %v4045_v61  ;;  %v4321_v61 = vld [vmem:[%s5399_s0 + $0x228] sm:$0xff]  }
  0x49   :  { %453 = vst [vmem:[#allocation1 + $0x390] sm:$0xff] %v4044_v63  ;;  %v3993_v63 = vunpack.c.h.bf16 %v4320_v58  ;;  %v2586_v1 = vld [vmem:[#allocation1 + $0x146] ss:$8 sm:$0xf0]  }
  0x4a   :  { %v2387_v10 = vld [vmem:[#allocation1 + $0x147] ss:$8 sm:$0xf]   ;;  %468 = vst [vmem:[#allocation1 + $0x388] sm:$0xff] %v4049_v2  ;;  %v3992_v2 = vunpack.c.l.bf16 %v4320_v58 }
  0x4b   :  { %v2391_v12 = vsel %vm2164_vm0, %v2389_v5, %v2387_v10  ;;  %483 = vst [vmem:[#allocation1 + $0x380] sm:$0xff] %v4048_v3  ;;  %v2584_v0 = vld [vmem:[#allocation1 + $0x146] ss:$8 sm:$0xf]   ;;  %v3997_v5 = vunpack.c.h.bf16 %v4321_v61 }
  0x4c   :  { %v4420_v15 = vpack.i.bf16 %v2402_v7, %v2391_v12  ;;  %858 = vst [vmem:[#allocation1 + $0x2b8] sm:$0xff] %v4101_v6  ;;  %v4322_v3 = vld [vmem:[%s5399_s0 + $0x220] sm:$0xff]   ;;  %v2588_v14 = vsel %vm2164_vm0, %v2586_v1, %v2584_v0 }
  0x4d   :  { %873 = vst [vmem:[#allocation1 + $0x2b0] sm:$0xff] %v4100_v8  ;;  %v2597_v6 = vld [vmem:[#allocation1 + $0x246] ss:$8 sm:$0xf0]   ;;  %v3996_v8 = vunpack.c.l.bf16 %v4321_v61  ;;  %v4000_v12 = vunpack.c.l.bf16 %v4322_v3 }
  0x4e   :  { %4421 = vrot.lane.b32.xlu1 %v4420_v15, %s4720_s11  ;;  %888 = vst [vmem:[#allocation1 + $0x2a8] sm:$0xff] %v4105_v11  ;;  %v2466_v29 = vld [vmem:[#allocation1 + $0x387] ss:$8 sm:$0xf0]   ;;  %v4001_v11 = vunpack.c.h.bf16 %v4322_v3  ;;  %v2599_v15 = vsel %vm2164_vm0, %v2597_v6, %v2595_v4 }
  0x4f   :  { %903 = vst [vmem:[#allocation1 + $0x2a0] sm:$0xff] %v4104_v13  ;;  %v4336_v13 = vld [vmem:[%s5399_s0 + $0x1b0] sm:$0xff]  }
  0x50   :  { %918 = vst [vmem:[#allocation1 + $0x298] sm:$0xff] %v4109_v16  ;;  %v4057_v24 = vunpack.c.h.bf16 %v4336_v13  ;;  %v4380_v3 = vld [vmem:[%s5399_s0 + $0x50] sm:$0xff]  }
  0x51   :  { %933 = vst [vmem:[#allocation1 + $0x290] sm:$0xff] %v4108_v17  ;;  %v4053_v17 = vunpack.c.h.bf16 %v4335_v9 }
  0x52   :  { %948 = vst [vmem:[#allocation1 + $0x288] sm:$0xff] %v4113_v19  ;;  %v2464_v32 = vld [vmem:[#allocation1 + $0x387] ss:$8 sm:$0xf]   ;;  %v4052_v19 = vunpack.c.l.bf16 %v4335_v9 }
  0x53   :  { %963 = vst [vmem:[#allocation1 + $0x280] sm:$0xff] %v4112_v20  ;;  %v2468_v38 = vsel %vm2164_vm0, %v2466_v29, %v2464_v32  ;;  %v4337_v20 = vld [vmem:[%s5399_s0 + $0x1a8] sm:$0xff]   ;;  %v4338_v29 = vld [vmem:[%s5399_s0 + $0x1a0] sm:$0xff]  }
  0x54   :  { %1218 = vst [vmem:[#allocation1 + $0x1f8] sm:$0xff] %v4149_v22  ;;  %v2540_v22 = vld [vmem:[#allocation1 + $0x206] ss:$8 sm:$0xf]   ;;  %v4061_v32 = vunpack.c.h.bf16 %v4337_v20  ;;  %v4065_v35 = vunpack.c.h.bf16 %v4338_v29 }
  0x55   :  { %1233 = vst [vmem:[#allocation1 + $0x1f0] sm:$0xff] %v4148_v23  ;;  %v2542_v23 = vld [vmem:[#allocation1 + $0x206] ss:$8 sm:$0xf0]  }
  0x56   :  { %1248 = vst [vmem:[#allocation1 + $0x1e8] sm:$0xff] %v4153_v25  ;;  %v2455_v36 = vld [vmem:[#allocation1 + $0x287] ss:$8 sm:$0xf0]   ;;  %v4465_v25 = vpack.i.bf16 %v2599_v15, %v2588_v14 }
  0x57   :  { %1263 = vst [vmem:[#allocation1 + $0x1e0] sm:$0xff] %v4152_v26  ;;  %v2652_v43 = vld [vmem:[#allocation1 + $0x286] ss:$8 sm:$0xf0]  }
  0x58   :  { %1278 = vst [vmem:[#allocation1 + $0x1d8] sm:$0xff] %v4157_v28  ;;  %v4056_v28 = vunpack.c.l.bf16 %v4336_v13  ;;  %v2661_v51 = vld [vmem:[#allocation1 + $0x386] ss:$8 sm:$0xf]  }
  0x59   :  { %1293 = vst [vmem:[#allocation1 + $0x1d0] sm:$0xff] %v4156_v30 }
  0x5a   :  { %v2453_v41 = vld [vmem:[#allocation1 + $0x287] ss:$8 sm:$0xf]   ;;  %1308 = vst [vmem:[#allocation1 + $0x1c8] sm:$0xff] %v4161_v33  ;;  %v4060_v33 = vunpack.c.l.bf16 %v4337_v20 }
  0x5b   :  { %v2457_v45 = vsel %vm2164_vm0, %v2455_v36, %v2453_v41  ;;  %1323 = vst [vmem:[#allocation1 + $0x1c0] sm:$0xff] %v4160_v34  ;;  %v4363_v34 = vld [vmem:[%s5399_s0 + $0xd8] sm:$0xff]   ;;  %v2544_v36 = vsel %vm2164_vm0, %v2542_v23, %v2540_v22 }
  0x5c   :  { %v4435_v49 = vpack.i.bf16 %v2468_v38, %v2457_v45  ;;  %1698 = vst [vmem:[#allocation1 + $0xf8] sm:$0xff] %v4213_v37  ;;  %v2555_v37 = vsel %vm2164_vm0, %v2553_v31, %v2551_v27  ;;  %v4064_v38 = vunpack.c.l.bf16 %v4338_v29  ;;  %v2650_v41 = vld [vmem:[#allocation1 + $0x286] ss:$8 sm:$0xf]  }
  0x5d   :  { %1713 = vst [vmem:[#allocation1 + $0xf0] sm:$0xff] %v4212_v39  ;;  %v4165_v39 = vunpack.c.h.bf16 %v4363_v34  ;;  %v4455_v44 = vpack.i.bf16 %v2555_v37, %v2544_v36  ;;  %v4365_v45 = vld [vmem:[%s5399_s0 + $0xc8] sm:$0xff]  }
  0x5e   :  { %4436 = vrot.lane.b32.xlu0 %v4435_v49, %s4720_s11  ;;  %1728 = vst [vmem:[#allocation1 + $0xe8] sm:$0xff] %v4217_v42  ;;  %v2488_v7 = vld [vmem:[#allocation1 + $0x1c7] ss:$8 sm:$0xf0]   ;;  %v4164_v42 = vunpack.c.l.bf16 %v4363_v34  ;;  %v4168_v49 = vunpack.c.l.bf16 %v4364_v40 }
  0x5f   :  { %1743 = vst [vmem:[#allocation1 + $0xe0] sm:$0xff] %v4216_v46  ;;  %v4169_v46 = vunpack.c.h.bf16 %v4364_v40  ;;  %v2718_v29 = vld [vmem:[#allocation1 + $0x5] ss:$8 sm:$0xf0]  }
  0x60   :  { %1758 = vst [vmem:[#allocation1 + $0xd8] sm:$0xff] %v4221_v50  ;;  %v2654_v50 = vsel %vm2164_vm0, %v2652_v43, %v2650_v41  ;;  %v2728_v36 = vld [vmem:[#allocation1 + $0x105] ss:$8 sm:$0xf0]  }
  0x61   :  { %1773 = vst [vmem:[#allocation1 + $0xd0] sm:$0xff] %v4220_v52  ;;  %v4173_v52 = vunpack.c.h.bf16 %v4365_v45  ;;  %v4330_v40 = vld [vmem:[%s5399_s0 + $0x1e0] sm:$0xff]  }
  0x62   :  { %1788 = vst [vmem:[#allocation1 + $0xc8] sm:$0xff] %v4225_v54  ;;  %v2486_v10 = vld [vmem:[#allocation1 + $0x1c7] ss:$8 sm:$0xf]  }
  0x63   :  { %1803 = vst [vmem:[#allocation1 + $0xc0] sm:$0xff] %v4224_v55  ;;  %v2490_v18 = vsel %vm2164_vm0, %v2488_v7, %v2486_v10  ;;  %v2663_v54 = vld [vmem:[#allocation1 + $0x386] ss:$8 sm:$0xf0]  }
  0x64   :  { %18 = vst [vmem:[#allocation1 + $0x478] sm:$0xff] %v3989_v59  ;;  %v2665_v57 = vsel %vm2164_vm0, %v2663_v54, %v2661_v51  ;;  %v4172_v59 = vunpack.c.l.bf16 %v4365_v45  ;;  %v2683_v13 = vld [vmem:[#allocation1 + $0x1c6] ss:$8 sm:$0xf]  }
  0x65   :  { %33 = vst [vmem:[#allocation1 + $0x470] sm:$0xff] %v3988_v60  ;;  %v4379_v60 = vld [vmem:[%s5399_s0 + $0x58] sm:$0xff]   ;;  %v4480_v61 = vpack.i.bf16 %v2665_v57, %v2654_v50  ;;  %v4033_v50 = vunpack.c.h.bf16 %v4330_v40 }
  0x66   :  { %4451 = vrot.lane.b32.xlu0 %v4450_v62, %s4721_s28  ;;  %48 = vst [vmem:[#allocation1 + $0x468] sm:$0xff] %v3993_v63  ;;  %v2477_v16 = vld [vmem:[#allocation1 + $0xc7] ss:$8 sm:$0xf0]   ;;  %v4177_v63 = vunpack.c.h.bf16 %v4366_v53  ;;  %v4229_v6 = vunpack.c.h.bf16 %v4379_v60 }
  0x67   :  { %63 = vst [vmem:[#allocation1 + $0x460] sm:$0xff] %v3992_v2  ;;  %v4176_v2 = vunpack.c.l.bf16 %v4366_v53  ;;  %v2739_v45 = vld [vmem:[#allocation1 + $0x205] ss:$8 sm:$0xf0]  }
  0x68   :  { %78 = vst [vmem:[#allocation1 + $0x458] sm:$0xff] %v3997_v5  ;;  %v4344_v53 = vld [vmem:[%s5399_s0 + $0x170] sm:$0xff]  }
  0x69   :  { %93 = vst [vmem:[#allocation1 + $0x450] sm:$0xff] %v3996_v8  ;;  %v2674_v8 = vld [vmem:[#allocation1 + $0xc6] ss:$8 sm:$0xf0]  }
  0x6a   :  { %v2475_v21 = vld [vmem:[#allocation1 + $0xc7] ss:$8 sm:$0xf]   ;;  %108 = vst [vmem:[#allocation1 + $0x448] sm:$0xff] %v4001_v11  ;;  %v4228_v11 = vunpack.c.l.bf16 %v4379_v60 }
  0x6b   :  { %v2479_v26 = vsel %vm2164_vm0, %v2477_v16, %v2475_v21  ;;  %123 = vst [vmem:[#allocation1 + $0x440] sm:$0xff] %v4000_v12  ;;  %v2672_v7 = vld [vmem:[#allocation1 + $0xc6] ss:$8 sm:$0xf]   ;;  %v4233_v16 = vunpack.c.h.bf16 %v4380_v3 }
  0x6c   :  { %v4440_v30 = vpack.i.bf16 %v2490_v18, %v2479_v26  ;;  %498 = vst [vmem:[#allocation1 + $0x378] sm:$0xff] %v4053_v17  ;;  %v4381_v12 = vld [vmem:[%s5399_s0 + $0x48] sm:$0xff]   ;;  %v4232_v18 = vunpack.c.l.bf16 %v4380_v3  ;;  %v2676_v22 = vsel %vm2164_vm0, %v2674_v8, %v2672_v7 }
  0x6d   :  { %513 = vst [vmem:[#allocation1 + $0x370] sm:$0xff] %v4052_v19  ;;  %v2685_v17 = vld [vmem:[#allocation1 + $0x1c6] ss:$8 sm:$0xf0]   ;;  %v4237_v20 = vunpack.c.h.bf16 %v4381_v12  ;;  %v4236_v21 = vunpack.c.l.bf16 %v4381_v12 }
  0x6e   :  { %4441 = vrot.lane.b32.xlu1 %v4440_v30, %s4720_s11  ;;  %528 = vst [vmem:[#allocation1 + $0x368] sm:$0xff] %v4057_v24  ;;  %4466 = vrot.lane.b32.xlu0 %v4465_v25, %s4721_s28  ;;  %v2422_v47 = vld [vmem:[#allocation1 + $0x447] ss:$8 sm:$0xf0]   ;;  %v2687_v23 = vsel %vm2164_vm0, %v2685_v17, %v2683_v13 }
  0x6f   :  { %543 = vst [vmem:[#allocation1 + $0x360] sm:$0xff] %v4056_v28  ;;  %v2619_v48 = vld [vmem:[#allocation1 + $0x446] ss:$8 sm:$0xf0]   ;;  %v4485_v30 = vpack.i.bf16 %v2687_v23, %v2676_v22 }
  0x70   :  { %558 = vst [vmem:[#allocation1 + $0x358] sm:$0xff] %v4061_v32  ;;  %v4382_v19 = vld [vmem:[%s5399_s0 + $0x40] sm:$0xff]   ;;  %v4327_v24 = vld [vmem:[%s5399_s0 + $0x1f8] sm:$0xff]   ;;  %v4328_v28 = vld [vmem:[%s5399_s0 + $0x1f0] sm:$0xff]  }
  0x71   :  { %573 = vst [vmem:[#allocation1 + $0x350] sm:$0xff] %v4060_v33  ;;  %v4241_v25 = vunpack.c.h.bf16 %v4382_v19  ;;  %v2716_v26 = vld [vmem:[#allocation1 + $0x5] ss:$8 sm:$0xf]   ;;  %v4240_v27 = vunpack.c.l.bf16 %v4382_v19  ;;  %v4021_v31 = vunpack.c.h.bf16 %v4327_v24  ;;  %v4020_v34 = vunpack.c.l.bf16 %v4327_v24 }
  0x72   :  { %588 = vst [vmem:[#allocation1 + $0x348] sm:$0xff] %v4065_v35  ;;  %v2420_v55 = vld [vmem:[#allocation1 + $0x447] ss:$8 sm:$0xf]   ;;  %v2720_v32 = vsel %vm2164_vm0, %v2718_v29, %v2716_v26  ;;  %v4025_v37 = vunpack.c.h.bf16 %v4328_v28 }
  0x73   :  { %603 = vst [vmem:[#allocation1 + $0x340] sm:$0xff] %v4064_v38  ;;  %v2617_v56 = vld [vmem:[#allocation1 + $0x446] ss:$8 sm:$0xf]   ;;  %v2424_v0 = vsel %vm2164_vm0, %v2422_v47, %v2420_v55 }
  0x74   :  { %1338 = vst [vmem:[#allocation1 + $0x1b8] sm:$0xff] %v4165_v39  ;;  %v2621_v1 = vsel %vm2164_vm0, %v2619_v48, %v2617_v56  ;;  %v2726_v33 = vld [vmem:[#allocation1 + $0x105] ss:$8 sm:$0xf]   ;;  %v4024_v39 = vunpack.c.l.bf16 %v4328_v28 }
  0x75   :  { %1353 = vst [vmem:[#allocation1 + $0x1b0] sm:$0xff] %v4164_v42  ;;  %v4329_v35 = vld [vmem:[%s5399_s0 + $0x1e8] sm:$0xff]   ;;  %v2730_v38 = vsel %vm2164_vm0, %v2728_v36, %v2726_v33  ;;  %v4343_v47 = vld [vmem:[%s5399_s0 + $0x178] sm:$0xff]  }
  0x76   :  { %4456 = vrot.lane.b32.xlu1 %v4455_v44, %s4721_s28  ;;  %v2411_v58 = vld [vmem:[#allocation1 + $0x347] ss:$8 sm:$0xf0]   ;;  %1368 = vst [vmem:[#allocation1 + $0x1a8] sm:$0xff] %v4169_v46  ;;  %4481 = vrot.lane.b32.xlu0 %v4480_v61, %s4721_s28  ;;  %v4495_v41 = vpack.i.bf16 %v2730_v38, %v2720_v32  ;;  %v4029_v44 = vunpack.c.h.bf16 %v4329_v35  ;;  %v4028_v46 = vunpack.c.l.bf16 %v4329_v35  ;;  %v4085_v56 = vunpack.c.h.bf16 %v4343_v47 }
  0x77   :  { %v2608_v62 = vld [vmem:[#allocation1 + $0x346] ss:$8 sm:$0xf0]   ;;  %1383 = vst [vmem:[#allocation1 + $0x1a0] sm:$0xff] %v4168_v49 }
  0x78   :  { %1398 = vst [vmem:[#allocation1 + $0x198] sm:$0xff] %v4173_v52  ;;  %v2737_v42 = vld [vmem:[#allocation1 + $0x205] ss:$8 sm:$0xf]   ;;  %v4032_v52 = vunpack.c.l.bf16 %v4330_v40 }
  0x79   :  { %1413 = vst [vmem:[#allocation1 + $0x190] sm:$0xff] %v4172_v59  ;;  %v2748_v48 = vld [vmem:[#allocation1 + $0x305] ss:$8 sm:$0xf]   ;;  %v2741_v51 = vsel %vm2164_vm0, %v2739_v45, %v2737_v42  ;;  %v4084_v59 = vunpack.c.l.bf16 %v4343_v47 }
  0x7a   :  { %v2409_v4 = vld [vmem:[#allocation1 + $0x347] ss:$8 sm:$0xf]   ;;  %v2606_v5 = vld [vmem:[#allocation1 + $0x346] ss:$8 sm:$0xf]  }
  0x7b   :  { %v2413_v9 = vsel %vm2164_vm0, %v2411_v58, %v2409_v4  ;;  %v2610_v10 = vsel %vm2164_vm0, %v2608_v62, %v2606_v5  ;;  %1428 = vst [vmem:[#allocation1 + $0x188] sm:$0xff] %v4177_v63  ;;  %v2750_v54 = vld [vmem:[#allocation1 + $0x305] ss:$8 sm:$0xf0]   ;;  %v4089_v63 = vunpack.c.h.bf16 %v4344_v53 }
  0x7c   :  { %v4425_v14 = vpack.i.bf16 %v2424_v0, %v2413_v9  ;;  %v4470_v15 = vpack.i.bf16 %v2621_v1, %v2610_v10  ;;  %1443 = vst [vmem:[#allocation1 + $0x180] sm:$0xff] %v4176_v2  ;;  %v2752_v57 = vsel %vm2164_vm0, %v2750_v54, %v2748_v48  ;;  %v4345_v60 = vld [vmem:[%s5399_s0 + $0x168] sm:$0xff]   ;;  %v4088_v1 = vunpack.c.l.bf16 %v4344_v53  ;;  %v4346_v2 = vld [vmem:[%s5399_s0 + $0x160] sm:$0xff]   ;;  %s4723_s0 = smov 64  }
  0x7d   :  { %1818 = vst [vmem:[#allocation1 + $0xb8] sm:$0xff] %v4229_v6  ;;  %v4500_v61 = vpack.i.bf16 %v2752_v57, %v2741_v51  ;;  %v4093_v4 = vunpack.c.h.bf16 %v4345_v60  ;;  %v4092_v5 = vunpack.c.l.bf16 %v4345_v60  ;;  %v2781_v6 = vld [vmem:[#allocation1 + $0x145] ss:$8 sm:$0xf]   ;;  %v4097_v7 = vunpack.c.h.bf16 %v4346_v2 }
  0x7e   :  { %4426 = vrot.lane.b32.xlu2 %v4425_v14, %s4720_s11  ;;  %4471 = vrot.lane.b32.xlu1 %v4470_v15, %s4721_s28  ;;  %1833 = vst [vmem:[#allocation1 + $0xb0] sm:$0xff] %v4228_v11  ;;  %v2444_v43 = vld [vmem:[#allocation1 + $0x187] ss:$8 sm:$0xf0]   ;;  %v4096_v8 = vunpack.c.l.bf16 %v4346_v2 }
  0x7f   :  { %1848 = vst [vmem:[#allocation1 + $0xa8] sm:$0xff] %v4233_v16  ;;  %4496 = vrot.lane.b32.xlu0 %v4495_v41, %s4722_s5  ;;  %v2783_v9 = vld [vmem:[#allocation1 + $0x145] ss:$8 sm:$0xf0]  }
  0x80   :  { %1863 = vst [vmem:[#allocation1 + $0xa0] sm:$0xff] %v4232_v18  ;;  %v2785_v10 = vsel %vm2164_vm0, %v2783_v9, %v2781_v6  ;;  %v2792_v11 = vld [vmem:[#allocation1 + $0x245] ss:$8 sm:$0xf]  }
  0x81   :  { %1878 = vst [vmem:[#allocation1 + $0x98] sm:$0xff] %v4237_v20  ;;  %v2794_v12 = vld [vmem:[#allocation1 + $0x245] ss:$8 sm:$0xf0]  }
  0x82   :  { %1893 = vst [vmem:[#allocation1 + $0x90] sm:$0xff] %v4236_v21  ;;  %v2796_v13 = vsel %vm2164_vm0, %v2794_v12, %v2792_v11  ;;  %v2803_v15 = vld [vmem:[#allocation1 + $0x345] ss:$8 sm:$0xf]  }
  0x83   :  { %1908 = vst [vmem:[#allocation1 + $0x88] sm:$0xff] %v4241_v25  ;;  %v2442_v49 = vld [vmem:[#allocation1 + $0x187] ss:$8 sm:$0xf]   ;;  %v4510_v14 = vpack.i.bf16 %v2796_v13, %v2785_v10 }
  0x84   :  { %1923 = vst [vmem:[#allocation1 + $0x80] sm:$0xff] %v4240_v27  ;;  %v2446_v58 = vsel %vm2164_vm0, %v2444_v43, %v2442_v49  ;;  %v2805_v16 = vld [vmem:[#allocation1 + $0x345] ss:$8 sm:$0xf0]  }
  0x85   :  { %258 = vst [vmem:[#allocation1 + $0x3f8] sm:$0xff] %v4021_v31  ;;  %v2814_v17 = vld [vmem:[#allocation1 + $0x445] ss:$8 sm:$0xf]   ;;  %v2807_v18 = vsel %vm2164_vm0, %v2805_v16, %v2803_v15 }
  0x86   :  { %4486 = vrot.lane.b32.xlu1 %v4485_v30, %s4721_s28  ;;  %273 = vst [vmem:[#allocation1 + $0x3f0] sm:$0xff] %v4020_v34  ;;  %v2816_v19 = vld [vmem:[#allocation1 + $0x445] ss:$8 sm:$0xf0]  }
  0x87   :  { %288 = vst [vmem:[#allocation1 + $0x3e8] sm:$0xff] %v4025_v37  ;;  %v2433_v55 = vld [vmem:[#allocation1 + $0x87] ss:$8 sm:$0xf0]   ;;  %4511 = vrot.lane.b32.xlu0 %v4510_v14, %s4722_s5  ;;  %v2818_v22 = vsel %vm2164_vm0, %v2816_v19, %v2814_v17 }
  0x88   :  { %303 = vst [vmem:[#allocation1 + $0x3e0] sm:$0xff] %v4024_v39  ;;  %v4515_v24 = vpack.i.bf16 %v2818_v22, %v2807_v18  ;;  %v2847_v25 = vld [vmem:[#allocation1 + $0x285] ss:$8 sm:$0xf]  }
  0x89   :  { %318 = vst [vmem:[#allocation1 + $0x3d8] sm:$0xff] %v4029_v44  ;;  %v2849_v26 = vld [vmem:[#allocation1 + $0x285] ss:$8 sm:$0xf0]  }
  0x8a   :  { %333 = vst [vmem:[#allocation1 + $0x3d0] sm:$0xff] %v4028_v46  ;;  %v2851_v28 = vsel %vm2164_vm0, %v2849_v26, %v2847_v25  ;;  %v2858_v29 = vld [vmem:[#allocation1 + $0x385] ss:$8 sm:$0xf]  }
  0x8b   :  { %v2431_v62 = vld [vmem:[#allocation1 + $0x87] ss:$8 sm:$0xf]   ;;  %348 = vst [vmem:[#allocation1 + $0x3c8] sm:$0xff] %v4033_v50 }
  0x8c   :  { %v2435_v0 = vsel %vm2164_vm0, %v2433_v55, %v2431_v62  ;;  %363 = vst [vmem:[#allocation1 + $0x3c0] sm:$0xff] %v4032_v52  ;;  %v2860_v30 = vld [vmem:[#allocation1 + $0x385] ss:$8 sm:$0xf0]  }
  0x8d   :  { %v4430_v3 = vpack.i.bf16 %v2446_v58, %v2435_v0  ;;  %738 = vst [vmem:[#allocation1 + $0x2f8] sm:$0xff] %v4085_v56  ;;  %v2562_v32 = vld [vmem:[#allocation1 + $0x406] ss:$8 sm:$0xf]   ;;  %v2862_v35 = vsel %vm2164_vm0, %v2860_v30, %v2858_v29 }
  0x8e   :  { %4501 = vrot.lane.b32.xlu1 %v4500_v61, %s4722_s5  ;;  %753 = vst [vmem:[#allocation1 + $0x2f0] sm:$0xff] %v4084_v59  ;;  %v2564_v33 = vld [vmem:[#allocation1 + $0x406] ss:$8 sm:$0xf0]   ;;  %v4525_v38 = vpack.i.bf16 %v2862_v35, %v2851_v28 }
  0x8f   :  { %4431 = vrot.lane.b32.xlu2 %v4430_v3, %s4720_s11  ;;  %768 = vst [vmem:[#allocation1 + $0x2e8] sm:$0xff] %v4089_v63  ;;  %v2510_v21 = vld [vmem:[#allocation1 + $0x3c7] ss:$8 sm:$0xf0]   ;;  %v2566_v48 = vsel %vm2164_vm0, %v2564_v33, %v2562_v32 }
  0x90   :  { %783 = vst [vmem:[#allocation1 + $0x2e0] sm:$0xff] %v4088_v1  ;;  %v2573_v34 = vld [vmem:[#allocation1 + $0x46] ss:$8 sm:$0xf]   ;;  %4526 = vrot.lane.b32.xlu0 %v4525_v38, %s4722_s5 }
  0x91   :  { %798 = vst [vmem:[#allocation1 + $0x2d8] sm:$0xff] %v4093_v4  ;;  %v2869_v36 = vld [vmem:[#allocation1 + $0xc5] ss:$8 sm:$0xf]  }
  0x92   :  { %813 = vst [vmem:[#allocation1 + $0x2d0] sm:$0xff] %v4092_v5  ;;  %v2871_v39 = vld [vmem:[#allocation1 + $0xc5] ss:$8 sm:$0xf0]  }
  0x93   :  { %828 = vst [vmem:[#allocation1 + $0x2c8] sm:$0xff] %v4097_v7  ;;  %v2508_v20 = vld [vmem:[#allocation1 + $0x3c7] ss:$8 sm:$0xf]   ;;  %v2873_v43 = vsel %vm2164_vm0, %v2871_v39, %v2869_v36 }
  0x94   :  { %843 = vst [vmem:[#allocation1 + $0x2c0] sm:$0xff] %v4096_v8  ;;  %v2512_v27 = vsel %vm2164_vm0, %v2510_v21, %v2508_v20  ;;  %v2880_v40 = vld [vmem:[#allocation1 + $0x1c5] ss:$8 sm:$0xf]  }
  0x95   :  { %v2575_v42 = vld [vmem:[#allocation1 + $0x46] ss:$8 sm:$0xf0]   ;;  %v2882_v44 = vld [vmem:[#allocation1 + $0x1c5] ss:$8 sm:$0xf0]  }
  0x96   :  { %4516 = vrot.lane.b32.xlu1 %v4515_v24, %s4722_s5  ;;  %v2884_v45 = vsel %vm2164_vm0, %v2882_v44, %v2880_v40  ;;  %v2913_v47 = vld [vmem:[#allocation1 + $0x4] ss:$8 sm:$0xf]   ;;  %v2577_v49 = vsel %vm2164_vm0, %v2575_v42, %v2573_v34  ;;  %v2628_v59 = vld [vmem:[#allocation1 + $0x86] ss:$8 sm:$0xf]  }
  0x97   :  { %v2499_v23 = vld [vmem:[#allocation1 + $0x2c7] ss:$8 sm:$0xf0]   ;;  %v4530_v46 = vpack.i.bf16 %v2884_v45, %v2873_v43  ;;  %v2915_v50 = vld [vmem:[#allocation1 + $0x4] ss:$8 sm:$0xf0]   ;;  %v4460_v58 = vpack.i.bf16 %v2577_v49, %v2566_v48 }
  0x98   :  { %v2923_v51 = vld [vmem:[#allocation1 + $0x104] ss:$8 sm:$0xf]   ;;  %v2917_v52 = vsel %vm2164_vm0, %v2915_v50, %v2913_v47  ;;  %v2630_v63 = vld [vmem:[#allocation1 + $0x86] ss:$8 sm:$0xf0]  }
  0x99   :  { %v2925_v53 = vld [vmem:[#allocation1 + $0x104] ss:$8 sm:$0xf0]   ;;  %v2639_v0 = vld [vmem:[#allocation1 + $0x186] ss:$8 sm:$0xf]   ;;  %v2632_v10 = vsel %vm2164_vm0, %v2630_v63, %v2628_v59 }
  0x9a   :  { %v2934_v54 = vld [vmem:[#allocation1 + $0x204] ss:$8 sm:$0xf]   ;;  %v2927_v55 = vsel %vm2164_vm0, %v2925_v53, %v2923_v51  ;;  %v2641_v2 = vld [vmem:[#allocation1 + $0x186] ss:$8 sm:$0xf0]  }
  0x9b   :  { %v2497_v31 = vld [vmem:[#allocation1 + $0x2c7] ss:$8 sm:$0xf]   ;;  %v2936_v56 = vld [vmem:[#allocation1 + $0x204] ss:$8 sm:$0xf0]   ;;  %v4540_v60 = vpack.i.bf16 %v2927_v55, %v2917_v52  ;;  %v2643_v11 = vsel %vm2164_vm0, %v2641_v2, %v2639_v0 }
  0x9c   :  { %v2501_v37 = vsel %vm2164_vm0, %v2499_v23, %v2497_v31  ;;  %v2945_v57 = vld [vmem:[#allocation1 + $0x304] ss:$8 sm:$0xf]   ;;  %v2938_v61 = vsel %vm2164_vm0, %v2936_v56, %v2934_v54  ;;  %v4475_v17 = vpack.i.bf16 %v2643_v11, %v2632_v10  ;;  %v2694_v18 = vld [vmem:[#allocation1 + $0x2c6] ss:$8 sm:$0xf]  }
  0x9d   :  { %v4445_v41 = vpack.i.bf16 %v2512_v27, %v2501_v37  ;;  %v2947_v62 = vld [vmem:[#allocation1 + $0x304] ss:$8 sm:$0xf0]   ;;  %4541 = vrot.lane.b32.xlu0 %v4540_v60, %s4723_s0  ;;  %v2696_v19 = vld [vmem:[#allocation1 + $0x2c6] ss:$8 sm:$0xf0]  }
  0x9e   :  { %4531 = vrot.lane.b32.xlu1 %v4530_v46, %s4722_s5  ;;  %v2949_v1 = vsel %vm2164_vm0, %v2947_v62, %v2945_v57  ;;  %v2978_v3 = vld [vmem:[#allocation1 + $0x144] ss:$8 sm:$0xf]   ;;  %v2705_v20 = vld [vmem:[#allocation1 + $0x3c6] ss:$8 sm:$0xf]   ;;  %v2698_v33 = vsel %vm2164_vm0, %v2696_v19, %v2694_v18 }
  0x9f   :  { %4446 = vrot.lane.b32.xlu2 %v4445_v41, %s4720_s11  ;;  %v4545_v4 = vpack.i.bf16 %v2949_v1, %v2938_v61  ;;  %v2980_v5 = vld [vmem:[#allocation1 + $0x144] ss:$8 sm:$0xf0]   ;;  %v2707_v26 = vld [vmem:[#allocation1 + $0x3c6] ss:$8 sm:$0xf0]  }
  0xa0   :  { %v2989_v6 = vld [vmem:[#allocation1 + $0x244] ss:$8 sm:$0xf]   ;;  %v2982_v7 = vsel %vm2164_vm0, %v2980_v5, %v2978_v3  ;;  %v2709_v34 = vsel %vm2164_vm0, %v2707_v26, %v2705_v20  ;;  %v2759_v39 = vld [vmem:[#allocation1 + $0x405] ss:$8 sm:$0xf]  }
  0xa1   :  { %v2991_v8 = vld [vmem:[#allocation1 + $0x244] ss:$8 sm:$0xf0]   ;;  %v4490_v38 = vpack.i.bf16 %v2709_v34, %v2698_v33  ;;  %v2761_v40 = vld [vmem:[#allocation1 + $0x405] ss:$8 sm:$0xf0]  }
  0xa2   :  { %v3000_v9 = vld [vmem:[#allocation1 + $0x344] ss:$8 sm:$0xf]   ;;  %v2993_v12 = vsel %vm2164_vm0, %v2991_v8, %v2989_v6  ;;  %v3110_v43 = vld [vmem:[#allocation1 + $0x3] ss:$8 sm:$0xf]   ;;  %v2763_v54 = vsel %vm2164_vm0, %v2761_v40, %v2759_v39  ;;  %v4417_v39 = vpop.permute.xlu1 %4416 }
  0xa3   :  { %v3002_v13 = vld [vmem:[#allocation1 + $0x344] ss:$8 sm:$0xf0]   ;;  %v4555_v16 = vpack.i.bf16 %v2993_v12, %v2982_v7  ;;  %v3112_v44 = vld [vmem:[#allocation1 + $0x3] ss:$8 sm:$0xf0]  }
  0xa4   :  { %v3011_v14 = vld [vmem:[#allocation1 + $0x444] ss:$8 sm:$0xf]   ;;  %v3004_v21 = vsel %vm2164_vm0, %v3002_v13, %v3000_v9  ;;  %v3120_v45 = vld [vmem:[#allocation1 + $0x103] ss:$8 sm:$0xf]   ;;  %v3114_v50 = vsel %vm2164_vm0, %v3112_v44, %v3110_v43 }
  0xa5   :  { %v3013_v15 = vld [vmem:[#allocation1 + $0x444] ss:$8 sm:$0xf0]   ;;  %4556 = vrot.lane.b32.xlu0 %v4555_v16, %s4723_s0  ;;  %v3122_v46 = vld [vmem:[#allocation1 + $0x103] ss:$8 sm:$0xf0]  }
  0xa6   :  { %4546 = vrot.lane.b32.xlu1 %v4545_v4, %s4723_s0  ;;  %v3015_v22 = vsel %vm2164_vm0, %v3013_v15, %v3011_v14  ;;  %v3044_v23 = vld [vmem:[#allocation1 + $0x284] ss:$8 sm:$0xf]   ;;  %v2770_v47 = vld [vmem:[#allocation1 + $0x45] ss:$8 sm:$0xf]   ;;  %v3124_v51 = vsel %vm2164_vm0, %v3122_v46, %v3120_v45 }
  0xa7   :  { %4461 = vrot.lane.b32.xlu2 %v4460_v58, %s4721_s28  ;;  %v3046_v24 = vld [vmem:[#allocation1 + $0x284] ss:$8 sm:$0xf0]   ;;  %v4560_v28 = vpack.i.bf16 %v3015_v22, %v3004_v21  ;;  %v2772_v48 = vld [vmem:[#allocation1 + $0x45] ss:$8 sm:$0xf0]   ;;  %v4585_v58 = vpack.i.bf16 %v3124_v51, %v3114_v50 }
  0xa8   :  { %v3055_v25 = vld [vmem:[#allocation1 + $0x384] ss:$8 sm:$0xf]   ;;  %v3048_v29 = vsel %vm2164_vm0, %v3046_v24, %v3044_v23  ;;  %v3131_v52 = vld [vmem:[#allocation1 + $0x203] ss:$8 sm:$0xf]   ;;  %v2774_v55 = vsel %vm2164_vm0, %v2772_v48, %v2770_v47 }
  0xa9   :  { %v3057_v27 = vld [vmem:[#allocation1 + $0x384] ss:$8 sm:$0xf0]   ;;  %v3133_v53 = vld [vmem:[#allocation1 + $0x203] ss:$8 sm:$0xf0]   ;;  %v4505_v59 = vpack.i.bf16 %v2774_v55, %v2763_v54 }
  0xaa   :  { %v3059_v30 = vsel %vm2164_vm0, %v3057_v27, %v3055_v25  ;;  %v3066_v31 = vld [vmem:[#allocation1 + $0xc4] ss:$8 sm:$0xf]   ;;  %v3142_v56 = vld [vmem:[#allocation1 + $0x303] ss:$8 sm:$0xf]   ;;  %v3135_v62 = vsel %vm2164_vm0, %v3133_v53, %v3131_v52 }
  0xab   :  { %v3068_v32 = vld [vmem:[#allocation1 + $0xc4] ss:$8 sm:$0xf0]   ;;  %v4570_v37 = vpack.i.bf16 %v3059_v30, %v3048_v29  ;;  %v3144_v57 = vld [vmem:[#allocation1 + $0x303] ss:$8 sm:$0xf0]  }
  0xac   :  { %v3077_v35 = vld [vmem:[#allocation1 + $0x1c4] ss:$8 sm:$0xf]   ;;  %v3070_v41 = vsel %vm2164_vm0, %v3068_v32, %v3066_v31  ;;  %v2825_v60 = vld [vmem:[#allocation1 + $0x85] ss:$8 sm:$0xf]   ;;  %v3146_v63 = vsel %vm2164_vm0, %v3144_v57, %v3142_v56 }
  0xad   :  { %v3079_v36 = vld [vmem:[#allocation1 + $0x1c4] ss:$8 sm:$0xf0]   ;;  %4571 = vrot.lane.b32.xlu0 %v4570_v37, %s4723_s0  ;;  %v2827_v61 = vld [vmem:[#allocation1 + $0x85] ss:$8 sm:$0xf0]   ;;  %v4590_v6 = vpack.i.bf16 %v3146_v63, %v3135_v62 }
  0xae   :  { %4561 = vrot.lane.b32.xlu1 %v4560_v28, %s4723_s0  ;;  %v3081_v42 = vsel %vm2164_vm0, %v3079_v36, %v3077_v35  ;;  %v3175_v0 = vld [vmem:[#allocation1 + $0x143] ss:$8 sm:$0xf]   ;;  %v2836_v4 = vld [vmem:[#allocation1 + $0x185] ss:$8 sm:$0xf]   ;;  %v2829_v11 = vsel %vm2164_vm0, %v2827_v61, %v2825_v60  ;;  %v4418_v60 = vunpack.i.l.bf16 %v4417_v39 }
  0xaf   :  { %4476 = vrot.lane.b32.xlu2 %v4475_v17, %s4721_s28  ;;  %v4575_v49 = vpack.i.bf16 %v3081_v42, %v3070_v41  ;;  %v3177_v1 = vld [vmem:[#allocation1 + $0x143] ss:$8 sm:$0xf0]   ;;  %v2838_v5 = vld [vmem:[#allocation1 + $0x185] ss:$8 sm:$0xf0]  }
  0xb0   :  { %v3186_v2 = vld [vmem:[#allocation1 + $0x243] ss:$8 sm:$0xf]   ;;  %s4724_s11 = smov 48   ;;  %v3179_v7 = vsel %vm2164_vm0, %v3177_v1, %v3175_v0  ;;  %v2840_v12 = vsel %vm2164_vm0, %v2838_v5, %v2836_v4 }
  0xb1   :  { %v3188_v3 = vld [vmem:[#allocation1 + $0x243] ss:$8 sm:$0xf0]   ;;  %v2891_v15 = vld [vmem:[#allocation1 + $0x2c5] ss:$8 sm:$0xf]   ;;  %v4520_v20 = vpack.i.bf16 %v2840_v12, %v2829_v11 }
  0xb2   :  { %v3190_v8 = vsel %vm2164_vm0, %v3188_v3, %v3186_v2  ;;  %v3197_v9 = vld [vmem:[#allocation1 + $0x343] ss:$8 sm:$0xf]   ;;  %v2893_v16 = vld [vmem:[#allocation1 + $0x2c5] ss:$8 sm:$0xf0]  }
  0xb3   :  { %v3199_v10 = vld [vmem:[#allocation1 + $0x343] ss:$8 sm:$0xf0]   ;;  %v2902_v17 = vld [vmem:[#allocation1 + $0x3c5] ss:$8 sm:$0xf]   ;;  %v4600_v19 = vpack.i.bf16 %v3190_v8, %v3179_v7  ;;  %v2895_v32 = vsel %vm2164_vm0, %v2893_v16, %v2891_v15 }
  0xb4   :  { %v3208_v13 = vld [vmem:[#allocation1 + $0x443] ss:$8 sm:$0xf]   ;;  %v2904_v18 = vld [vmem:[#allocation1 + $0x3c5] ss:$8 sm:$0xf0]   ;;  %v3201_v21 = vsel %vm2164_vm0, %v3199_v10, %v3197_v9 }
  0xb5   :  { %4586 = vrot.lane.b32.xlu0 %v4585_v58, %s4724_s11  ;;  %v3210_v14 = vld [vmem:[#allocation1 + $0x443] ss:$8 sm:$0xf0]   ;;  %v2906_v33 = vsel %vm2164_vm0, %v2904_v18, %v2902_v17  ;;  %v2162_v36 = vld [vmem:[#allocation1] ss:$8 sm:$0xf]   ;;  %v4419_v58 = vunpack.i.h.bf16 %v4417_v39 }
  0xb6   :  { %4576 = vrot.lane.b32.xlu1 %v4575_v49, %s4723_s0  ;;  %v3212_v22 = vsel %vm2164_vm0, %v3210_v14, %v3208_v13  ;;  %v3241_v23 = vld [vmem:[#allocation1 + $0x283] ss:$8 sm:$0xf]   ;;  %v2163_v37 = vld [vmem:[#allocation1] ss:$8 sm:$0xf0]   ;;  %v4535_v45 = vpack.i.bf16 %v2906_v33, %v2895_v32 }
  0xb7   :  { %4491 = vrot.lane.b32.xlu2 %v4490_v38, %s4721_s28  ;;  %v3243_v24 = vld [vmem:[#allocation1 + $0x283] ss:$8 sm:$0xf0]   ;;  %v4605_v27 = vpack.i.bf16 %v3212_v22, %v3201_v21  ;;  %v4407_v38 = vpop.permute.xlu0 %4406  ;;  %v2165_v40 = vsel %vm2164_vm0, %v2163_v37, %v2162_v36  ;;  %v2196_v41 = vld [vmem:[#allocation1 + $0x100] ss:$8 sm:$0xf]  }
  0xb8   :  { %v3252_v25 = vld [vmem:[#allocation1 + $0x383] ss:$8 sm:$0xf]   ;;  %v3245_v34 = vsel %vm2164_vm0, %v3243_v24, %v3241_v23  ;;  %2167 = vst.msk [vmem:[#allocation0] sm:$0xff] %vm2166_vm1, %v2165_v40   ;;  %v4409_v42 = vunpack.i.h.bf16 %v4407_v38  ;;  %v4408_v43 = vunpack.i.l.bf16 %v4407_v38  ;;  %s4725_s28 = smov 32  }
  0xb9   :  { %v3254_v26 = vld [vmem:[#allocation1 + $0x383] ss:$8 sm:$0xf0]   ;;  %v2198_v44 = vld [vmem:[#allocation1 + $0x100] ss:$8 sm:$0xf0]  }
  0xba   :  { %v3263_v28 = vld [vmem:[#allocation1 + $0xc3] ss:$8 sm:$0xf]   ;;  %v3256_v35 = vsel %vm2164_vm0, %v3254_v26, %v3252_v25  ;;  %v2200_v47 = vsel %vm2164_vm0, %v2198_v44, %v2196_v41  ;;  %v2169_v48 = vld [vmem:[#allocation1 + $0x40] ss:$8 sm:$0xf]  }
  0xbb   :  { %v3265_v29 = vld [vmem:[#allocation1 + $0xc3] ss:$8 sm:$0xf0]   ;;  %v4615_v46 = vpack.i.bf16 %v3256_v35, %v3245_v34  ;;  %v2171_v49 = vld [vmem:[#allocation1 + $0x40] ss:$8 sm:$0xf0]  }
  0xbc   :  { %v3274_v30 = vld [vmem:[#allocation1 + $0x1c3] ss:$8 sm:$0xf]   ;;  %v2956_v50 = vld [vmem:[#allocation1 + $0x404] ss:$8 sm:$0xf]   ;;  %v3267_v54 = vsel %vm2164_vm0, %v3265_v29, %v3263_v28  ;;  %v2173_v56 = vsel %vm2164_vm0, %v2171_v49, %v2169_v48 }
  0xbd   :  { %4601 = vrot.lane.b32.xlu0 %v4600_v19, %s4724_s11  ;;  %v3276_v31 = vld [vmem:[#allocation1 + $0x1c3] ss:$8 sm:$0xf0]   ;;  %v2958_v51 = vld [vmem:[#allocation1 + $0x404] ss:$8 sm:$0xf0]  }
  0xbe   :  { %4591 = vrot.lane.b32.xlu1 %v4590_v6, %s4724_s11  ;;  %v2967_v52 = vld [vmem:[#allocation1 + $0x44] ss:$8 sm:$0xf]   ;;  %v3278_v55 = vsel %vm2164_vm0, %v3276_v31, %v3274_v30  ;;  %2203 = vst.msk [vmem:[#allocation0 + $0x20] sm:$0xff] %vm2166_vm1, %v2200_v47   ;;  %v2960_v5 = vsel %vm2164_vm0, %v2958_v51, %v2956_v50 }
  0xbf   :  { %4506 = vrot.lane.b32.xlu2 %v4505_v59, %s4722_s5  ;;  %v2969_v53 = vld [vmem:[#allocation1 + $0x44] ss:$8 sm:$0xf0]   ;;  %v2304_v57 = vld [vmem:[#allocation1 + $0x400] ss:$8 sm:$0xf]   ;;  %v4620_v63 = vpack.i.bf16 %v3278_v55, %v3267_v54  ;;  %v5080_v3 = vpop.permute.xlu0 %4411 }
  0xc0   :  { %2330 = vst.msk [vmem:[#allocation0] sm:$0xff] %vm2329_vm2, %v4408_v43   ;;  %v2306_v59 = vld [vmem:[#allocation1 + $0x400] ss:$8 sm:$0xf0]   ;;  %v5082_v4 = vpop.permute.xlu1 %4421  ;;  %v2971_v6 = vsel %vm2164_vm0, %v2969_v53, %v2967_v52  ;;  %v4413_v38 = vunpack.i.l.bf16 %v5080_v3 }
  0xc1   :  { %2341 = vst.msk [vmem:[#allocation0 + $0x20] sm:$0xff] %vm2329_vm2, %v4409_v42   ;;  %v2308_v61 = vsel %vm2164_vm0, %v2306_v59, %v2304_v57  ;;  %v2277_v62 = vld [vmem:[#allocation1 + $0x340] ss:$8 sm:$0xf]   ;;  %v4550_v13 = vpack.i.bf16 %v2971_v6, %v2960_v5  ;;  %v4424_v52 = vunpack.i.h.bf16 %v5082_v4  ;;  %v4423_v54 = vunpack.i.l.bf16 %v5082_v4 }
  0xc2   :  { %2176 = vst.msk [vmem:[#allocation0 + $0x8] sm:$0xff] %vm2166_vm1, %v2173_v56   ;;  %v2279_v0 = vld [vmem:[#allocation1 + $0x340] ss:$8 sm:$0xf0]  }
  0xc3   :  { %2385 = vst.msk [vmem:[#allocation0 + $0x8] sm:$0xff] %vm2329_vm2, %v4419_v58   ;;  %v2281_v1 = vsel %vm2164_vm0, %v2279_v0, %v2277_v62  ;;  %v2313_v2 = vld [vmem:[#allocation1 + $0x440] ss:$8 sm:$0xf]  }
  0xc4   :  { %2311 = vst.msk [vmem:[#allocation0 + $0x80] sm:$0xff] %vm2166_vm1, %v2308_v61   ;;  %v2315_v7 = vld [vmem:[#allocation1 + $0x440] ss:$8 sm:$0xf0]  }
  0xc5   :  { %4616 = vrot.lane.b32.xlu0 %v4615_v46, %s4724_s11  ;;  %2374 = vst.msk [vmem:[#allocation0 + $0x80] sm:$0xff] %vm2329_vm2, %v4418_v60   ;;  %v2317_v8 = vsel %vm2164_vm0, %v2315_v7, %v2313_v2  ;;  %v3307_v9 = vld [vmem:[#allocation1 + $0x2] ss:$8 sm:$0xf]  }
  0xc6   :  { %4606 = vrot.lane.b32.xlu1 %v4605_v27, %s4724_s11  ;;  %v3022_v10 = vld [vmem:[#allocation1 + $0x84] ss:$8 sm:$0xf]   ;;  %2284 = vst.msk [vmem:[#allocation0 + $0x68] sm:$0xff] %vm2166_vm1, %v2281_v1  }
  0xc7   :  { %4521 = vrot.lane.b32.xlu2 %v4520_v20, %s4722_s5  ;;  %v3024_v11 = vld [vmem:[#allocation1 + $0x84] ss:$8 sm:$0xf0]   ;;  %v3309_v12 = vld [vmem:[#allocation1 + $0x2] ss:$8 sm:$0xf0]  }
  0xc8   :  { %v3033_v14 = vld [vmem:[#allocation1 + $0x184] ss:$8 sm:$0xf]   ;;  %2320 = vst.msk [vmem:[#allocation0 + $0x88] sm:$0xff] %vm2166_vm1, %v2317_v8   ;;  %v3311_v16 = vsel %vm2164_vm0, %v3309_v12, %v3307_v9  ;;  %v3026_v26 = vsel %vm2164_vm0, %v3024_v11, %v3022_v10 }
  0xc9   :  { %v3035_v15 = vld [vmem:[#allocation1 + $0x184] ss:$8 sm:$0xf0]   ;;  %v3317_v17 = vld [vmem:[#allocation1 + $0x102] ss:$8 sm:$0xf]  }
  0xca   :  { %v3319_v18 = vld [vmem:[#allocation1 + $0x102] ss:$8 sm:$0xf0]   ;;  %v3037_v30 = vsel %vm2164_vm0, %v3035_v15, %v3033_v14  ;;  %v2232_v34 = vld [vmem:[#allocation1 + $0x200] ss:$8 sm:$0xf]  }
  0xcb   :  { %v3328_v19 = vld [vmem:[#allocation1 + $0x202] ss:$8 sm:$0xf]   ;;  %v3321_v20 = vsel %vm2164_vm0, %v3319_v18, %v3317_v17  ;;  %v2234_v35 = vld [vmem:[#allocation1 + $0x200] ss:$8 sm:$0xf0]   ;;  %v4565_v40 = vpack.i.bf16 %v3037_v30, %v3026_v26 }
  0xcc   :  { %v3330_v21 = vld [vmem:[#allocation1 + $0x202] ss:$8 sm:$0xf0]   ;;  %v4630_v23 = vpack.i.bf16 %v3321_v20, %v3311_v16  ;;  %v2268_v36 = vld [vmem:[#allocation1 + $0x300] ss:$8 sm:$0xf]   ;;  %v2236_v37 = vsel %vm2164_vm0, %v2234_v35, %v2232_v34 }
  0xcd   :  { %v3339_v22 = vld [vmem:[#allocation1 + $0x302] ss:$8 sm:$0xf]   ;;  %v3332_v24 = vsel %vm2164_vm0, %v3330_v21, %v3328_v19  ;;  %v2270_v39 = vld [vmem:[#allocation1 + $0x300] ss:$8 sm:$0xf0]  }
  0xce   :  { %4621 = vrot.lane.b32.xlu1 %v4620_v63, %s4724_s11  ;;  %v3341_v25 = vld [vmem:[#allocation1 + $0x302] ss:$8 sm:$0xf0]   ;;  %4631 = vrot.lane.b32.xlu0 %v4630_v23, %s4725_s28  ;;  %v3088_v41 = vld [vmem:[#allocation1 + $0x2c4] ss:$8 sm:$0xf]   ;;  %v2272_v46 = vsel %vm2164_vm0, %v2270_v39, %v2268_v36 }
  0xcf   :  { %4536 = vrot.lane.b32.xlu2 %v4535_v45, %s4722_s5  ;;  %v3343_v28 = vsel %vm2164_vm0, %v3341_v25, %v3339_v22  ;;  %v3090_v42 = vld [vmem:[#allocation1 + $0x2c4] ss:$8 sm:$0xf0]   ;;  %v4414_v45 = vunpack.i.h.bf16 %v5080_v3  ;;  %v2205_v47 = vld [vmem:[#allocation1 + $0x140] ss:$8 sm:$0xf]  }
  0xd0   :  { %v5098_v29 = vpop.permute.xlu0 %4436  ;;  %v4635_v33 = vpack.i.bf16 %v3343_v28, %v3332_v24  ;;  %v3099_v43 = vld [vmem:[#allocation1 + $0x3c4] ss:$8 sm:$0xf]   ;;  %2239 = vst.msk [vmem:[#allocation0 + $0x40] sm:$0xff] %vm2166_vm1, %v2236_v37   ;;  %v3092_v57 = vsel %vm2164_vm0, %v3090_v42, %v3088_v41 }
  0xd1   :  { %v3101_v44 = vld [vmem:[#allocation1 + $0x3c4] ss:$8 sm:$0xf0]   ;;  %v2207_v48 = vld [vmem:[#allocation1 + $0x140] ss:$8 sm:$0xf0]   ;;  %v4438_v37 = vunpack.i.l.bf16 %v5098_v29  ;;  %v4439_v29 = vunpack.i.h.bf16 %v5098_v29 }
  0xd2   :  { %2275 = vst.msk [vmem:[#allocation0 + $0x60] sm:$0xff] %vm2166_vm1, %v2272_v46   ;;  %v2209_v49 = vsel %vm2164_vm0, %v2207_v48, %v2205_v47  ;;  %v2241_v50 = vld [vmem:[#allocation1 + $0x240] ss:$8 sm:$0xf]   ;;  %v3103_v58 = vsel %vm2164_vm0, %v3101_v44, %v3099_v43 }
  0xd3   :  { %2352 = vst.msk [vmem:[#allocation0 + $0x40] sm:$0xff] %vm2329_vm2, %v4413_v38   ;;  %v2243_v51 = vld [vmem:[#allocation1 + $0x240] ss:$8 sm:$0xf0]   ;;  %v4580_v0 = vpack.i.bf16 %v3103_v58, %v3092_v57 }
  0xd4   :  { %2363 = vst.msk [vmem:[#allocation0 + $0x60] sm:$0xff] %vm2329_vm2, %v4414_v45   ;;  %v2245_v53 = vsel %vm2164_vm0, %v2243_v51, %v2241_v50  ;;  %v2178_v55 = vld [vmem:[#allocation1 + $0x80] ss:$8 sm:$0xf]  }
  0xd5   :  { %2212 = vst.msk [vmem:[#allocation0 + $0x28] sm:$0xff] %vm2166_vm1, %v2209_v49   ;;  %v2180_v59 = vld [vmem:[#allocation1 + $0x80] ss:$8 sm:$0xf0]  }
  0xd6   :  { %4636 = vrot.lane.b32.xlu1 %v4635_v33, %s4725_s28  ;;  %2248 = vst.msk [vmem:[#allocation0 + $0x48] sm:$0xff] %vm2166_vm1, %v2245_v53   ;;  %v2182_v61 = vsel %vm2164_vm0, %v2180_v59, %v2178_v55  ;;  %v2214_v62 = vld [vmem:[#allocation1 + $0x180] ss:$8 sm:$0xf]  }
  0xd7   :  { %4551 = vrot.lane.b32.xlu2 %v4550_v13, %s4723_s0  ;;  %2407 = vst.msk [vmem:[#allocation0 + $0x48] sm:$0xff] %vm2329_vm2, %v4424_v52   ;;  %v2216_v63 = vld [vmem:[#allocation1 + $0x180] ss:$8 sm:$0xf0]  }
  0xd8   :  { %v4427_v27 = vpop.permute.xlu2 %4426  ;;  %v5123_v60 = vpop.permute.xlu0 %4451  ;;  %v3153_v1 = vld [vmem:[#allocation1 + $0x403] ss:$8 sm:$0xf]   ;;  %2396 = vst.msk [vmem:[#allocation0 + $0x28] sm:$0xff] %vm2329_vm2, %v4423_v54   ;;  %v2218_v5 = vsel %vm2164_vm0, %v2216_v63, %v2214_v62 }
  0xd9   :  { %v4429_v31 = vunpack.i.h.bf16 %v4427_v27  ;;  %v4428_v32 = vunpack.i.l.bf16 %v4427_v27  ;;  %v3155_v2 = vld [vmem:[#allocation1 + $0x403] ss:$8 sm:$0xf0]   ;;  %v3372_v6 = vld [vmem:[#allocation1 + $0x142] ss:$8 sm:$0xf]  }
  0xda   :  { %v3164_v3 = vld [vmem:[#allocation1 + $0x43] ss:$8 sm:$0xf]   ;;  %2185 = vst.msk [vmem:[#allocation0 + $0x10] sm:$0xff] %vm2166_vm1, %v2182_v61   ;;  %v3157_v16 = vsel %vm2164_vm0, %v3155_v2, %v3153_v1 }
  0xdb   :  { %2418 = vst.msk [vmem:[#allocation0 + $0x68] sm:$0xff] %vm2329_vm2, %v4428_v32   ;;  %v3166_v4 = vld [vmem:[#allocation1 + $0x43] ss:$8 sm:$0xf0]  }
  0xdc   :  { %2429 = vst.msk [vmem:[#allocation0 + $0x88] sm:$0xff] %vm2329_vm2, %v4429_v31   ;;  %v3374_v7 = vld [vmem:[#allocation1 + $0x142] ss:$8 sm:$0xf0]   ;;  %v3168_v17 = vsel %vm2164_vm0, %v3166_v4, %v3164_v3 }
  0xdd   :  { %2221 = vst.msk [vmem:[#allocation0 + $0x30] sm:$0xff] %vm2166_vm1, %v2218_v5   ;;  %v3376_v8 = vsel %vm2164_vm0, %v3374_v7, %v3372_v6  ;;  %v3383_v9 = vld [vmem:[#allocation1 + $0x242] ss:$8 sm:$0xf]   ;;  %v4595_v28 = vpack.i.bf16 %v3168_v17, %v3157_v16  ;;  %v4454_v7 = vunpack.i.h.bf16 %v5123_v60  ;;  %v4453_v60 = vunpack.i.l.bf16 %v5123_v60 }
  0xde   :  { %v3385_v10 = vld [vmem:[#allocation1 + $0x242] ss:$8 sm:$0xf0]   ;;  %v2250_v26 = vld [vmem:[#allocation1 + $0x280] ss:$8 sm:$0xf]  }
  0xdf   :  { %4566 = vrot.lane.b32.xlu2 %v4565_v40, %s4723_s0  ;;  %v3394_v11 = vld [vmem:[#allocation1 + $0x342] ss:$8 sm:$0xf]   ;;  %v3387_v12 = vsel %vm2164_vm0, %v3385_v10, %v3383_v9  ;;  %v3219_v30 = vld [vmem:[#allocation1 + $0x83] ss:$8 sm:$0xf]  }
  0xe0   :  { %v5118_v56 = vpop.permute.xlu1 %4441  ;;  %v3396_v13 = vld [vmem:[#allocation1 + $0x342] ss:$8 sm:$0xf0]   ;;  %v4645_v18 = vpack.i.bf16 %v3387_v12, %v3376_v8  ;;  %v5142_v27 = vpop.permute.xlu0 %4466  ;;  %v3221_v31 = vld [vmem:[#allocation1 + $0x83] ss:$8 sm:$0xf0]  }
  0xe1   :  { %v3405_v14 = vld [vmem:[#allocation1 + $0x442] ss:$8 sm:$0xf]   ;;  %v3398_v19 = vsel %vm2164_vm0, %v3396_v13, %v3394_v11  ;;  %v3230_v32 = vld [vmem:[#allocation1 + $0x183] ss:$8 sm:$0xf]   ;;  %v3223_v45 = vsel %vm2164_vm0, %v3221_v31, %v3219_v30  ;;  %v4444_v48 = vunpack.i.h.bf16 %v5118_v56  ;;  %v4443_v50 = vunpack.i.l.bf16 %v5118_v56 }
  0xe2   :  { %v3407_v20 = vld [vmem:[#allocation1 + $0x442] ss:$8 sm:$0xf0]   ;;  %4646 = vrot.lane.b32.xlu0 %v4645_v18, %s4725_s28  ;;  %v3232_v33 = vld [vmem:[#allocation1 + $0x183] ss:$8 sm:$0xf0]  }
  0xe3   :  { %v3409_v22 = vsel %vm2164_vm0, %v3407_v20, %v3405_v14  ;;  %v2252_v34 = vld [vmem:[#allocation1 + $0x280] ss:$8 sm:$0xf0]   ;;  %v3234_v46 = vsel %vm2164_vm0, %v3232_v33, %v3230_v32  ;;  %v3438_v59 = vld [vmem:[#allocation1 + $0x282] ss:$8 sm:$0xf]  }
  0xe4   :  { %v4650_v25 = vpack.i.bf16 %v3409_v22, %v3398_v19  ;;  %v2286_v35 = vld [vmem:[#allocation1 + $0x380] ss:$8 sm:$0xf]   ;;  %v2254_v36 = vsel %vm2164_vm0, %v2252_v34, %v2250_v26  ;;  %v4610_v53 = vpack.i.bf16 %v3234_v46, %v3223_v45  ;;  %v3440_v61 = vld [vmem:[#allocation1 + $0x282] ss:$8 sm:$0xf0]  }
  0xe5   :  { %v2288_v38 = vld [vmem:[#allocation1 + $0x380] ss:$8 sm:$0xf0]   ;;  %2257 = vst.msk [vmem:[#allocation0 + $0x50] sm:$0xff] %vm2166_vm1, %v2254_v36   ;;  %v3442_v62 = vsel %vm2164_vm0, %v3440_v61, %v3438_v59 }
  0xe6   :  { %4651 = vrot.lane.b32.xlu1 %v4650_v25, %s4725_s28  ;;  %v2290_v39 = vsel %vm2164_vm0, %v2288_v38, %v2286_v35  ;;  %v2187_v40 = vld [vmem:[#allocation1 + $0xc0] ss:$8 sm:$0xf]   ;;  %2462 = vst.msk [vmem:[#allocation0 + $0x50] sm:$0xff] %vm2329_vm2, %v4438_v37  }
  0xe7   :  { %4581 = vrot.lane.b32.xlu2 %v4580_v0, %s4723_s0  ;;  %v2189_v41 = vld [vmem:[#allocation1 + $0xc0] ss:$8 sm:$0xf0]   ;;  %2293 = vst.msk [vmem:[#allocation0 + $0x70] sm:$0xff] %vm2166_vm1, %v2290_v39  }
  0xe8   :  { %v5135_v15 = vpop.permute.xlu1 %4456  ;;  %v2191_v42 = vsel %vm2164_vm0, %v2189_v41, %v2187_v40  ;;  %v2223_v43 = vld [vmem:[#allocation1 + $0x1c0] ss:$8 sm:$0xf]   ;;  %2473 = vst.msk [vmem:[#allocation0 + $0x70] sm:$0xff] %vm2329_vm2, %v4439_v29   ;;  %v5167_v56 = vpop.permute.xlu0 %4481  ;;  %v4468_v40 = vunpack.i.l.bf16 %v5142_v27  ;;  %v4469_v27 = vunpack.i.h.bf16 %v5142_v27 }
  0xe9   :  { %v4432_v21 = vpop.permute.xlu2 %4431  ;;  %v2225_v47 = vld [vmem:[#allocation1 + $0x1c0] ss:$8 sm:$0xf0]   ;;  %2194 = vst.msk [vmem:[#allocation0 + $0x18] sm:$0xff] %vm2166_vm1, %v2191_v42  }
  0xea   :  { %v4434_v23 = vunpack.i.h.bf16 %v4432_v21  ;;  %v4433_v24 = vunpack.i.l.bf16 %v4432_v21  ;;  %v2227_v49 = vsel %vm2164_vm0, %v2225_v47, %v2223_v43  ;;  %v2259_v51 = vld [vmem:[#allocation1 + $0x2c0] ss:$8 sm:$0xf]   ;;  %2484 = vst.msk [vmem:[#allocation0 + $0x18] sm:$0xff] %vm2329_vm2, %v4443_v50   ;;  %v4459_v21 = vunpack.i.h.bf16 %v5135_v15 }
  0xeb   :  { %v2261_v52 = vld [vmem:[#allocation1 + $0x2c0] ss:$8 sm:$0xf0]   ;;  %2230 = vst.msk [vmem:[#allocation0 + $0x38] sm:$0xff] %vm2166_vm1, %v2227_v49   ;;  %v4458_v15 = vunpack.i.l.bf16 %v5135_v15 }
  0xec   :  { %2451 = vst.msk [vmem:[#allocation0 + $0x30] sm:$0xff] %vm2329_vm2, %v4434_v23   ;;  %v2263_v54 = vsel %vm2164_vm0, %v2261_v52, %v2259_v51  ;;  %v2295_v55 = vld [vmem:[#allocation1 + $0x3c0] ss:$8 sm:$0xf]  }
  0xed   :  { %2440 = vst.msk [vmem:[#allocation0 + $0x10] sm:$0xff] %vm2329_vm2, %v4433_v24   ;;  %v2297_v57 = vld [vmem:[#allocation1 + $0x3c0] ss:$8 sm:$0xf0]  }
  0xee   :  { %2495 = vst.msk [vmem:[#allocation0 + $0x38] sm:$0xff] %vm2329_vm2, %v4444_v48   ;;  %v2299_v58 = vsel %vm2164_vm0, %v2297_v57, %v2295_v55  ;;  %v3449_v63 = vld [vmem:[#allocation1 + $0x382] ss:$8 sm:$0xf]  }
  0xef   :  { %4596 = vrot.lane.b32.xlu2 %v4595_v28, %s4724_s11  ;;  %2266 = vst.msk [vmem:[#allocation0 + $0x58] sm:$0xff] %vm2166_vm1, %v2263_v54   ;;  %v3451_v1 = vld [vmem:[#allocation1 + $0x382] ss:$8 sm:$0xf0]  }
  0xf0   :  { %v5155_v44 = vpop.permute.xlu1 %4471  ;;  %2302 = vst.msk [vmem:[#allocation0 + $0x78] sm:$0xff] %vm2166_vm1, %v2299_v58   ;;  %v3460_v2 = vld [vmem:[#allocation1 + $0xc2] ss:$8 sm:$0xf]   ;;  %v3453_v4 = vsel %vm2164_vm0, %v3451_v1, %v3449_v63 }
  0xf1   :  { %v3462_v5 = vld [vmem:[#allocation1 + $0xc2] ss:$8 sm:$0xf0]   ;;  %v4660_v10 = vpack.i.bf16 %v3453_v4, %v3442_v62  ;;  %v3285_v13 = vld [vmem:[#allocation1 + $0x2c3] ss:$8 sm:$0xf]   ;;  %v5187_v22 = vpop.permute.xlu0 %4496  ;;  %v4473_v47 = vunpack.i.l.bf16 %v5155_v44  ;;  %v4474_v44 = vunpack.i.h.bf16 %v5155_v44 }
  0xf2   :  { %v3471_v6 = vld [vmem:[#allocation1 + $0x1c2] ss:$8 sm:$0xf]   ;;  %v3464_v11 = vsel %vm2164_vm0, %v3462_v5, %v3460_v2  ;;  %v3287_v16 = vld [vmem:[#allocation1 + $0x2c3] ss:$8 sm:$0xf0]  }
  0xf3   :  { %v3473_v12 = vld [vmem:[#allocation1 + $0x1c2] ss:$8 sm:$0xf0]   ;;  %v3296_v17 = vld [vmem:[#allocation1 + $0x3c3] ss:$8 sm:$0xf]   ;;  %4661 = vrot.lane.b32.xlu0 %v4660_v10, %s4725_s28  ;;  %v3289_v19 = vsel %vm2164_vm0, %v3287_v16, %v3285_v13 }
  0xf4   :  { %v3475_v14 = vsel %vm2164_vm0, %v3473_v12, %v3471_v6  ;;  %v3298_v20 = vld [vmem:[#allocation1 + $0x3c3] ss:$8 sm:$0xf0]   ;;  %v3504_v24 = vld [vmem:[#allocation1 + $0x1] ss:$8 sm:$0xf]   ;;  %v4483_v6 = vunpack.i.l.bf16 %v5167_v56  ;;  %v4484_v56 = vunpack.i.h.bf16 %v5167_v56 }
  0xf5   :  { %v4665_v18 = vpack.i.bf16 %v3475_v14, %v3464_v11  ;;  %v3300_v23 = vsel %vm2164_vm0, %v3298_v20, %v3296_v17  ;;  %2538 = vst.msk [vmem:[#allocation0 + $0x20] sm:$0xff] %vm2526_vm3, %v4454_v7   ;;  %v3506_v26 = vld [vmem:[#allocation1 + $0x1] ss:$8 sm:$0xf0]  }
  0xf6   :  { %v4625_v25 = vpack.i.bf16 %v3300_v23, %v3289_v19  ;;  %2527 = vst.msk [vmem:[#allocation0] sm:$0xff] %vm2526_vm3, %v4453_v60   ;;  %v3508_v28 = vsel %vm2164_vm0, %v3506_v26, %v3504_v24  ;;  %v3514_v30 = vld [vmem:[#allocation1 + $0x101] ss:$8 sm:$0xf]  }
  0xf7   :  { %4611 = vrot.lane.b32.xlu2 %v4610_v53, %s4724_s11  ;;  %4666 = vrot.lane.b32.xlu1 %v4665_v18, %s4725_s28  ;;  %2560 = vst.msk [vmem:[#allocation0 + $0x60] sm:$0xff] %vm2526_vm3, %v4459_v21   ;;  %v3516_v32 = vld [vmem:[#allocation1 + $0x101] ss:$8 sm:$0xf0]  }
  0xf8   :  { %v5176_v0 = vpop.permute.xlu1 %4486  ;;  %2549 = vst.msk [vmem:[#allocation0 + $0x40] sm:$0xff] %vm2526_vm3, %v4458_v15   ;;  %v3518_v34 = vsel %vm2164_vm0, %v3516_v32, %v3514_v30  ;;  %v3525_v35 = vld [vmem:[#allocation1 + $0x201] ss:$8 sm:$0xf]  }
  0xf9   :  { %v4447_v3 = vpop.permute.xlu2 %4446  ;;  %v4675_v38 = vpack.i.bf16 %v3518_v34, %v3508_v28  ;;  %v3527_v29 = vld [vmem:[#allocation1 + $0x201] ss:$8 sm:$0xf0]   ;;  %v3350_v43 = vld [vmem:[#allocation1 + $0x402] ss:$8 sm:$0xf]   ;;  %v5217_v57 = vpop.permute.xlu0 %4511  ;;  %v4489_v13 = vunpack.i.h.bf16 %v5176_v0  ;;  %v4488_v0 = vunpack.i.l.bf16 %v5176_v0 }
  0xfa   :  { %v4449_v8 = vunpack.i.h.bf16 %v4447_v3  ;;  %v4448_v9 = vunpack.i.l.bf16 %v4447_v3  ;;  %v3536_v39 = vld [vmem:[#allocation1 + $0x301] ss:$8 sm:$0xf]   ;;  %v3529_v41 = vsel %vm2164_vm0, %v3527_v29, %v3525_v35  ;;  %v3352_v46 = vld [vmem:[#allocation1 + $0x402] ss:$8 sm:$0xf0]  }
  0xfb   :  { %v3538_v42 = vld [vmem:[#allocation1 + $0x301] ss:$8 sm:$0xf0]   ;;  %4676 = vrot.lane.b32.xlu0 %v4675_v38, %s4726_s13  ;;  %v3354_v49 = vsel %vm2164_vm0, %v3352_v46, %v3350_v43  ;;  %v3361_v50 = vld [vmem:[#allocation1 + $0x42] ss:$8 sm:$0xf]  }
  0xfc   :  { %2517 = vst.msk [vmem:[#allocation0 + $0x78] sm:$0xff] %vm2329_vm2, %v4449_v8   ;;  %v3540_v45 = vsel %vm2164_vm0, %v3538_v42, %v3536_v39  ;;  %v3363_v51 = vld [vmem:[#allocation1 + $0x42] ss:$8 sm:$0xf0]  }
  0xfd   :  { %2506 = vst.msk [vmem:[#allocation0 + $0x58] sm:$0xff] %vm2329_vm2, %v4448_v9   ;;  %v4680_v48 = vpack.i.bf16 %v3540_v45, %v3529_v41  ;;  %v3365_v52 = vsel %vm2164_vm0, %v3363_v51, %v3361_v50  ;;  %v3569_v53 = vld [vmem:[#allocation1 + $0x141] ss:$8 sm:$0xf]  }
  0xfe   :  { %2593 = vst.msk [vmem:[#allocation0 + $0x28] sm:$0xff] %vm2526_vm3, %v4468_v40   ;;  %v4640_v54 = vpack.i.bf16 %v3365_v52, %v3354_v49  ;;  %v3571_v55 = vld [vmem:[#allocation1 + $0x141] ss:$8 sm:$0xf0]  }
  0xff   :  { %4626 = vrot.lane.b32.xlu2 %v4625_v25, %s4724_s11  ;;  %4681 = vrot.lane.b32.xlu1 %v4680_v48, %s4726_s13  ;;  %2604 = vst.msk [vmem:[#allocation0 + $0x48] sm:$0xff] %vm2526_vm3, %v4469_v27   ;;  %v3573_v59 = vsel %vm2164_vm0, %v3571_v55, %v3569_v53  ;;  %v3580_v61 = vld [vmem:[#allocation1 + $0x241] ss:$8 sm:$0xf]  }
 0x100   :  { %v5196_v31 = vpop.permute.xlu1 %4501  ;;  %2615 = vst.msk [vmem:[#allocation0 + $0x68] sm:$0xff] %vm2526_vm3, %v4473_v47   ;;  %v3582_v1 = vld [vmem:[#allocation1 + $0x241] ss:$8 sm:$0xf0]  }
 0x101   :  { %v4462_v33 = vpop.permute.xlu2 %4461  ;;  %2626 = vst.msk [vmem:[#allocation0 + $0x88] sm:$0xff] %vm2526_vm3, %v4474_v44   ;;  %v3591_v2 = vld [vmem:[#allocation1 + $0x341] ss:$8 sm:$0xf]   ;;  %v3584_v3 = vsel %vm2164_vm0, %v3582_v1, %v3580_v61  ;;  %v4504_v42 = vunpack.i.h.bf16 %v5196_v31  ;;  %v4503_v31 = vunpack.i.l.bf16 %v5196_v31 }
 0x102   :  { %v4464_v36 = vunpack.i.h.bf16 %v4462_v33  ;;  %v4463_v37 = vunpack.i.l.bf16 %v4462_v33  ;;  %v3593_v4 = vld [vmem:[#allocation1 + $0x341] ss:$8 sm:$0xf0]   ;;  %v4690_v7 = vpack.i.bf16 %v3584_v3, %v3573_v59  ;;  %v3416_v12 = vld [vmem:[#allocation1 + $0x82] ss:$8 sm:$0xf]   ;;  %v5239_v21 = vpop.permute.xlu0 %4526 }
 0x103   :  { %v3602_v5 = vld [vmem:[#allocation1 + $0x441] ss:$8 sm:$0xf]   ;;  %v3595_v8 = vsel %vm2164_vm0, %v3593_v4, %v3591_v2  ;;  %v3418_v16 = vld [vmem:[#allocation1 + $0x82] ss:$8 sm:$0xf0]   ;;  %v4528_v4 = vunpack.i.l.bf16 %v5239_v21 }
 0x104   :  { %2582 = vst.msk [vmem:[#allocation0 + $0x8] sm:$0xff] %vm2526_vm3, %v4464_v36   ;;  %v3604_v9 = vld [vmem:[#allocation1 + $0x441] ss:$8 sm:$0xf0]   ;;  %4691 = vrot.lane.b32.xlu0 %v4690_v7, %s4726_s13  ;;  %v3420_v60 = vsel %vm2164_vm0, %v3418_v16, %v3416_v12  ;;  %v4498_v36 = vunpack.i.l.bf16 %v5187_v22  ;;  %v4499_v22 = vunpack.i.h.bf16 %v5187_v22 }
 0x105   :  { %2571 = vst.msk [vmem:[#allocation0 + $0x80] sm:$0xff] %vm2526_vm3, %v4463_v37   ;;  %v3606_v11 = vsel %vm2164_vm0, %v3604_v9, %v3602_v5  ;;  %v3427_v17 = vld [vmem:[#allocation1 + $0x182] ss:$8 sm:$0xf]   ;;  %v4529_v5 = vunpack.i.h.bf16 %v5239_v21 }
 0x106   :  { %v4695_v14 = vpack.i.bf16 %v3606_v11, %v3595_v8  ;;  %v3429_v18 = vld [vmem:[#allocation1 + $0x182] ss:$8 sm:$0xf0]   ;;  %2659 = vst.msk [vmem:[#allocation0 + $0x50] sm:$0xff] %vm2526_vm3, %v4483_v6  }
 0x107   :  { %4641 = vrot.lane.b32.xlu2 %v4640_v54, %s4725_s28  ;;  %v3431_v19 = vsel %vm2164_vm0, %v3429_v18, %v3427_v17  ;;  %2670 = vst.msk [vmem:[#allocation0 + $0x70] sm:$0xff] %vm2526_vm3, %v4484_v56   ;;  %v3635_v20 = vld [vmem:[#allocation1 + $0x281] ss:$8 sm:$0xf]  }
 0x108   :  { %v5227_v10 = vpop.permute.xlu1 %4516  ;;  %4696 = vrot.lane.b32.xlu1 %v4695_v14, %s4726_s13  ;;  %v4655_v23 = vpack.i.bf16 %v3431_v19, %v3420_v60  ;;  %2692 = vst.msk [vmem:[#allocation0 + $0x38] sm:$0xff] %vm2526_vm3, %v4489_v13   ;;  %v3637_v24 = vld [vmem:[#allocation1 + $0x281] ss:$8 sm:$0xf0]  }
 0x109   :  { %v4477_v58 = vpop.permute.xlu2 %4476  ;;  %2681 = vst.msk [vmem:[#allocation0 + $0x18] sm:$0xff] %vm2526_vm3, %v4488_v0   ;;  %v3639_v28 = vsel %vm2164_vm0, %v3637_v24, %v3635_v20  ;;  %v3646_v30 = vld [vmem:[#allocation1 + $0x381] ss:$8 sm:$0xf]   ;;  %v4519_v3 = vunpack.i.h.bf16 %v5227_v10 }
 0x10a   :  { %v4479_v62 = vunpack.i.h.bf16 %v4477_v58  ;;  %v4478_v63 = vunpack.i.l.bf16 %v4477_v58  ;;  %v3648_v32 = vld [vmem:[#allocation1 + $0x381] ss:$8 sm:$0xf0]   ;;  %v3482_v41 = vld [vmem:[#allocation1 + $0x2c2] ss:$8 sm:$0xf]   ;;  %v4513_v58 = vunpack.i.l.bf16 %v5217_v57  ;;  %v4514_v57 = vunpack.i.h.bf16 %v5217_v57 }
 0x10b   :  { %v3657_v33 = vld [vmem:[#allocation1 + $0xc1] ss:$8 sm:$0xf]   ;;  %v3650_v34 = vsel %vm2164_vm0, %v3648_v32, %v3646_v30  ;;  %v3484_v27 = vld [vmem:[#allocation1 + $0x2c2] ss:$8 sm:$0xf0]  }
 0x10c   :  { %2637 = vst.msk [vmem:[#allocation0 + $0x10] sm:$0xff] %vm2526_vm3, %v4478_v63   ;;  %v3659_v35 = vld [vmem:[#allocation1 + $0xc1] ss:$8 sm:$0xf0]   ;;  %v4705_v38 = vpack.i.bf16 %v3650_v34, %v3639_v28  ;;  %v3486_v47 = vsel %vm2164_vm0, %v3484_v27, %v3482_v41 }
 0x10d   :  { %2648 = vst.msk [vmem:[#allocation0 + $0x30] sm:$0xff] %vm2526_vm3, %v4479_v62   ;;  %v3661_v29 = vsel %vm2164_vm0, %v3659_v35, %v3657_v33  ;;  %v3668_v39 = vld [vmem:[#allocation1 + $0x1c1] ss:$8 sm:$0xf]   ;;  %v4518_v62 = vunpack.i.l.bf16 %v5227_v10 }
 0x10e   :  { %v3670_v40 = vld [vmem:[#allocation1 + $0x1c1] ss:$8 sm:$0xf0]   ;;  %4706 = vrot.lane.b32.xlu0 %v4705_v38, %s4726_s13  ;;  %v3493_v45 = vld [vmem:[#allocation1 + $0x3c2] ss:$8 sm:$0xf]  }
 0x10f   :  { %4656 = vrot.lane.b32.xlu2 %v4655_v23, %s4725_s28  ;;  %v3672_v43 = vsel %vm2164_vm0, %v3670_v40, %v3668_v39  ;;  %v3495_v48 = vld [vmem:[#allocation1 + $0x3c2] ss:$8 sm:$0xf0]   ;;  %2724 = vst.msk [vmem:[#allocation0] sm:$0xff] %vm2723_vm4, %v4498_v36   ;;  %v5259_v49 = vpop.permute.xlu0 %4541 }
 0x110   :  { %v5248_v37 = vpop.permute.xlu1 %4531  ;;  %v4710_v46 = vpack.i.bf16 %v3672_v43, %v3661_v29  ;;  %v3497_v50 = vsel %vm2164_vm0, %v3495_v48, %v3493_v45  ;;  %2735 = vst.msk [vmem:[#allocation0 + $0x20] sm:$0xff] %vm2723_vm4, %v4499_v22   ;;  %v3547_v51 = vld [vmem:[#allocation1 + $0x401] ss:$8 sm:$0xf]   ;;  %v4543_v17 = vunpack.i.l.bf16 %v5259_v49  ;;  %v4544_v19 = vunpack.i.h.bf16 %v5259_v49 }
 0x111   :  { %v4492_v15 = vpop.permute.xlu2 %4491  ;;  %v4670_v52 = vpack.i.bf16 %v3497_v50, %v3486_v47  ;;  %2757 = vst.msk [vmem:[#allocation0 + $0x60] sm:$0xff] %vm2723_vm4, %v4504_v42   ;;  %v3549_v55 = vld [vmem:[#allocation1 + $0x401] ss:$8 sm:$0xf0]   ;;  %v4533_v14 = vunpack.i.l.bf16 %v5248_v37  ;;  %v4534_v16 = vunpack.i.h.bf16 %v5248_v37 }
 0x112   :  { %v4494_v25 = vunpack.i.h.bf16 %v4492_v15  ;;  %v4493_v26 = vunpack.i.l.bf16 %v4492_v15  ;;  %4711 = vrot.lane.b32.xlu1 %v4710_v46, %s4726_s13  ;;  %2746 = vst.msk [vmem:[#allocation0 + $0x40] sm:$0xff] %vm2723_vm4, %v4503_v31   ;;  %v3558_v59 = vld [vmem:[#allocation1 + $0x41] ss:$8 sm:$0xf]   ;;  %v3551_v1 = vsel %vm2164_vm0, %v3549_v55, %v3547_v51 }
 0x113   :  { %v3560_v61 = vld [vmem:[#allocation1 + $0x41] ss:$8 sm:$0xf0]   ;;  %2790 = vst.msk [vmem:[#allocation0 + $0x28] sm:$0xff] %vm2723_vm4, %v4513_v58  }
 0x114   :  { %2703 = vst.msk [vmem:[#allocation0 + $0x58] sm:$0xff] %vm2526_vm3, %v4493_v26   ;;  %v3562_v2 = vsel %vm2164_vm0, %v3560_v61, %v3558_v59  ;;  %v3613_v7 = vld [vmem:[#allocation1 + $0x81] ss:$8 sm:$0xf]  }
 0x115   :  { %2714 = vst.msk [vmem:[#allocation0 + $0x78] sm:$0xff] %vm2526_vm3, %v4494_v25   ;;  %v4685_v6 = vpack.i.bf16 %v3562_v2, %v3551_v1  ;;  %v3615_v8 = vld [vmem:[#allocation1 + $0x81] ss:$8 sm:$0xf0]  }
 0x116   :  { %2801 = vst.msk [vmem:[#allocation0 + $0x48] sm:$0xff] %vm2723_vm4, %v4514_v57   ;;  %v3624_v10 = vld [vmem:[#allocation1 + $0x181] ss:$8 sm:$0xf]   ;;  %v3617_v60 = vsel %vm2164_vm0, %v3615_v8, %v3613_v7 }
 0x117   :  { %4671 = vrot.lane.b32.xlu2 %v4670_v52, %s4725_s28  ;;  %2812 = vst.msk [vmem:[#allocation0 + $0x68] sm:$0xff] %vm2723_vm4, %v4518_v62   ;;  %v4557_v9 = vpop.permute.xlu0 %4556  ;;  %v3626_v13 = vld [vmem:[#allocation1 + $0x181] ss:$8 sm:$0xf0]  }
 0x118   :  { %v4547_v63 = vpop.permute.xlu1 %4546  ;;  %2823 = vst.msk [vmem:[#allocation0 + $0x88] sm:$0xff] %vm2723_vm4, %v4519_v3   ;;  %v3628_v18 = vsel %vm2164_vm0, %v3626_v13, %v3624_v10  ;;  %v3679_v15 = vld [vmem:[#allocation1 + $0x2c1] ss:$8 sm:$0xf]   ;;  %v4558_v34 = vunpack.i.l.bf16 %v4557_v9  ;;  %v4559_v35 = vunpack.i.h.bf16 %v4557_v9 }
 0x119   :  { %v4507_v44 = vpop.permute.xlu2 %4506  ;;  %2856 = vst.msk [vmem:[#allocation0 + $0x50] sm:$0xff] %vm2723_vm4, %v4528_v4   ;;  %v4548_v20 = vunpack.i.l.bf16 %v4547_v63  ;;  %v4549_v21 = vunpack.i.h.bf16 %v4547_v63  ;;  %v4700_v23 = vpack.i.bf16 %v3628_v18, %v3617_v60  ;;  %v3681_v24 = vld [vmem:[#allocation1 + $0x2c1] ss:$8 sm:$0xf0]  }
 0x11a   :  { %v4509_v53 = vunpack.i.h.bf16 %v4507_v44  ;;  %v4508_v54 = vunpack.i.l.bf16 %v4507_v44  ;;  %2867 = vst.msk [vmem:[#allocation0 + $0x70] sm:$0xff] %vm2723_vm4, %v4529_v5   ;;  %v3690_v28 = vld [vmem:[#allocation1 + $0x3c1] ss:$8 sm:$0xf]   ;;  %v3683_v38 = vsel %vm2164_vm0, %v3681_v24, %v3679_v15 }
 0x11b   :  { %2878 = vst.msk [vmem:[#allocation0 + $0x18] sm:$0xff] %vm2723_vm4, %v4533_v14   ;;  %v3692_v33 = vld [vmem:[#allocation1 + $0x3c1] ss:$8 sm:$0xf0]  }
 0x11c   :  { %2768 = vst.msk [vmem:[#allocation0 + $0x80] sm:$0xff] %vm2723_vm4, %v4508_v54   ;;  %v3694_v29 = vsel %vm2164_vm0, %v3692_v33, %v3690_v28 }
 0x11d   :  { %2779 = vst.msk [vmem:[#allocation0 + $0x8] sm:$0xff] %vm2723_vm4, %v4509_v53   ;;  %v4715_v41 = vpack.i.bf16 %v3694_v29, %v3683_v38 }
 0x11e   :  { %2889 = vst.msk [vmem:[#allocation0 + $0x38] sm:$0xff] %vm2723_vm4, %v4534_v16  }
 0x11f   :  { %4686 = vrot.lane.b32.xlu2 %v4685_v6, %s4726_s13  ;;  %2921 = vst.msk [vmem:[#allocation0] sm:$0xff] %vm2920_vm5, %v4543_v17   ;;  %v4572_v25 = vpop.permute.xlu0 %4571 }
 0x120   :  { %v4562_v0 = vpop.permute.xlu1 %4561  ;;  %2932 = vst.msk [vmem:[#allocation0 + $0x20] sm:$0xff] %vm2920_vm5, %v4544_v19   ;;  %v4573_v22 = vunpack.i.l.bf16 %v4572_v25  ;;  %v4574_v40 = vunpack.i.h.bf16 %v4572_v25 }
 0x121   :  { %v4522_v56 = vpop.permute.xlu2 %4521  ;;  %2943 = vst.msk [vmem:[#allocation0 + $0x40] sm:$0xff] %vm2920_vm5, %v4548_v20   ;;  %v4563_v36 = vunpack.i.l.bf16 %v4562_v0  ;;  %v4564_v39 = vunpack.i.h.bf16 %v4562_v0 }
 0x122   :  { %v4524_v11 = vunpack.i.h.bf16 %v4522_v56  ;;  %v4523_v12 = vunpack.i.l.bf16 %v4522_v56  ;;  %2954 = vst.msk [vmem:[#allocation0 + $0x60] sm:$0xff] %vm2920_vm5, %v4549_v21  }
 0x123   :  { %2987 = vst.msk [vmem:[#allocation0 + $0x28] sm:$0xff] %vm2920_vm5, %v4558_v34  }
 0x124   :  { %2834 = vst.msk [vmem:[#allocation0 + $0x10] sm:$0xff] %vm2723_vm4, %v4523_v12  }
 0x125   :  { %2845 = vst.msk [vmem:[#allocation0 + $0x30] sm:$0xff] %vm2723_vm4, %v4524_v11  }
 0x126   :  { %2998 = vst.msk [vmem:[#allocation0 + $0x48] sm:$0xff] %vm2920_vm5, %v4559_v35  }
 0x127   :  { %4701 = vrot.lane.b32.xlu2 %v4700_v23, %s4726_s13  ;;  %3009 = vst.msk [vmem:[#allocation0 + $0x68] sm:$0xff] %vm2920_vm5, %v4563_v36   ;;  %v4587_v42 = vpop.permute.xlu0 %4586 }
 0x128   :  { %v4577_v37 = vpop.permute.xlu1 %4576  ;;  %3020 = vst.msk [vmem:[#allocation0 + $0x88] sm:$0xff] %vm2920_vm5, %v4564_v39   ;;  %v4588_v47 = vunpack.i.l.bf16 %v4587_v42  ;;  %v4589_v49 = vunpack.i.h.bf16 %v4587_v42 }
 0x129   :  { %v4537_v26 = vpop.permute.xlu2 %4536  ;;  %3053 = vst.msk [vmem:[#allocation0 + $0x50] sm:$0xff] %vm2920_vm5, %v4573_v22   ;;  %v4578_v31 = vunpack.i.l.bf16 %v4577_v37  ;;  %v4579_v46 = vunpack.i.h.bf16 %v4577_v37 }
 0x12a   :  { %v4539_v30 = vunpack.i.h.bf16 %v4537_v26  ;;  %v4538_v32 = vunpack.i.l.bf16 %v4537_v26  ;;  %3064 = vst.msk [vmem:[#allocation0 + $0x70] sm:$0xff] %vm2920_vm5, %v4574_v40  }
 0x12b   :  { %3075 = vst.msk [vmem:[#allocation0 + $0x18] sm:$0xff] %vm2920_vm5, %v4578_v31  }
 0x12c   :  { %2900 = vst.msk [vmem:[#allocation0 + $0x58] sm:$0xff] %vm2723_vm4, %v4538_v32  }
 0x12d   :  { %2911 = vst.msk [vmem:[#allocation0 + $0x78] sm:$0xff] %vm2723_vm4, %v4539_v30  }
 0x12e   :  { %3086 = vst.msk [vmem:[#allocation0 + $0x38] sm:$0xff] %vm2920_vm5, %v4579_v46  }
 0x12f   :  { %4716 = vrot.lane.b32.xlu2 %v4715_v41, %s4726_s13  ;;  %3118 = vst.msk [vmem:[#allocation0] sm:$0xff] %vm3117_vm6, %v4588_v47   ;;  %v4602_v51 = vpop.permute.xlu0 %4601 }
 0x130   :  { %v4592_v48 = vpop.permute.xlu1 %4591  ;;  %3129 = vst.msk [vmem:[#allocation0 + $0x20] sm:$0xff] %vm3117_vm6, %v4589_v49   ;;  %v4603_v55 = vunpack.i.l.bf16 %v4602_v51  ;;  %v4604_v58 = vunpack.i.h.bf16 %v4602_v51 }
 0x131   :  { %v4552_v43 = vpop.permute.xlu2 %4551  ;;  %v4593_v50 = vunpack.i.l.bf16 %v4592_v48  ;;  %v4594_v44 = vunpack.i.h.bf16 %v4592_v48 }
 0x132   :  { %v4554_v27 = vunpack.i.h.bf16 %v4552_v43  ;;  %v4553_v45 = vunpack.i.l.bf16 %v4552_v43  ;;  %3184 = vst.msk [vmem:[#allocation0 + $0x28] sm:$0xff] %vm3117_vm6, %v4603_v55  }
 0x133   :  { %3140 = vst.msk [vmem:[#allocation0 + $0x40] sm:$0xff] %vm3117_vm6, %v4593_v50  }
 0x134   :  { %2965 = vst.msk [vmem:[#allocation0 + $0x80] sm:$0xff] %vm2920_vm5, %v4553_v45  }
 0x135   :  { %2976 = vst.msk [vmem:[#allocation0 + $0x8] sm:$0xff] %vm2920_vm5, %v4554_v27  }
 0x136   :  { %3151 = vst.msk [vmem:[#allocation0 + $0x60] sm:$0xff] %vm3117_vm6, %v4594_v44  }
 0x137   :  { %3195 = vst.msk [vmem:[#allocation0 + $0x48] sm:$0xff] %vm3117_vm6, %v4604_v58   ;;  %v4617_v62 = vpop.permute.xlu0 %4616 }
 0x138   :  { %v4607_v59 = vpop.permute.xlu1 %4606  ;;  %v4618_v1 = vunpack.i.l.bf16 %v4617_v62  ;;  %v4619_v4 = vunpack.i.h.bf16 %v4617_v62 }
 0x139   :  { %v4567_v52 = vpop.permute.xlu2 %4566  ;;  %v4609_v57 = vunpack.i.h.bf16 %v4607_v59  ;;  %v4608_v61 = vunpack.i.l.bf16 %v4607_v59 }
 0x13a   :  { %v4569_v53 = vunpack.i.h.bf16 %v4567_v52  ;;  %v4568_v54 = vunpack.i.l.bf16 %v4567_v52  ;;  %3250 = vst.msk [vmem:[#allocation0 + $0x50] sm:$0xff] %vm3117_vm6, %v4618_v1  }
 0x13b   :  { %3206 = vst.msk [vmem:[#allocation0 + $0x68] sm:$0xff] %vm3117_vm6, %v4608_v61  }
 0x13c   :  { %3031 = vst.msk [vmem:[#allocation0 + $0x10] sm:$0xff] %vm2920_vm5, %v4568_v54  }
 0x13d   :  { %3042 = vst.msk [vmem:[#allocation0 + $0x30] sm:$0xff] %vm2920_vm5, %v4569_v53  }
 0x13e   :  { %3217 = vst.msk [vmem:[#allocation0 + $0x88] sm:$0xff] %vm3117_vm6, %v4609_v57  }
 0x13f   :  { %3261 = vst.msk [vmem:[#allocation0 + $0x70] sm:$0xff] %vm3117_vm6, %v4619_v4  }
 0x140   :  { %v4622_v5 = vpop.permute.xlu1 %4621  ;;  %v4632_v10 = vpop.permute.xlu0 %4631 }
 0x141   :  { %v4582_v63 = vpop.permute.xlu2 %4581  ;;  %v4624_v6 = vunpack.i.h.bf16 %v4622_v5  ;;  %v4623_v7 = vunpack.i.l.bf16 %v4622_v5  ;;  %v4634_v11 = vunpack.i.h.bf16 %v4632_v10  ;;  %v4633_v12 = vunpack.i.l.bf16 %v4632_v10 }
 0x142   :  { %v4584_v2 = vunpack.i.h.bf16 %v4582_v63  ;;  %v4583_v3 = vunpack.i.l.bf16 %v4582_v63 }
 0x143   :  { %3272 = vst.msk [vmem:[#allocation0 + $0x18] sm:$0xff] %vm3117_vm6, %v4623_v7  }
 0x144   :  { %3097 = vst.msk [vmem:[#allocation0 + $0x58] sm:$0xff] %vm2920_vm5, %v4583_v3  }
 0x145   :  { %3108 = vst.msk [vmem:[#allocation0 + $0x78] sm:$0xff] %vm2920_vm5, %v4584_v2  }
 0x146   :  { %3283 = vst.msk [vmem:[#allocation0 + $0x38] sm:$0xff] %vm3117_vm6, %v4624_v6  }
 0x147   :  { %3315 = vst.msk [vmem:[#allocation0] sm:$0xff] %vm3314_vm7, %v4633_v12  }
 0x148   :  { %v4637_v13 = vpop.permute.xlu1 %4636  ;;  %3326 = vst.msk [vmem:[#allocation0 + $0x20] sm:$0xff] %vm3314_vm7, %v4634_v11  }
 0x149   :  { %v4597_v8 = vpop.permute.xlu2 %4596  ;;  %v4639_v14 = vunpack.i.h.bf16 %v4637_v13  ;;  %v4638_v16 = vunpack.i.l.bf16 %v4637_v13 }
 0x14a   :  { %v4599_v9 = vunpack.i.h.bf16 %v4597_v8  ;;  %v4598_v56 = vunpack.i.l.bf16 %v4597_v8 }
 0x14b   :  { %3337 = vst.msk [vmem:[#allocation0 + $0x40] sm:$0xff] %vm3314_vm7, %v4638_v16  }
 0x14c   :  { %3162 = vst.msk [vmem:[#allocation0 + $0x80] sm:$0xff] %vm3117_vm6, %v4598_v56  }
 0x14d   :  { %3173 = vst.msk [vmem:[#allocation0 + $0x8] sm:$0xff] %vm3117_vm6, %v4599_v9  }
 0x14e   :  { %3348 = vst.msk [vmem:[#allocation0 + $0x60] sm:$0xff] %vm3314_vm7, %v4639_v14  }
 0x151   :  { %v4612_v17 = vpop.permute.xlu2 %4611 }
 0x152   :  { %v4614_v0 = vunpack.i.h.bf16 %v4612_v17  ;;  %v4613_v60 = vunpack.i.l.bf16 %v4612_v17 }
 0x154   :  { %3228 = vst.msk [vmem:[#allocation0 + $0x10] sm:$0xff] %vm3117_vm6, %v4613_v60   ;;  %v4647_v21 = vpop.permute.xlu0 %4646 }
 0x155   :  { %3239 = vst.msk [vmem:[#allocation0 + $0x30] sm:$0xff] %vm3117_vm6, %v4614_v0   ;;  %v4649_v23 = vunpack.i.h.bf16 %v4647_v21  ;;  %v4648_v15 = vunpack.i.l.bf16 %v4647_v21 }
 0x157   :  { %3381 = vst.msk [vmem:[#allocation0 + $0x28] sm:$0xff] %vm3314_vm7, %v4648_v15  }
 0x158   :  { %v4652_v24 = vpop.permute.xlu1 %4651  ;;  %3392 = vst.msk [vmem:[#allocation0 + $0x48] sm:$0xff] %vm3314_vm7, %v4649_v23  }
 0x159   :  { %v4627_v18 = vpop.permute.xlu2 %4626  ;;  %v4654_v25 = vunpack.i.h.bf16 %v4652_v24  ;;  %v4653_v26 = vunpack.i.l.bf16 %v4652_v24 }
 0x15a   :  { %v4629_v19 = vunpack.i.h.bf16 %v4627_v18  ;;  %v4628_v20 = vunpack.i.l.bf16 %v4627_v18 }
 0x15b   :  { %3403 = vst.msk [vmem:[#allocation0 + $0x68] sm:$0xff] %vm3314_vm7, %v4653_v26  }
 0x15c   :  { %3294 = vst.msk [vmem:[#allocation0 + $0x58] sm:$0xff] %vm3117_vm6, %v4628_v20  }
 0x15d   :  { %3305 = vst.msk [vmem:[#allocation0 + $0x78] sm:$0xff] %vm3117_vm6, %v4629_v19  }
 0x15e   :  { %3414 = vst.msk [vmem:[#allocation0 + $0x88] sm:$0xff] %vm3314_vm7, %v4654_v25  }
 0x161   :  { %v4642_v28 = vpop.permute.xlu2 %4641 }
 0x162   :  { %v4644_v30 = vunpack.i.h.bf16 %v4642_v28  ;;  %v4643_v32 = vunpack.i.l.bf16 %v4642_v28 }
 0x164   :  { %3359 = vst.msk [vmem:[#allocation0 + $0x80] sm:$0xff] %vm3314_vm7, %v4643_v32  }
 0x165   :  { %3370 = vst.msk [vmem:[#allocation0 + $0x8] sm:$0xff] %vm3314_vm7, %v4644_v30   ;;  %v4662_v36 = vpop.permute.xlu0 %4661 }
 0x166   :  { %v4664_v37 = vunpack.i.h.bf16 %v4662_v36  ;;  %v4663_v38 = vunpack.i.l.bf16 %v4662_v36 }
 0x168   :  { %3447 = vst.msk [vmem:[#allocation0 + $0x50] sm:$0xff] %vm3314_vm7, %v4663_v38  }
 0x169   :  { %v4657_v33 = vpop.permute.xlu2 %4656  ;;  %v4667_v29 = vpop.permute.xlu1 %4666  ;;  %3458 = vst.msk [vmem:[#allocation0 + $0x70] sm:$0xff] %vm3314_vm7, %v4664_v37  }
 0x16a   :  { %v4659_v34 = vunpack.i.h.bf16 %v4657_v33  ;;  %v4658_v35 = vunpack.i.l.bf16 %v4657_v33  ;;  %v4669_v39 = vunpack.i.h.bf16 %v4667_v29  ;;  %v4668_v22 = vunpack.i.l.bf16 %v4667_v29 }
 0x16c   :  { %3425 = vst.msk [vmem:[#allocation0 + $0x10] sm:$0xff] %vm3314_vm7, %v4658_v35  }
 0x16d   :  { %3436 = vst.msk [vmem:[#allocation0 + $0x30] sm:$0xff] %vm3314_vm7, %v4659_v34   ;;  %v4677_v41 = vpop.permute.xlu0 %4676 }
 0x16e   :  { %3469 = vst.msk [vmem:[#allocation0 + $0x18] sm:$0xff] %vm3314_vm7, %v4668_v22   ;;  %v4678_v27 = vunpack.i.l.bf16 %v4677_v41  ;;  %v4679_v45 = vunpack.i.h.bf16 %v4677_v41 }
 0x16f   :  { %3480 = vst.msk [vmem:[#allocation0 + $0x38] sm:$0xff] %vm3314_vm7, %v4669_v39  }
 0x170   :  { %3512 = vst.msk [vmem:[#allocation0] sm:$0xff] %vm3511_vm8, %v4678_v27  }
 0x171   :  { %v4672_v40 = vpop.permute.xlu2 %4671  ;;  %v4682_v31 = vpop.permute.xlu1 %4681  ;;  %3523 = vst.msk [vmem:[#allocation0 + $0x20] sm:$0xff] %vm3511_vm8, %v4679_v45  }
 0x172   :  { %v4674_v42 = vunpack.i.h.bf16 %v4672_v40  ;;  %v4673_v43 = vunpack.i.l.bf16 %v4672_v40  ;;  %v4684_v46 = vunpack.i.h.bf16 %v4682_v31  ;;  %v4683_v47 = vunpack.i.l.bf16 %v4682_v31 }
 0x174   :  { %3491 = vst.msk [vmem:[#allocation0 + $0x58] sm:$0xff] %vm3314_vm7, %v4673_v43  }
 0x175   :  { %3502 = vst.msk [vmem:[#allocation0 + $0x78] sm:$0xff] %vm3314_vm7, %v4674_v42  }
 0x176   :  { %3534 = vst.msk [vmem:[#allocation0 + $0x40] sm:$0xff] %vm3511_vm8, %v4683_v47   ;;  %v4692_v44 = vpop.permute.xlu0 %4691 }
 0x177   :  { %3545 = vst.msk [vmem:[#allocation0 + $0x60] sm:$0xff] %vm3511_vm8, %v4684_v46   ;;  %v4694_v51 = vunpack.i.h.bf16 %v4692_v44  ;;  %v4693_v52 = vunpack.i.l.bf16 %v4692_v44  ;;  %v3702_v59 = vld [vmem:[#allocation0] sm:$0xff] }
 0x178   :  { %v3729_v1 = vld [vmem:[#allocation0 + $0x20] sm:$0xff] }
 0x179   :  { %v4687_v48 = vpop.permute.xlu2 %4686  ;;  %3578 = vst.msk [vmem:[#allocation0 + $0x28] sm:$0xff] %vm3511_vm8, %v4693_v52  }
 0x17a   :  { %v4689_v49 = vunpack.i.h.bf16 %v4687_v48  ;;  %v4688_v50 = vunpack.i.l.bf16 %v4687_v48  ;;  %v4697_v53 = vpop.permute.xlu1 %4696  ;;  %3589 = vst.msk [vmem:[#allocation0 + $0x48] sm:$0xff] %vm3511_vm8, %v4694_v51  }
 0x17b   :  { %v4699_v54 = vunpack.i.h.bf16 %v4697_v53  ;;  %v4698_v55 = vunpack.i.l.bf16 %v4697_v53 }
 0x17c   :  { %3556 = vst.msk [vmem:[#allocation0 + $0x80] sm:$0xff] %vm3511_vm8, %v4688_v50  }
 0x17d   :  { %3567 = vst.msk [vmem:[#allocation0 + $0x8] sm:$0xff] %vm3511_vm8, %v4689_v49   ;;  %v3757_v4 = vld [vmem:[#allocation0 + $0x40] sm:$0xff] }
 0x17e   :  { %3600 = vst.msk [vmem:[#allocation0 + $0x68] sm:$0xff] %vm3511_vm8, %v4698_v55   ;;  %v3785_v7 = vld [vmem:[#allocation0 + $0x60] sm:$0xff] }
 0x17f   :  { %3611 = vst.msk [vmem:[#allocation0 + $0x88] sm:$0xff] %vm3511_vm8, %v4699_v54  }
 0x180   :  { %v4707_v63 = vpop.permute.xlu0 %4706  ;;  %v3736_v3 = vld [vmem:[#allocation0 + $0x28] sm:$0xff] }
 0x181   :  { %v4702_v58 = vpop.permute.xlu2 %4701  ;;  %v3764_v5 = vld [vmem:[#allocation0 + $0x48] sm:$0xff]  ;;  %v4287_v6 = vpack.c.bf16 %v3736_v3, %v3729_v1  ;;  %v4708_v13 = vunpack.i.l.bf16 %v4707_v63  ;;  %v4709_v16 = vunpack.i.h.bf16 %v4707_v63 }
 0x182   :  { %v4704_v57 = vunpack.i.h.bf16 %v4702_v58  ;;  %v4703_v61 = vunpack.i.l.bf16 %v4702_v58  ;;  %v4297_v8 = vpack.c.bf16 %v3764_v5, %v3757_v4 }
 0x183   :  { %v3813_v10 = vld [vmem:[#allocation0 + $0x80] sm:$0xff]  ;;  %4391 = vst [vmem:[%s5400_s1 + $0x10] sm:$0xff] %v4287_v6  }
 0x184   :  { %v3708_v62 = vld [vmem:[#allocation0 + $0x8] sm:$0xff]  ;;  %3622 = vst.msk [vmem:[#allocation0 + $0x10] sm:$0xff] %vm3511_vm8, %v4703_v61   ;;  %v4712_v56 = vpop.permute.xlu1 %4711 }
 0x185   :  { %v4277_v2 = vpack.c.bf16 %v3708_v62, %v3702_v59  ;;  %3633 = vst.msk [vmem:[#allocation0 + $0x30] sm:$0xff] %vm3511_vm8, %v4704_v57   ;;  %v3792_v9 = vld [vmem:[#allocation0 + $0x68] sm:$0xff]  ;;  %v4713_v0 = vunpack.i.l.bf16 %v4712_v56  ;;  %v4714_v60 = vunpack.i.h.bf16 %v4712_v56 }
 0x186   :  { %v4307_v11 = vpack.c.bf16 %v3792_v9, %v3785_v7  ;;  %v3820_v12 = vld [vmem:[#allocation0 + $0x88] sm:$0xff]  ;;  %4393 = vst [vmem:[%s5400_s1 + $0x20] sm:$0xff] %v4297_v8  }
 0x187   :  { %4278 = vst [vmem:[%s5400_s1] sm:$0xff] %v4277_v2   ;;  %v4317_v14 = vpack.c.bf16 %v3820_v12, %v3813_v10 }
 0x188   :  { %4395 = vst [vmem:[%s5400_s1 + $0x30] sm:$0xff] %v4307_v11  }
 0x189   :  { %v4717_v17 = vpop.permute.xlu2 %4716  ;;  %4397 = vst [vmem:[%s5400_s1 + $0x40] sm:$0xff] %v4317_v14  }
 0x18a   :  { %3644 = vst.msk [vmem:[#allocation0 + $0x50] sm:$0xff] %vm3511_vm8, %v4708_v13   ;;  %v4718_v18 = vunpack.i.l.bf16 %v4717_v17  ;;  %v4719_v19 = vunpack.i.h.bf16 %v4717_v17 }
 0x18b   :  { %3655 = vst.msk [vmem:[#allocation0 + $0x70] sm:$0xff] %vm3511_vm8, %v4709_v16   ;;  %v3715_v20 = vld [vmem:[#allocation0 + $0x10] sm:$0xff] }
 0x18c   :  { %3666 = vst.msk [vmem:[#allocation0 + $0x18] sm:$0xff] %vm3511_vm8, %v4713_v0   ;;  %v3743_v15 = vld [vmem:[#allocation0 + $0x30] sm:$0xff] }
 0x18d   :  { %3677 = vst.msk [vmem:[#allocation0 + $0x38] sm:$0xff] %vm3511_vm8, %v4714_v60  }
 0x18e   :  { %3688 = vst.msk [vmem:[#allocation0 + $0x58] sm:$0xff] %vm3511_vm8, %v4718_v18  }
 0x18f   :  { %3699 = vst.msk [vmem:[#allocation0 + $0x78] sm:$0xff] %vm3511_vm8, %v4719_v19  }
 0x191   :  { %v3771_v21 = vld [vmem:[#allocation0 + $0x50] sm:$0xff] }
 0x192   :  { %v3799_v24 = vld [vmem:[#allocation0 + $0x70] sm:$0xff] }
 0x193   :  { %v3722_v23 = vld [vmem:[#allocation0 + $0x18] sm:$0xff] }
 0x194   :  { %v4282_v25 = vpack.c.bf16 %v3722_v23, %v3715_v20  ;;  %v3750_v26 = vld [vmem:[#allocation0 + $0x38] sm:$0xff] }
 0x195   :  { %v4292_v28 = vpack.c.bf16 %v3750_v26, %v3743_v15  ;;  %v3778_v30 = vld [vmem:[#allocation0 + $0x58] sm:$0xff] }
 0x196   :  { %4390 = vst [vmem:[%s5400_s1 + $0x8] sm:$0xff] %v4282_v25   ;;  %v4302_v32 = vpack.c.bf16 %v3778_v30, %v3771_v21  ;;  %v3806_v33 = vld [vmem:[#allocation0 + $0x78] sm:$0xff] }
 0x197   :  { %4392 = vst [vmem:[%s5400_s1 + $0x18] sm:$0xff] %v4292_v28   ;;  %v4312_v34 = vpack.c.bf16 %v3806_v33, %v3799_v24 }
 0x198   :  { %4394 = vst [vmem:[%s5400_s1 + $0x28] sm:$0xff] %v4302_v32  }
 0x199   :  { %4396 = vst [vmem:[%s5400_s1 + $0x38] sm:$0xff] %v4312_v34  }

// kernel: tile.23
= control target key start
LH: loop header
LB: loop body
LE: loop exit
PB: predicated region body
PF: predicated region fallthrough
CT: control target
= control target key end

     0   :  { %s22_s0 = inlined_call_operand.vmem [shape: f32[16], index: 0, kind: input, shape index: {}]   ;;  %s23_s1 = inlined_call_operand.vmem [shape: f32[8,16], index: 1, kind: output, shape index: {}]  }
   0x1   :  { %v4_v0 = vld [vmem:[%s22_s0] ss:$0 sm:$0xff] }
   0x2   :  { %5 = vst [vmem:[%s23_s1] sm:$0xff] %v4_v0 }

// kernel: tile.32
= control target key start
LH: loop header
LB: loop body
LE: loop exit
PB: predicated region body
PF: predicated region fallthrough
CT: control target
= control target key end

     0   :  { %s67_s10 = smov 112   ;;  %s68_s11 = smov 80   ;;  %vm3_vm0 = vcmask 130048   ;;  %vm9_vm1 = vcmask 1048448   ;;  %vm15_vm2 = vcmask 917248   ;;  %vm21_vm3 = vcmask 786048   ;;  %s111_s0 = inlined_call_operand.vmem [shape: f32[8,16], index: 0, kind: input, shape index: {}]   ;;  %s112_s1 = inlined_call_operand.vmem [shape: f32[1,128], index: 1, kind: output, shape index: {}]  }
   0x1   :  { %v53_v0 = vld [vmem:[%s111_s0 + $0x7] sm:$0x1]   ;;  %v55_v1 = vld [vmem:[%s111_s0 + $0x5] sm:$0x1]   ;;  %v57_v2 = vld [vmem:[%s111_s0 + $0x3] sm:$0x1]  }
   0x2   :  { %7 = vrot.lane.b32.xlu0 %v53_v0, %s67_s10  ;;  %19 = vrot.lane.b32.xlu1 %v55_v1, %s68_s11  ;;  %s69_s14 = smov 48   ;;  %v54_v3 = vld [vmem:[%s111_s0 + $0x6] sm:$0x1]   ;;  %v56_v4 = vld [vmem:[%s111_s0 + $0x4] sm:$0x1]   ;;  %s70_s21 = smov 96  }
   0x3   :  { %31 = vrot.lane.b32.xlu2 %v57_v2, %s69_s14  ;;  %v58_v5 = vld [vmem:[%s111_s0 + $0x2] sm:$0x1]   ;;  %s71_s22 = smov 64   ;;  %s72_s23 = smov 32   ;;  %v59_v6 = vld [vmem:[%s111_s0 + $0x1] sm:$0x1]  }
   0x4   :  { %s73_s26 = smov 16   ;;  %v2_v7 = vld [vmem:[%s111_s0] sm:$0x1]   ;;  %vm27_vm4 = vcmask 654848   ;;  %vm33_vm5 = vcmask 523648   ;;  %vm39_vm6 = vcmask 392448  }
   0x5   :  { %4 = vst.msk [vmem:[#allocation0] sm:$0x1] %vm3_vm0, %v2_v7   ;;  %vm45_vm7 = vcmask 261248  }
   0xa   :  { %13 = vrot.lane.b32.xlu0 %v54_v3, %s70_s21  ;;  %25 = vrot.lane.b32.xlu1 %v56_v4, %s71_s22 }
   0xb   :  { %37 = vrot.lane.b32.xlu2 %v58_v5, %s72_s23 }
  0x12   :  { %43 = vrot.lane.b32.xlu0 %v59_v6, %s73_s26 }
  0x5d   :  { %v32_v8 = vpop.permute.xlu2 %31  }
  0x65   :  { %v38_v9 = vpop.permute.xlu2 %37  }
  0x74   :  { %v8_v10 = vpop.permute.xlu0 %7   ;;  %v20_v11 = vpop.permute.xlu1 %19  }
  0x75   :  { %10 = vst.msk [vmem:[#allocation0] sm:$0x1] %vm9_vm1, %v8_v10  }
  0x7c   :  { %v14_v12 = vpop.permute.xlu0 %13   ;;  %v26_v13 = vpop.permute.xlu1 %25  }
  0x7d   :  { %16 = vst.msk [vmem:[#allocation0] sm:$0x1] %vm15_vm2, %v14_v12  }
  0x7e   :  { %22 = vst.msk [vmem:[#allocation0] sm:$0x1] %vm21_vm3, %v20_v11  }
  0x7f   :  { %28 = vst.msk [vmem:[#allocation0] sm:$0x1] %vm27_vm4, %v26_v13  }
  0x80   :  { %34 = vst.msk [vmem:[#allocation0] sm:$0x1] %vm33_vm5, %v32_v8  }
  0x81   :  { %40 = vst.msk [vmem:[#allocation0] sm:$0x1] %vm39_vm6, %v38_v9  }
  0x84   :  { %v44_v14 = vpop.permute.xlu0 %43  }
  0x85   :  { %46 = vst.msk [vmem:[#allocation0] sm:$0x1] %vm45_vm7, %v44_v14  }
  0x8c   :  { %v49_v15 = vld [vmem:[#allocation0] sm:$0x1] }
  0x8d   :  { %52 = vst [vmem:[%s112_s1] sm:$0x1] %v49_v15 }

// kernel: tile.39
= control target key start
LH: loop header
LB: loop body
LE: loop exit
PB: predicated region body
PF: predicated region fallthrough
CT: control target
= control target key end

     0   :  { %s7_s6 = smov 3  ;;  %s21_s9 = smov 3  ;;  %vm4_vm0 = vcmask 130048   ;;  %vm11_vm1 = vcmask 1048448   ;;  %vm18_vm2 = vcmask 917248   ;;  %vm25_vm3 = vcmask 786048   ;;  %s119_s0 = inlined_call_operand.vmem [shape: f32[2,8,16], index: 0, kind: input, shape index: {}]   ;;  %s120_s1 = inlined_call_operand.vmem [shape: f32[2,128], index: 1, kind: output, shape index: {}]  }
   0x1   :  { %v61_v0 = vld [vmem:[%s119_s0 + $0x7] ss:$8 sm:%s7_s6]   ;;  %s75_s10 = smov 112   ;;  %v63_v1 = vld [vmem:[%s119_s0 + $0x5] ss:$8 sm:%s21_s9]   ;;  %s76_s13 = smov 80  }
   0x2   :  { %9 = vrot.lane.b32.xlu0 %v61_v0, %s75_s10  ;;  %23 = vrot.lane.b32.xlu1 %v63_v1, %s76_s13  ;;  %s14_s14 = smov 3  ;;  %s28_s15 = smov 3  ;;  %vm32_vm4 = vcmask 654848   ;;  %vm39_vm5 = vcmask 523648   ;;  %vm46_vm6 = vcmask 392448   ;;  %vm53_vm7 = vcmask 261248  }
   0x3   :  { %s35_s16 = smov 3  ;;  %v62_v3 = vld [vmem:[%s119_s0 + $0x6] ss:$8 sm:%s14_s14]   ;;  %s77_s21 = smov 48   ;;  %v64_v4 = vld [vmem:[%s119_s0 + $0x4] ss:$8 sm:%s28_s15]  }
   0x4   :  { %v65_v2 = vld [vmem:[%s119_s0 + $0x3] ss:$8 sm:%s35_s16]   ;;  %s42_s24 = smov 3  ;;  %s78_s25 = smov 96  }
   0x5   :  { %37 = vrot.lane.b32.xlu2 %v65_v2, %s77_s21  ;;  %s79_s26 = smov 64   ;;  %s49_s27 = smov 3  ;;  %v66_v5 = vld [vmem:[%s119_s0 + $0x2] ss:$8 sm:%s42_s24]  }
   0x6   :  { %v67_v6 = vld [vmem:[%s119_s0 + $0x1] ss:$8 sm:%s49_s27]   ;;  %s80_s3 = smov 32   ;;  %s81_s4 = smov 16  }
   0x7   :  { %s2_s5 = smov 3 }
   0x8   :  { %v3_v7 = vld [vmem:[%s119_s0] ss:$8 sm:%s2_s5]  }
   0x9   :  { %5 = vst.msk [vmem:[#allocation0] sm:$0x3] %vm4_vm0, %v3_v7  }
   0xa   :  { %16 = vrot.lane.b32.xlu0 %v62_v3, %s78_s25  ;;  %30 = vrot.lane.b32.xlu1 %v64_v4, %s79_s26 }
   0xd   :  { %44 = vrot.lane.b32.xlu2 %v66_v5, %s80_s3 }
  0x12   :  { %51 = vrot.lane.b32.xlu0 %v67_v6, %s81_s4 }
  0x5f   :  { %v38_v8 = vpop.permute.xlu2 %37  }
  0x67   :  { %v45_v9 = vpop.permute.xlu2 %44  }
  0x74   :  { %v10_v10 = vpop.permute.xlu0 %9   ;;  %v24_v11 = vpop.permute.xlu1 %23  }
  0x75   :  { %12 = vst.msk [vmem:[#allocation0] sm:$0x3] %vm11_vm1, %v10_v10  }
  0x7c   :  { %v17_v12 = vpop.permute.xlu0 %16   ;;  %v31_v13 = vpop.permute.xlu1 %30  }
  0x7d   :  { %19 = vst.msk [vmem:[#allocation0] sm:$0x3] %vm18_vm2, %v17_v12  }
  0x7e   :  { %26 = vst.msk [vmem:[#allocation0] sm:$0x3] %vm25_vm3, %v24_v11  }
  0x7f   :  { %33 = vst.msk [vmem:[#allocation0] sm:$0x3] %vm32_vm4, %v31_v13  }
  0x80   :  { %40 = vst.msk [vmem:[#allocation0] sm:$0x3] %vm39_vm5, %v38_v8  }
  0x81   :  { %47 = vst.msk [vmem:[#allocation0] sm:$0x3] %vm46_vm6, %v45_v9  }
  0x84   :  { %v52_v14 = vpop.permute.xlu0 %51  }
  0x85   :  { %54 = vst.msk [vmem:[#allocation0] sm:$0x3] %vm53_vm7, %v52_v14  }
  0x8c   :  { %v57_v15 = vld [vmem:[#allocation0] sm:$0x3] }
  0x8d   :  { %60 = vst [vmem:[%s120_s1] sm:$0x3] %v57_v15 }

// kernel: block2_forward.1
= control target key start
LH: loop header
LB: loop body
LE: loop exit
PB: predicated region body
PF: predicated region fallthrough
CT: control target
= control target key end

     0   :  { %s2643_s27 = smov 0   ;;  %s3385_s0 = inlined_call_operand.vmem [shape: bf16[2,9,144], index: 0, kind: input, shape index: {}]   ;;  %s3386_s1 = inlined_call_operand.vmem [shape: bf16[2,8,144], index: 1, kind: input, shape index: {}]   ;;  %s3387_s2 = inlined_call_operand.vmem [shape: bf16[3,144,256], index: 2, kind: input, shape index: {}]   ;;  %s3388_s3 = inlined_call_operand.vmem [shape: bf16[3,128,128], index: 3, kind: input, shape index: {}]   ;;  %s3389_s4 = inlined_call_operand.vmem [shape: f32[3,128], index: 4, kind: input, shape index: {}]   ;;  %s3390_s5 = inlined_call_operand.vmem [shape: f32[16,2], index: 5, kind: input, shape index: {}]   ;;  %s3391_s6 = inlined_call_operand.vmem [shape: f32[2,128], index: 6, kind: input, shape index: {}]   ;;  %s3392_s7 = inlined_call_operand.vmem [shape: bf16[196,128], index: 7, kind: input, shape index: {}]   ;;  %s3393_s8 = inlined_call_operand.vmem [shape: f32[2,8,128], index: 8, kind: output, shape index: {}]  }
   0x1 LB: > { %s1979_s28 = sadd.s32 4294967295, %s2573_s27   ;;  %p1983_p0 = scmp.ge.s32.totalorder %s2573_s27, 1  ;;  %s2573_s27 = sphi %s2643_s27, %s18_s27  }
   0x2   : > { %p272_p1 = scmp.lt.s32.totalorder %s2573_s27, 3 }
   0x4   : > { %p273_p2 = pnand %p1983_p0, %p272_p1 }
   0x5   : > { %p310_p3 = scmp.lt.s32.totalorder (!%p273_p2), %s1979_s28, 1  ;;  %s2576_s16 = smov (!%p273_p2), 48  }
   0x6   : > { %276 = sbr.rel (%p273_p2) target bundleno = 1648 (0x670), region = 52  ;;  %s2579_s17 = smov (!%p273_p2), 32  }
   0x7   : > { %s2580_s18 = smov (!%p273_p2), 96   ;;  %s2581_s20 = smov (!%p273_p2), 16  }
   0x8   : > { %s2582_s21 = smov (!%p273_p2), 64   ;;  %s2587_s9 = smov (!%p273_p2), 2  }
   0x9   : > { %s2588_s10 = smov (!%p273_p2), 6   ;;  %s2589_s11 = smov (!%p273_p2), 4  }
   0xa   : > { %s2590_s13 = smov (!%p273_p2), 10   ;;  %s2591_s14 = smov (!%p273_p2), 12  }
   0xb   : > { %v2073_v0 = vld [vmem:[%s3387_s2 + $0x110] sm:$0xf]  ;;  %v2466_v1 = vld [vmem:[%s3387_s2 + $0x114] sm:$0xf0]  ;;  %v2463_v2 = vld [vmem:[%s3387_s2 + $0x104] sm:$0xf] }
   0xc   : > { %v2074_v3 = vor.u32 %v2466_v1, %v2073_v0  ;;  %v2067_v4 = vld [vmem:[%s3387_s2 + $0x108] sm:$0xf0]  ;;  %v2139_v5 = vld [vmem:[%s3387_s2 + $0x70] sm:$0xf]  ;;  %v2446_v6 = vld [vmem:[%s3387_s2 + $0x74] sm:$0xf0] }
   0xd   : > { %v2070_v7 = vor.u32 %v2463_v2, %v2067_v4  ;;  %v2140_v8 = vor.u32 %v2446_v6, %v2139_v5  ;;  %v2065_v9 = vld [vmem:[%s3387_s2 + $0x100] sm:$0xf]  ;;  %v2464_v10 = vld [vmem:[%s3387_s2 + $0x104] sm:$0xf0]  ;;  %v2461_v11 = vld [vmem:[%s3387_s2 + $0xf4] sm:$0xf] }
   0xe   : > { %485 = vmatpush.bf16.msra.mxu1 %v2074_v3  ;;  %v2066_v12 = vor.u32 %v2464_v10, %v2065_v9  ;;  %v2059_v13 = vld [vmem:[%s3387_s2 + $0xf8] sm:$0xf0]  ;;  %v2465_v14 = vld [vmem:[%s3387_s2 + $0x114] sm:$0xf]  ;;  %v2131_v18 = vld [vmem:[%s3387_s2 + $0x60] sm:$0xf] }
   0xf   : > { %v2075_v15 = vld [vmem:[%s3387_s2 + $0x118] sm:$0xf0]  ;;  %491 = vmatpush.bf16.msra.mxu2 %v2070_v7  ;;  %v2062_v16 = vor.u32 %v2461_v11, %v2059_v13  ;;  %v2444_v19 = vld [vmem:[%s3387_s2 + $0x64] sm:$0xf0]  ;;  %v2057_v20 = vld [vmem:[%s3387_s2 + $0xf0] sm:$0xf] }
  0x10   : > { %v2078_v17 = vor.u32 %v2465_v14, %v2075_v15  ;;  %465 = vmatpush.bf16.msra.mxu0 %v2066_v12  ;;  %v2132_v21 = vor.u32 %v2444_v19, %v2131_v18  ;;  %v2462_v22 = vld [vmem:[%s3387_s2 + $0xf4] sm:$0xf0]  ;;  %v2459_v23 = vld [vmem:[%s3387_s2 + $0xe4] sm:$0xf]  ;;  %v2051_v24 = vld [vmem:[%s3387_s2 + $0xe8] sm:$0xf0] }
  0x11   : > { %v2058_v25 = vor.u32 %v2462_v22, %v2057_v20  ;;  %v2147_v26 = vld [vmem:[%s3387_s2 + $0x80] sm:$0xf]  ;;  %v2448_v27 = vld [vmem:[%s3387_s2 + $0x84] sm:$0xf0]  ;;  %v2123_v29 = vld [vmem:[%s3387_s2 + $0x50] sm:$0xf]  ;;  %v2054_v31 = vor.u32 %v2459_v23, %v2051_v24 }
  0x12   : > { %616 = vmatpush.bf16.msrb.mxu1 %v2140_v8  ;;  %511 = vmatpush.bf16.msra.mxu3 %v2078_v17  ;;  %v2148_v28 = vor.u32 %v2448_v27, %v2147_v26  ;;  %v2442_v30 = vld [vmem:[%s3387_s2 + $0x54] sm:$0xf0]  ;;  %s3395_s28 = smov (!%p310_p3, %s1979_s28), 1  ;;  %v2049_v33 = vld [vmem:[%s3387_s2 + $0xe0] sm:$0xf]  ;;  %vm461_vm0 = vcmask 130048  }
  0x13   : > { %492 = vmatpush.bf16.msra.mxu2 %v2062_v16  ;;  %v2124_v32 = vor.u32 %v2442_v30, %v2123_v29  ;;  %v2460_v34 = vld [vmem:[%s3387_s2 + $0xe4] sm:$0xf0]  ;;  %v2457_v35 = vld [vmem:[%s3387_s2 + $0xd4] sm:$0xf]  ;;  %v2043_v36 = vld [vmem:[%s3387_s2 + $0xd8] sm:$0xf0] }
  0x14   : > { %466 = vmatpush.bf16.msra.mxu0 %v2058_v25  ;;  %s2430_s19 = sshll.u32 %s3395_s28, 3  ;;  %v2050_v37 = vor.u32 %v2460_v34, %v2049_v33  ;;  %v2115_v38 = vld [vmem:[%s3387_s2 + $0x40] sm:$0xf]  ;;  %v2440_v39 = vld [vmem:[%s3387_s2 + $0x44] sm:$0xf0]  ;;  %v2046_v44 = vor.u32 %v2457_v35, %v2043_v36  ;;  %s2429_s12 = sshll.u32 %s3395_s28, 4 }
  0x15   : > { %s319_s26 = scalar_lea.vmem %s3386_s1, %s2430_s19  ;;  %v2445_v40 = vld [vmem:[%s3387_s2 + $0x74] sm:$0xf]  ;;  %v2141_v41 = vld [vmem:[%s3387_s2 + $0x78] sm:$0xf0]  ;;  %v2041_v42 = vld [vmem:[%s3387_s2 + $0xd0] sm:$0xf]  ;;  %v2116_v45 = vor.u32 %v2440_v39, %v2115_v38  ;;  %s314_s30 = scalar_lea.vmem %s3385_s0, %s2429_s12 }
  0x16   : > { %617 = vmatpush.bf16.msrb.mxu1 %v2132_v21  ;;  %636 = vmatpush.bf16.msrb.mxu3 %v2148_v28  ;;  %v2756_v43 = vld [vmem:[%s319_s26] sm:$0xff]  ;;  %v2458_v46 = vld [vmem:[%s3387_s2 + $0xd4] sm:$0xf0]  ;;  %v2035_v50 = vld [vmem:[%s3387_s2 + $0xc8] sm:$0xf0]  ;;  %v2144_v52 = vor.u32 %v2445_v40, %v2141_v41  ;;  %s2577_s12 = smov 112  }
  0x17   : > { %493 = vmatpush.bf16.msra.mxu2 %v2054_v31  ;;  %v367_v47 = vunpack.c.h.b16 %v2756_v43  ;;  %v2042_v48 = vor.u32 %v2458_v46, %v2041_v42  ;;  %v2455_v49 = vld [vmem:[%s3387_s2 + $0xc4] sm:$0xf]  ;;  %v2107_v51 = vld [vmem:[%s3387_s2 + $0x30] sm:$0xf]  ;;  %v2438_v54 = vld [vmem:[%s3387_s2 + $0x34] sm:$0xf0] }
  0x18   : > { %467 = vmatpush.bf16.msra.mxu0 %v2050_v37  ;;  %v2443_v53 = vld [vmem:[%s3387_s2 + $0x64] sm:$0xf]  ;;  %v2133_v56 = vld [vmem:[%s3387_s2 + $0x68] sm:$0xf0]  ;;  %v2033_v57 = vld [vmem:[%s3387_s2 + $0xc0] sm:$0xf]  ;;  %v2038_v59 = vor.u32 %v2455_v49, %v2035_v50  ;;  %v2108_v60 = vor.u32 %v2438_v54, %v2107_v51 }
  0x19   : > { %v369_v55 = vpack.c.b16 %v367_v47, %v367_v47  ;;  %v2456_v58 = vld [vmem:[%s3387_s2 + $0xc4] sm:$0xf0]  ;;  %v2453_v61 = vld [vmem:[%s3387_s2 + $0xb4] sm:$0xf]  ;;  %v2027_v63 = vld [vmem:[%s3387_s2 + $0xb8] sm:$0xf0]  ;;  %v2136_v2 = vor.u32 %v2443_v53, %v2133_v56 }
  0x1a   : > { %618 = vmatpush.bf16.msrb.mxu1 %v2124_v32  ;;  %v2034_v62 = vor.u32 %v2456_v58, %v2033_v57  ;;  %v2099_v0 = vld [vmem:[%s3387_s2 + $0x20] sm:$0xf]  ;;  %v2436_v1 = vld [vmem:[%s3387_s2 + $0x24] sm:$0xf0]  ;;  %v2025_v3 = vld [vmem:[%s3387_s2 + $0xb0] sm:$0xf]  ;;  %v2030_v7 = vor.u32 %v2453_v61, %v2027_v63 }
  0x1b   : > { %494 = vmatpush.bf16.msra.mxu2 %v2046_v44  ;;  %2080 = vmatmul.msk.bf16.vlgmr.msra.gmra.mxu3 %vm461_vm0, %v369_v55  ;;  %v2454_v4 = vld [vmem:[%s3387_s2 + $0xb4] sm:$0xf0]  ;;  %v2441_v5 = vld [vmem:[%s3387_s2 + $0x54] sm:$0xf]  ;;  %v2125_v6 = vld [vmem:[%s3387_s2 + $0x58] sm:$0xf0]  ;;  %v2100_v8 = vor.u32 %v2436_v1, %v2099_v0 }
  0x1c   : > { %468 = vmatpush.bf16.msra.mxu0 %v2042_v48  ;;  %642 = vmatpush.bf16.msra.mxu3 %v2144_v52  ;;  %v2451_v9 = vld [vmem:[%s3387_s2 + $0xa4] sm:$0xf]  ;;  %v2026_v10 = vor.u32 %v2454_v4, %v2025_v3  ;;  %v2019_v11 = vld [vmem:[%s3387_s2 + $0xa8] sm:$0xf0]  ;;  %v2091_v12 = vld [vmem:[%s3387_s2 + $0x10] sm:$0xf]  ;;  %v2128_v14 = vor.u32 %v2441_v5, %v2125_v6 }
  0x1d   : > { %2079 = vmatmul.msk.bf16.vlgmr.msra.gmra.mxu1 %vm461_vm0, %v369_v55  ;;  %v2434_v13 = vld [vmem:[%s3387_s2 + $0x14] sm:$0xf0]  ;;  %v325_v15 = vld [vmem:[%s314_s30] sm:$0xff]  ;;  %v2452_v17 = vld [vmem:[%s3387_s2 + $0xa4] sm:$0xf0]  ;;  %v2022_v21 = vor.u32 %v2451_v9, %v2019_v11  ;;  %vm1130_vm1 = vcmask 1047556  }
  0x1e   : > { %619 = vmatpush.bf16.msrb.mxu1 %v2116_v45  ;;  %v2017_v16 = vld [vmem:[%s3387_s2 + $0xa0] sm:$0xf]  ;;  %v2439_v18 = vld [vmem:[%s3387_s2 + $0x44] sm:$0xf]  ;;  %v2117_v19 = vld [vmem:[%s3387_s2 + $0x48] sm:$0xf0]  ;;  %v2092_v22 = vor.u32 %v2434_v13, %v2091_v12  ;;  %v519_v24 = vunpack.c.h.b16 %v325_v15  ;;  %v2872_v36 = vunpack.c.l.b16 %v325_v15  ;;  %v366_v45 = vunpack.c.l.b16 %v2756_v43 }
  0x1f   : > { %495 = vmatpush.bf16.msra.mxu2 %v2038_v59  ;;  %v2840_v20 = vld [vmem:[%s314_s30 + $0x8] sm:$0x11]  ;;  %v2449_v23 = vld [vmem:[%s3387_s2 + $0x94] sm:$0xf]  ;;  %v2018_v25 = vor.u32 %v2452_v17, %v2017_v16  ;;  %v2011_v26 = vld [vmem:[%s3387_s2 + $0x98] sm:$0xf0]  ;;  %v2120_v29 = vor.u32 %v2439_v18, %v2117_v19 }
  0x20   : > { %469 = vmatpush.bf16.msra.mxu0 %v2034_v62  ;;  %643 = vmatpush.bf16.msra.mxu3 %v2136_v2  ;;  %v2083_v27 = vld [vmem:[%s3387_s2] sm:$0xf]  ;;  %v2432_v28 = vld [vmem:[%s3387_s2 + $0x4] sm:$0xf0]  ;;  %v2437_v30 = vld [vmem:[%s3387_s2 + $0x34] sm:$0xf]  ;;  %v689_v37 = vunpack.c.h.b16 %v2840_v20  ;;  %v2014_v38 = vor.u32 %v2449_v23, %v2011_v26  ;;  %v2881_v42 = vpack.c.b16 %v519_v24, %v519_v24  ;;  %v2898_v43 = vpack.c.b16 %v2872_v36, %v2872_v36 }
  0x21   : > { %v2231_v31 = vld [vmem:[%s3387_s2 + $0x190] sm:$0xf]  ;;  %v2482_v32 = vld [vmem:[%s3387_s2 + $0x194] sm:$0xf0]  ;;  %v2109_v33 = vld [vmem:[%s3387_s2 + $0x38] sm:$0xf0]  ;;  %v2084_v39 = vor.u32 %v2432_v28, %v2083_v27 }
  0x22   : > { %620 = vmatpush.bf16.msrb.mxu1 %v2108_v60  ;;  %v2009_v34 = vld [vmem:[%s3387_s2 + $0x90] sm:$0xf]  ;;  %v2450_v35 = vld [vmem:[%s3387_s2 + $0x94] sm:$0xf0]  ;;  %v2481_v40 = vld [vmem:[%s3387_s2 + $0x194] sm:$0xf]  ;;  %v2232_v44 = vor.u32 %v2482_v32, %v2231_v31  ;;  %v2112_v46 = vor.u32 %v2437_v30, %v2109_v33  ;;  %v2906_v55 = vpack.c.b16 %v689_v37, %v519_v24  ;;  %v368_v60 = vpack.c.b16 %v366_v45, %v366_v45 }
  0x23   : > { %496 = vmatpush.bf16.msra.mxu2 %v2030_v7  ;;  %v2233_v41 = vld [vmem:[%s3387_s2 + $0x198] sm:$0xf0]  ;;  %v2435_v47 = vld [vmem:[%s3387_s2 + $0x24] sm:$0xf]  ;;  %v2010_v48 = vor.u32 %v2450_v35, %v2009_v34  ;;  %v2223_v49 = vld [vmem:[%s3387_s2 + $0x180] sm:$0xf]  ;;  %v688_v31 = vunpack.c.l.b16 %v2840_v20 }
  0x24   : > { %470 = vmatpush.bf16.msra.mxu0 %v2026_v10  ;;  %644 = vmatpush.bf16.msra.mxu3 %v2128_v14  ;;  %v2480_v50 = vld [vmem:[%s3387_s2 + $0x184] sm:$0xf0]  ;;  %v2101_v51 = vld [vmem:[%s3387_s2 + $0x28] sm:$0xf0]  ;;  %v2236_v52 = vor.u32 %v2481_v40, %v2233_v41  ;;  %v2239_v53 = vld [vmem:[%s3387_s2 + $0x1a0] sm:$0xf] }
  0x25   : > { %v2484_v54 = vld [vmem:[%s3387_s2 + $0x1a4] sm:$0xf0]  ;;  %v2479_v56 = vld [vmem:[%s3387_s2 + $0x184] sm:$0xf]  ;;  %v2225_v57 = vld [vmem:[%s3387_s2 + $0x188] sm:$0xf0]  ;;  %v2224_v59 = vor.u32 %v2480_v50, %v2223_v49  ;;  %v2104_v61 = vor.u32 %v2435_v47, %v2101_v51 }
  0x26   : > { %621 = vmatpush.bf16.msrb.mxu1 %v2100_v8  ;;  %v2240_v58 = vor.u32 %v2484_v54, %v2239_v53  ;;  %v2215_v62 = vld [vmem:[%s3387_s2 + $0x170] sm:$0xf]  ;;  %v2478_v63 = vld [vmem:[%s3387_s2 + $0x174] sm:$0xf0]  ;;  %v2433_v0 = vld [vmem:[%s3387_s2 + $0x14] sm:$0xf]  ;;  %v2228_v2 = vor.u32 %v2479_v56, %v2225_v57 }
  0x27   : > { %497 = vmatpush.bf16.msra.mxu2 %v2022_v21  ;;  %v2093_v1 = vld [vmem:[%s3387_s2 + $0x18] sm:$0xf0]  ;;  %v702_v3 = vshll.u32 %v2906_v55, 16  ;;  %v2477_v4 = vld [vmem:[%s3387_s2 + $0x174] sm:$0xf]  ;;  %v2216_v8 = vor.u32 %v2478_v63, %v2215_v62  ;;  %s2578_s30 = smov 80  }
  0x28   : > { %471 = vmatpush.bf16.msra.mxu0 %v2018_v25  ;;  %645 = vmatpush.bf16.msra.mxu3 %v2120_v29  ;;  %v2217_v5 = vld [vmem:[%s3387_s2 + $0x178] sm:$0xf0]  ;;  %v2431_v6 = vld [vmem:[%s3387_s2 + $0x4] sm:$0xf]  ;;  %v2085_v7 = vld [vmem:[%s3387_s2 + $0x8] sm:$0xf0]  ;;  %v2096_v11 = vor.u32 %v2433_v0, %v2093_v1 }
  0x29   : > { %v2207_v9 = vld [vmem:[%s3387_s2 + $0x160] sm:$0xf]  ;;  %v2476_v10 = vld [vmem:[%s3387_s2 + $0x164] sm:$0xf0]  ;;  %v2475_v12 = vld [vmem:[%s3387_s2 + $0x164] sm:$0xf]  ;;  %v2220_v15 = vor.u32 %v2477_v4, %v2217_v5 }
  0x2a   : > { %622 = vmatpush.bf16.msrb.mxu1 %v2092_v22  ;;  %v2483_v13 = vld [vmem:[%s3387_s2 + $0x1a4] sm:$0xf]  ;;  %v2241_v14 = vld [vmem:[%s3387_s2 + $0x1a8] sm:$0xf0]  ;;  %v2208_v21 = vor.u32 %v2476_v10, %v2207_v9  ;;  %v2088_v22 = vor.u32 %v2431_v6, %v2085_v7  ;;  %v2199_v23 = vld [vmem:[%s3387_s2 + $0x150] sm:$0xf] }
  0x2b   : > { %498 = vmatpush.bf16.msra.mxu2 %v2014_v38  ;;  %2153 = vmatmul.msk.bf16.vlgmr.msrb.gmra.mxu3 %vm461_vm0, %v2881_v42  ;;  %v2244_v16 = vor.u32 %v2483_v13, %v2241_v14  ;;  %v2209_v17 = vld [vmem:[%s3387_s2 + $0x168] sm:$0xf0]  ;;  %v2447_v18 = vld [vmem:[%s3387_s2 + $0x84] sm:$0xf]  ;;  %v2474_v24 = vld [vmem:[%s3387_s2 + $0x154] sm:$0xf0] }
  0x2c   : > { %646 = vmatpush.bf16.msra.mxu3 %v2112_v46  ;;  %472 = vmatpush.bf16.msra.mxu0 %v2010_v48  ;;  %v2149_v19 = vld [vmem:[%s3387_s2 + $0x88] sm:$0xf0]  ;;  %v700_v25 = vshrl.u32 %v2906_v55, 16  ;;  %v2212_v26 = vor.u32 %v2475_v12, %v2209_v17  ;;  %v704_v27 = vrot.slane %v702_v3, 1  ;;  %v2473_v29 = vld [vmem:[%s3387_s2 + $0x154] sm:$0xf]  ;;  %v2200_v32 = vor.u32 %v2474_v24, %v2199_v23 }
  0x2d   : > { %v2152_v28 = vor.u32 %v2447_v18, %v2149_v19  ;;  %v2201_v30 = vld [vmem:[%s3387_s2 + $0x158] sm:$0xf0]  ;;  %v2191_v33 = vld [vmem:[%s3387_s2 + $0x140] sm:$0xf]  ;;  %v2472_v34 = vld [vmem:[%s3387_s2 + $0x144] sm:$0xf0] }
  0x2e   : > { %623 = vmatpush.bf16.msrb.mxu1 %v2084_v39  ;;  %499 = vmatmul.bf16.vlgmr.msra.gmra.mxu2 %v368_v60  ;;  %v705_v35 = vor.u32 %v704_v27, %v700_v25  ;;  %v2204_v37 = vor.u32 %v2473_v29, %v2201_v30  ;;  %v2471_v38 = vld [vmem:[%s3387_s2 + $0x144] sm:$0xf]  ;;  %v2193_v20 = vld [vmem:[%s3387_s2 + $0x148] sm:$0xf0]  ;;  %v690_v39 = vpack.c.b16 %v688_v31, %v2872_v36  ;;  %v2183_v41 = vld [vmem:[%s3387_s2 + $0x130] sm:$0xf] }
  0x2f   : > { %800 = vmatpush.bf16.msrb.mxu2 %v2232_v44  ;;  %473 = vmatmul.bf16.vlgmr.msra.gmra.mxu0 %v368_v60  ;;  %v2192_v40 = vor.u32 %v2472_v34, %v2191_v33  ;;  %v2470_v44 = vld [vmem:[%s3387_s2 + $0x134] sm:$0xf0]  ;;  %v2196_v45 = vor.u32 %v2471_v38, %v2193_v20  ;;  %v2469_v36 = vld [vmem:[%s3387_s2 + $0x134] sm:$0xf]  ;;  %v2185_v46 = vld [vmem:[%s3387_s2 + $0x138] sm:$0xf0] }
  0x30   : > { %826 = vmatpush.bf16.msrb.mxu0 %v2236_v52  ;;  %647 = vmatpush.bf16.msra.mxu3 %v2104_v61  ;;  %v695_v47 = vshll.u32 %v690_v39, 16  ;;  %v2184_v48 = vor.u32 %v2470_v44, %v2183_v41  ;;  %v2175_v49 = vld [vmem:[%s3387_s2 + $0x120] sm:$0xf]  ;;  %v2468_v50 = vld [vmem:[%s3387_s2 + $0x124] sm:$0xf0]  ;;  %v2188_v51 = vor.u32 %v2469_v36, %v2185_v46  ;;  %v2499_v61 = vld [vmem:[%s3388_s3 + $0x70] sm:$0xff] }
  0x31   : > { %624 = vmatmul.bf16.vlgmr.msrb.gmra.mxu1 %v2898_v43  ;;  %v2467_v53 = vld [vmem:[%s3387_s2 + $0x124] sm:$0xf]  ;;  %v2177_v54 = vld [vmem:[%s3387_s2 + $0x128] sm:$0xf0]  ;;  %v2176_v55 = vor.u32 %v2468_v50, %v2175_v49  ;;  %v2492_v63 = vld [vmem:[%s3388_s3 + $0x38] sm:$0xff]  ;;  %v2575_v27 = vmov 0.0  }
  0x32   : > { %820 = vmatpush.bf16.msra.mxu1 %v2240_v58  ;;  %v697_v52 = vrot.slane %v695_v47, 1  ;;  %v2180_v56 = vor.u32 %v2467_v53, %v2177_v54  ;;  %v2498_v0 = vld [vmem:[%s3388_s3 + $0x68] sm:$0xff]  ;;  %v2491_v3 = vld [vmem:[%s3388_s3 + $0x30] sm:$0xff]  ;;  %v2497_v4 = vld [vmem:[%s3388_s3 + $0x60] sm:$0xff]  ;;  %862 = vst [vmem:[#allocation2 + $0x9] sm:$0x1] %v2575_v27 }
  0x33   : > { %801 = vmatpush.bf16.msrb.mxu2 %v2224_v59  ;;  %v2500_v59 = vld [vmem:[%s3388_s3 + $0x78] sm:$0xff]  ;;  %v2506_v7 = vld [vmem:[%s3388_s3 + $0xa8] sm:$0xff]  ;;  %v2489_v12 = vld [vmem:[%s3388_s3 + $0x20] sm:$0xff]  ;;  %861 = vst [vmem:[#allocation2] sm:$0x1] %v2575_v27  ;;  %vm1329_vm2 = vcmask 1041408  }
  0x34   : > { %827 = vmatpush.bf16.msrb.mxu0 %v2228_v2  ;;  %648 = vmatpush.bf16.msra.mxu3 %v2096_v11  ;;  %v2507_v2 = vld [vmem:[%s3388_s3 + $0xb0] sm:$0xff]  ;;  %v2496_v9 = vld [vmem:[%s3388_s3 + $0x58] sm:$0xff]  ;;  %v2505_v11 = vld [vmem:[%s3388_s3 + $0xa0] sm:$0xff]  ;;  %vm1292_vm4 = vcmask 1040384   ;;  %vm1325_vm5 = vcmask 15360   ;;  %vm1557_vm7 = vcmask 7168  }
  0x35   : > { %v2495_v13 = vld [vmem:[%s3388_s3 + $0x50] sm:$0xff]  ;;  %v2504_v18 = vld [vmem:[%s3388_s3 + $0x98] sm:$0xff]  ;;  %v2493_v25 = vld [vmem:[%s3388_s3 + $0x40] sm:$0xff]  ;;  %s2592_s15 = smov 8   ;;  %vm1719_vm8 = vcmask 228352   ;;  %vm1721_vm9 = vcmask 226304  }
  0x36   : > { %846 = vmatpush.bf16.msrb.mxu1 %v2244_v16  ;;  %v2488_v19 = vld [vmem:[%s3388_s3 + $0x18] sm:$0xff]  ;;  %v2503_v23 = vld [vmem:[%s3388_s3 + $0x90] sm:$0xff]  ;;  %v2502_v29 = vld [vmem:[%s3388_s3 + $0x88] sm:$0xff]  ;;  %1720 = vst.msk [vmem:[#allocation3] sm:$0xff] %vm1719_vm8, %v2575_v27  ;;  %vm1707_vm10 = vcmask 31744   ;;  %vm1709_vm11 = vcmask 48128  }
  0x37   : > { %802 = vmatpush.bf16.msrb.mxu2 %v2216_v8  ;;  %v2490_v8 = vld [vmem:[%s3388_s3 + $0x28] sm:$0xff]  ;;  %v2487_v24 = vld [vmem:[%s3388_s3 + $0x10] sm:$0xff]  ;;  %v2485_v33 = vld [vmem:[%s3388_s3] sm:$0xff]  ;;  %1722 = vst.msk [vmem:[#allocation3 + $0x8] sm:$0x3f] %vm1721_vm9, %v2575_v27  ;;  %vm1711_vm12 = vcmask 64512  }
  0x38   : > { %828 = vmatpush.bf16.msrb.mxu0 %v2220_v15  ;;  %649 = vmatpush.bf16.msra.mxu3 %v2088_v22  ;;  %v2486_v30 = vld [vmem:[%s3388_s3 + $0x8] sm:$0xff]  ;;  %v2553_v47 = vld [vmem:[%s3389_s4] ss:$0 sm:$0xff]  ;;  %vm1713_vm13 = vcmask 80896   ;;  %vm1715_vm14 = vcmask 97280   ;;  %vm1717_vm15 = vcmask 113664  }
  0x3b   : > { %803 = vmatpush.bf16.msrb.mxu2 %v2208_v21  ;;  %650 = vmatmul.bf16.vlgmr.msra.gmra.mxu3 %v2898_v43  ;;  %v693_v43 = vshrl.u32 %v690_v39, 16  ;;  %v2494_v21 = vld [vmem:[%s3388_s3 + $0x48] sm:$0xff] }
  0x3c   : > { %829 = vmatpush.bf16.msrb.mxu0 %v2212_v26  ;;  %662 = vmatpush.bf16.msrb.mxu3 %v2152_v28 }
  0x3d   : > { %v698_v57 = vor.u32 %v697_v52, %v693_v43 }
  0x3f   : > { %804 = vmatpush.bf16.msrb.mxu2 %v2200_v32  ;;  %v2501_v32 = vld [vmem:[%s3388_s3 + $0x80] sm:$0xff] }
  0x40   : > { %830 = vmatpush.bf16.msrb.mxu0 %v2204_v37  ;;  %949 = vmatpush.bf16.msra.mxu3 %v2500_v59 }
  0x41   : > { %2245 = vmatmul.msk.bf16.vlgmr.msra.gmra.mxu1 %vm461_vm0, %v705_v35 }
  0x42   : > { %1090 = vmatpush.bf16.msra.mxu1 %v2492_v63  ;;  %v2554_v63 = vld [vmem:[%s3389_s4 + $0x1] ss:$0 sm:$0xff] }
  0x43   : > { %805 = vmatpush.bf16.msrb.mxu2 %v2192_v40 }
  0x44   : > { %831 = vmatpush.bf16.msrb.mxu0 %v2196_v45  ;;  %950 = vmatpush.bf16.msra.mxu3 %v2499_v61 }
  0x46   : > { %1091 = vmatpush.bf16.msra.mxu1 %v2491_v3 }
  0x47   : > { %806 = vmatpush.bf16.msrb.mxu2 %v2184_v48 }
  0x48   : > { %832 = vmatpush.bf16.msrb.mxu0 %v2188_v51  ;;  %951 = vmatpush.bf16.msra.mxu3 %v2498_v0 }
  0x4a   : > { %1092 = vmatpush.bf16.msra.mxu1 %v2490_v8 }
  0x4b   : > { %807 = vmatpush.bf16.msrb.mxu2 %v2176_v55  ;;  %2154 = vmatmul.msk.bf16.vlgmr.msrb.gmra.mxu3 %vm461_vm0, %v2881_v42  ;;  %v2508_v42 = vld [vmem:[%s3388_s3 + $0xb8] sm:$0xff] }
  0x4c   : > { %833 = vmatpush.bf16.msrb.mxu0 %v2180_v56  ;;  %952 = vmatpush.bf16.msra.mxu3 %v2497_v4 }
  0x4e   : > { %808 = vmatmul.bf16.vlgmr.msrb.gmra.mxu2 %v698_v57  ;;  %1093 = vmatpush.bf16.msra.mxu1 %v2489_v12 }
  0x4f   : > { %834 = vmatmul.bf16.vlgmr.msrb.gmra.mxu0 %v698_v57  ;;  %1029 = vmatpush.bf16.msra.mxu2 %v2508_v42 }
  0x50   : > { %953 = vmatpush.bf16.msra.mxu3 %v2496_v9 }
  0x51   : > { %2246 = vmatmul.msk.bf16.vlgmr.msrb.gmra.mxu1 %vm461_vm0, %v705_v35 }
  0x52   : > { %1094 = vmatpush.bf16.msra.mxu1 %v2488_v19 }
  0x53   : > { %1030 = vmatpush.bf16.msra.mxu2 %v2507_v2 }
  0x54   : > { %954 = vmatpush.bf16.msra.mxu3 %v2495_v13  ;;  %v1295_v13 = vld [vmem:[%s3390_s5 + $0x8] sm:$0xff] }
  0x55   : > { %1313 = vmatpush.msra.mxu0 %v1295_v13 }
  0x56   : > { %1095 = vmatpush.bf16.msra.mxu1 %v2487_v24 }
  0x57   : > { %1031 = vmatpush.bf16.msra.mxu2 %v2506_v7  ;;  %v2583_v7 = vmov 1983009808  }
  0x58   : > { %955 = vmatpush.bf16.msra.mxu3 %v2494_v21  ;;  %v1135_v8 = vunpack.c.l.s4 %v2583_v7 }
  0x5a   : > { %1096 = vmatpush.bf16.msra.mxu1 %v2486_v30 }
  0x5b   : > { %1032 = vmatpush.bf16.msra.mxu2 %v2505_v11 }
  0x5c   : > { %956 = vmatpush.bf16.msra.mxu3 %v2493_v25 }
  0x5e   : > { %1097 = vmatpush.bf16.msra.mxu1 %v2485_v33 }
  0x5f   : > { %1033 = vmatpush.bf16.msra.mxu2 %v2504_v18 }
  0x63   : > { %1034 = vmatpush.bf16.msra.mxu2 %v2503_v23 }
  0x67   : > { %1035 = vmatpush.bf16.msra.mxu2 %v2502_v29 }
  0x6b   : > { %1036 = vmatpush.bf16.msra.mxu2 %v2501_v32 }
  0x9a   : > { %v3022_v58 = vpop.f32.mrf.mxu1 }
  0x9e   : > { %v513_v60 = vpop.f32.mrf.mxu3 }
  0xa2   : > { %v489_v62 = vpop.f32.mrf.mxu1 }
  0xa6   : > { %v515_v1 = vpop.f32.mrf.mxu3 }
  0xac   : > { %v474_v6 = vpop.f32.mrf.mxu0 }
  0xad   : > { %v488_v37 = vadd.f32 %v3022_v58, %v474_v6 }
  0xae   : > { %v625_v5 = vpop.f32.mrf.mxu1  ;;  %v638_v10 = vpop.f32.mrf.mxu3 }
  0xaf   : > { %v626_v39 = vadd.f32 %v625_v5, %v488_v37 }
  0xb1   : > { %v500_v14 = vpop.f32.mrf.mxu2  ;;  %v639_v36 = vadd.f32 %v638_v10, %v626_v39 }
  0xb2   : > { %v514_v16 = vadd.f32 %v513_v60, %v500_v14  ;;  %v1294_v14 = vld [vmem:[%s3390_s5] sm:$0xff] }
  0xb3   : > { %1314 = vmatpush.msra.mxu0 %v1294_v14 }
  0xb4   : > { %v476_v17 = vpop.f32.mrf.mxu0 }
  0xb6   : > { %v627_v15 = vpop.f32.mrf.mxu1  ;;  %v640_v22 = vpop.f32.mrf.mxu3 }
  0xb7   : > { %v3129_v15 = vunpack.c.0.s8 %v1135_v8 }
  0xb9   : > { %v502_v26 = vpop.f32.mrf.mxu2 }
  0xbe   : > { %v822_v28 = vpop.f32.mrf.mxu1  ;;  %v651_v31 = vpop.f32.mrf.mxu3 }
  0xbf   : > { %v652_v34 = vadd.f32 %v651_v31, %v514_v16  ;;  %v2584_v31 = vmov 1934713408  }
  0xc0   : > { %v1183_v32 = vunpack.c.l.s4 %v2584_v31 }
  0xc6   : > { %v824_v35 = vpop.f32.mrf.mxu1  ;;  %v653_v38 = vpop.f32.mrf.mxu3 }
  0xcc   : > { %v835_v20 = vpop.f32.mrf.mxu0 }
  0xce   : > { %v848_v40 = vpop.f32.mrf.mxu1  ;;  %v664_v45 = vpop.f32.mrf.mxu3 }
  0xcf   : > { %v849_v41 = vadd.f32 %v848_v40, %v835_v20  ;;  %v665_v48 = vadd.f32 %v664_v45, %v652_v34 }
  0xd1   : > { %v809_v44 = vpop.f32.mrf.mxu2  ;;  %v3102_v50 = vadd.f32 %v849_v41, %v665_v48 }
  0xd2   : > { %v823_v46 = vadd.f32 %v822_v28, %v809_v44 }
  0xd4   : > { %v852_v49 = vadd.f32 %v823_v46, %v639_v36  ;;  %v837_v51 = vpop.f32.mrf.mxu0  ;;  %v3145_v36 = vunpack.c.0.s8 %v1183_v32 }
  0xd6   : > { %v856_v43 = vadd.f32 %v2553_v47, %v852_v49  ;;  %v850_v52 = vpop.f32.mrf.mxu1  ;;  %v666_v56 = vpop.f32.mrf.mxu3 }
  0xd8   : > { %v857_v53 = vmax.f32 %v856_v43, 0.0 }
  0xd9   : > { %v811_v54 = vpop.f32.mrf.mxu2 }
  0xda   : > { %863 = vst [vmem:[#allocation2 + $0x1] sm:$0xff] %v857_v53  ;;  %v883_v55 = vpack.c.bf16 %v857_v53, %v857_v53 }
  0xdc   : > { %957 = vmatmul.bf16.vlgmr.msra.gmra.mxu3 %v883_v55 }
  0xe1   : > { %v962_v57 = vld [vmem:[#allocation2 + $0x2] sm:$0xff] }
  0xe2   : > { %v864_v58 = vld [vmem:[#allocation2] sm:$0xff]  ;;  %v963_v59 = vpack.c.bf16 %v962_v57, %v962_v57 }
  0xe3   : > { %v865_v60 = vpack.c.bf16 %v864_v58, %v864_v58 }
  0xe4   : > { %1037 = vmatmul.bf16.vlgmr.msra.gmra.mxu2 %v963_v59 }
  0xe5   : > { %1098 = vmatmul.bf16.vlgmr.msra.gmra.mxu1 %v865_v60 }
 0x15f   : > { %v958_v61 = vpop.f32.mrf.mxu3 }
 0x162   : > { %v1099_v62 = vpop.f32.mrf.mxu1 }
 0x163   : > { %v1100_v42 = vadd.f32 %v1099_v62, %v958_v61 }
 0x167   : > { %v1038_v0 = vpop.f32.mrf.mxu2  ;;  %v960_v1 = vpop.f32.mrf.mxu3 }
 0x168   : > { %v1103_v2 = vadd.f32 %v1100_v42, %v1038_v0 }
 0x16a   : > { %v1101_v3 = vpop.f32.mrf.mxu1  ;;  %v3107_v4 = vadd.f32 %v2554_v63, %v1103_v2 }
 0x16c   : > { %1120 = vrot.lane.b32.xlu2 %v3107_v4, %s2576_s16  ;;  %1108 = vrot.lane.b32.xlu1 %v3107_v4, %s2577_s12  ;;  %v1132_v17 = vrot.slane %v3107_v4, 4 }
 0x16d   : > { %1114 = vrot.lane.b32.xlu0 %v3107_v4, %s2578_s30 }
 0x16f   : > { %v1040_v5 = vpop.f32.mrf.mxu2 }
 0x174   : > { %1123 = vrot.lane.b32.xlu2 %v3107_v4, %s2579_s17  ;;  %1111 = vrot.lane.b32.xlu1 %v3107_v4, %s2580_s18 }
 0x175   : > { %1126 = vrot.lane.b32.xlu0 %v3107_v4, %s2581_s20 }
 0x17d   : > { %1117 = vrot.lane.b32.xlu0 %v3107_v4, %s2582_s21 }
 0x1c6   : > { %v1121_v11 = vpop.permute.xlu2 %1120 }
 0x1c7   : > { %v1168_v30 = vrot.slane %v1121_v11, 4 }
 0x1ce   : > { %v1124_v35 = vpop.permute.xlu2 %1123 }
 0x1cf   : > { %v1154_v45 = vrot.slane %v1124_v35, 4 }
 0x1de   : > { %v1109_v6 = vpop.permute.xlu1 %1108 }
 0x1df   : > { %v1115_v9 = vpop.permute.xlu0 %1114  ;;  %v1144_v12 = vrot.slane %v1109_v6, 4 }
 0x1e0   : > { %v1142_v10 = vrot.slane %v1115_v9, 4 }
 0x1e1   : > { %v1145_v18 = vsel %vm1130_vm1, %v1115_v9, %v1144_v12  ;;  %v2585_v12 = vmov 64.0  }
 0x1e2   : > { %v1143_v16 = vsel %vm1130_vm1, %v1142_v10, %v1109_v6  ;;  %v1153_v26 = vperm.slane %v1145_v18, %v3129_v15  ;;  %2555 = vrcp.f32 %v2585_v12 }
 0x1e3   : > { %v1149_v21 = vperm.slane %v1143_v16, %v3129_v15 }
 0x1e4   : > { %v1190_v39 = vrot.slane %v1153_v26, 4 }
 0x1e5   : > { %v1178_v37 = vrot.slane %v1149_v21, 4 }
 0x1e6   : > { %v1112_v19 = vpop.permute.xlu1 %1111 }
 0x1e7   : > { %v1129_v22 = vrot.slane %v1112_v19, 4  ;;  %v1133_v23 = vsel %vm1130_vm1, %v1112_v19, %v1132_v17  ;;  %v1127_v24 = vpop.permute.xlu0 %1126 }
 0x1e8   : > { %v1166_v25 = vrot.slane %v1127_v24, 4  ;;  %v1141_v29 = vperm.slane %v1133_v23, %v3129_v15  ;;  %v1169_v20 = vsel %vm1130_vm1, %v1127_v24, %v1168_v30 }
 0x1e9   : > { %v1131_v28 = vsel %vm1130_vm1, %v1129_v22, %v3107_v4  ;;  %v1177_v48 = vperm.slane %v1169_v20, %v3129_v15 }
 0x1ea   : > { %v1137_v33 = vperm.slane %v1131_v28, %v3129_v15  ;;  %v1167_v34 = vsel %vm1130_vm1, %v1166_v25, %v1121_v11  ;;  %v1192_v41 = vrot.slane %v1141_v29, 4  ;;  %v1191_v47 = vsel %vm1130_vm1, %v1190_v39, %v1141_v29 }
 0x1eb   : > { %v1173_v44 = vperm.slane %v1167_v34, %v3129_v15  ;;  %v1197_v57 = vperm.slane %v1191_v47, %v3145_v36  ;;  %v1214_v59 = vrot.slane %v1177_v48, 4 }
 0x1ec   : > { %v1180_v38 = vrot.slane %v1137_v33, 4  ;;  %v1179_v40 = vsel %vm1130_vm1, %v1178_v37, %v1137_v33  ;;  %v1193_v54 = vsel %vm1130_vm1, %v1153_v26, %v1192_v41 }
 0x1ed   : > { %v1185_v51 = vperm.slane %v1179_v40, %v3145_v36  ;;  %v1202_v55 = vrot.slane %v1173_v44, 4  ;;  %v1201_v42 = vperm.slane %v1193_v54, %v3145_v36  ;;  %v1236_v10 = vrot.slane %v1197_v57, 4  ;;  %v1324_v40 = vld [vmem:[%s3391_s6] sm:$0x3] }
 0x1ee   : > { %v1181_v46 = vsel %vm1130_vm1, %v1149_v21, %v1180_v38  ;;  %2376 = vmatpush.msk.msrb.mxu3 %vm1329_vm2, %v1324_v40 }
 0x1ef   : > { %v1118_v49 = vpop.permute.xlu0 %1117  ;;  %v1189_v53 = vperm.slane %v1181_v46, %v3145_v36  ;;  %v1228_v63 = vrot.slane %v1185_v51, 4  ;;  %v1240_v18 = vrot.slane %v1201_v42, 4 }
 0x1f0   : > { %v1155_v43 = vsel %vm1130_vm1, %v1154_v45, %v1118_v49  ;;  %v1156_v52 = vrot.slane %v1118_v49, 4 }
 0x1f1   : > { %v1161_v56 = vperm.slane %v1155_v43, %v3129_v15  ;;  %v1232_v1 = vrot.slane %v1189_v53, 4 }
 0x1f2   : > { %v1157_v58 = vsel %vm1130_vm1, %v1124_v35, %v1156_v52  ;;  %v2556_v35 = vpop.eup %2555 }
 0x1f3   : > { %v1165_v60 = vperm.slane %v1157_v58, %v3129_v15  ;;  %v1203_v61 = vsel %vm1130_vm1, %v1202_v55, %v1161_v56  ;;  %v1204_v62 = vrot.slane %v1161_v56, 4  ;;  %v1264_v54 = vmul.f32 64.0, %v2556_v35 }
 0x1f4   : > { %v1209_v0 = vperm.slane %v1203_v61, %v3145_v36  ;;  %vm1268_vm3 = vweird.f32 %v2556_v35 }
 0x1f5   : > { %v1205_v2 = vsel %vm1130_vm1, %v1173_v44, %v1204_v62  ;;  %v1215_v3 = vsel %vm1130_vm1, %v1214_v59, %v1165_v60  ;;  %v1216_v5 = vrot.slane %v1165_v60, 4  ;;  %v1265_v62 = vsub.f32 1.0, %v1264_v54 }
 0x1f6   : > { %v1213_v6 = vperm.slane %v1205_v2, %v3145_v36  ;;  %v1221_v7 = vperm.slane %v1215_v3, %v3145_v36  ;;  %v1226_v8 = vrot.slane %v1209_v0, 4  ;;  %v1229_v9 = vsel %vm1130_vm1, %v1209_v0, %v1228_v63 }
 0x1f7   : > { %v1217_v11 = vsel %vm1130_vm1, %v1177_v48, %v1216_v5  ;;  %v1243_v22 = vsel %vm461_vm0, %v1229_v9, 0.0  ;;  %v1272_v44 = vsel %vm461_vm0, %v1229_v9, -inf  ;;  %v1266_v2 = vmul.f32 %v2556_v35, %v1265_v62 }
 0x1f8   : > { %v1225_v13 = vperm.slane %v1217_v11, %v3145_v36  ;;  %v1227_v14 = vsel %vm1130_vm1, %v1226_v8, %v1185_v51  ;;  %v1230_v16 = vrot.slane %v1213_v6, 4  ;;  %v1233_v17 = vsel %vm1130_vm1, %v1213_v6, %v1232_v1 }
 0x1f9   : > { %v1234_v19 = vrot.slane %v1221_v7, 4  ;;  %v1242_v21 = vsel %vm461_vm0, %v1227_v14, 0.0  ;;  %v1237_v24 = vsel %vm1130_vm1, %v1221_v7, %v1236_v10  ;;  %v1247_v30 = vsel %vm461_vm0, %v1233_v17, 0.0 }
 0x1fa   : > { %v1231_v23 = vsel %vm1130_vm1, %v1230_v16, %v1189_v53  ;;  %v1238_v25 = vrot.slane %v1225_v13, 4  ;;  %v1244_v26 = vadd.f32 %v1243_v22, %v1242_v21  ;;  %v1241_v32 = vsel %vm1130_vm1, %v1225_v13, %v1240_v18 }
 0x1fb   : > { %v1235_v28 = vsel %vm1130_vm1, %v1234_v19, %v1197_v57  ;;  %v1245_v29 = vsel %vm461_vm0, %v1231_v23, 0.0  ;;  %v1271_v34 = vsel %vm461_vm0, %v1227_v14, -inf  ;;  %v1273_v37 = vsel %vm461_vm0, %v1231_v23, -inf }
 0x1fc   : > { %v1239_v31 = vsel %vm1130_vm1, %v1238_v25, %v1201_v42  ;;  %v1246_v33 = vadd.f32 %v1245_v29, %v1244_v26  ;;  %v1275_v38 = vsel %vm461_vm0, %v1235_v28, -inf  ;;  %v1277_v20 = vsel %vm461_vm0, %v1237_v24, -inf }
 0x1fd   : > { %v1279_v39 = vsel %vm461_vm0, %v1239_v31, -inf  ;;  %v1276_v45 = vmax.f32 %v1271_v34, %v1275_v38  ;;  %v1249_v47 = vsel %vm461_vm0, %v1235_v28, 0.0  ;;  %v1274_v48 = vsel %vm461_vm0, %v1233_v17, -inf }
 0x1fe   : > { %v1248_v41 = vadd.f32 %v1247_v30, %v1246_v33  ;;  %v1280_v46 = vmax.f32 %v1273_v37, %v1279_v39  ;;  %v1281_v49 = vsel %vm461_vm0, %v1241_v32, -inf  ;;  %v1278_v43 = vmax.f32 %v1272_v44, %v1277_v20 }
 0x1ff   : > { %v1282_v52 = vmax.f32 %v1274_v48, %v1281_v49  ;;  %v1251_v53 = vsel %vm461_vm0, %v1237_v24, 0.0  ;;  %v1253_v58 = vsel %vm461_vm0, %v1239_v31, 0.0  ;;  %v1255_v61 = vsel %vm461_vm0, %v1241_v32, 0.0 }
 0x200   : > { %v1250_v51 = vadd.f32 %v1249_v47, %v1248_v41  ;;  %v1283_v56 = vmax.f32 %v1276_v45, %v1278_v43  ;;  %v1267_v8 = vadd.f32 %v2556_v35, %v1266_v2 }
 0x201   : > { %v1284_v57 = vmax.f32 %v1280_v46, %v1282_v52 }
 0x202   : > { %v1252_v55 = vadd.f32 %v1251_v53, %v1250_v51  ;;  %v1269_v12 = vsel %vm1268_vm3, %v2556_v35, %v1267_v8  ;;  %vm1761_vm3 = vcmask 457728  }
 0x203   : > { %v1285_v60 = vmax.f32 %v1283_v56, %v1284_v57 }
 0x204   : > { %v1254_v59 = vadd.f32 %v1253_v58, %v1252_v55 }
 0x205   : > { %v1286_v63 = vrot.slane %v1285_v60, 4 }
 0x206   : > { %v1256_v42 = vadd.f32 %v1255_v61, %v1254_v59 }
 0x207   : > { %v1287_v1 = vmax.f32 %v1285_v60, %v1286_v63 }
 0x208   : > { %v1257_v0 = vrot.slane %v1256_v42, 4 }
 0x209   : > { %v1288_v5 = vrot.slane %v1287_v1, 2 }
 0x20a   : > { %v1258_v3 = vadd.f32 %v1257_v0, %v1256_v42 }
 0x20b   : > { %v1289_v7 = vmax.f32 %v1287_v1, %v1288_v5 }
 0x20c   : > { %v1259_v6 = vrot.slane %v1258_v3, 2 }
 0x20d   : > { %v1290_v11 = vrot.slane %v1289_v7, 1 }
 0x20e   : > { %v1260_v9 = vadd.f32 %v1259_v6, %v1258_v3 }
 0x20f   : > { %v1291_v16 = vmax.f32 %v1289_v7, %v1290_v11 }
 0x210   : > { %v1261_v10 = vrot.slane %v1260_v9, 1 }
 0x212   : > { %v1262_v13 = vadd.f32 %v1261_v10, %v1260_v9 }
 0x214   : > { %v1270_v14 = vmul.f32 %v1269_v12, %v1262_v13 }
 0x216   : > { %v1293_v17 = vsel %vm1292_vm4, %v1270_v14, %v1291_v16  ;;  %vm1763_vm4 = vcmask 687104  }
 0x217   : > { %2375 = vmatmul.msk.f32.vlgmr.msra.gmra.mxu0 %vm461_vm0, %v1293_v17 }
 0x294   : > { %v1316_v18 = vpop.f32.mrf.mxu0 }
 0x295   : > { %v1319_v19 = vmax.f32 %v1316_v18, 0.0 }
 0x297   : > { %v1321_v21 = vrot.slane %v1319_v19, 1 }
 0x299   : > { %v1323_v22 = vadd.f32 %v1321_v21, %v1319_v19 }
 0x29b   : > { %2377 = vmatmul.msk.f32.vlgmr.msrb.gmra.mxu3 %vm1325_vm5, %v1323_v22 }
 0x31e   : > { %v1350_v23 = vpop.f32.mrf.mxu3 }
 0x31f   : > { %v1353_v24 = vsub.f32 0.0, %v1350_v23 }
 0x321   : > { %v1354_v25 = vmul.f32 1.442695, %v1353_v24 }
 0x323   : > { %2557 = vpow2.f32 %v1354_v25 }
 0x329   : > { %v2558_v26 = vpop.eup %2557 }
 0x32a   : > { %v1356_v28 = vadd.f32 1.0, %v2558_v26 }
 0x32c   : > { %2559 = vrcp.f32 %v1356_v28 }
 0x332   : > { %v2560_v29 = vpop.eup %2559 }
 0x333   : > { %v1358_v30 = vperm.slane %v2560_v29, 0 }
 0x335   : > { %v3198_v31 = vmul.f32 %v1358_v30, %v3107_v4 }
 0x337   : > { %1367 = vrot.lane.b32.xlu0 %v3198_v31, %s2578_s30  ;;  %1370 = vrot.lane.b32.xlu2 %v3198_v31, %s2582_s21  ;;  %v1384_v34 = vrot.slane %v3198_v31, 4  ;;  %s2594_s30 = smov 40  }
 0x338   : > { %1364 = vrot.lane.b32.xlu1 %v3198_v31, %s2580_s18  ;;  %s2596_s18 = smov 56  }
 0x33f   : > { %1373 = vrot.lane.b32.xlu0 %v3198_v31, %s2576_s16  ;;  %1361 = vrot.lane.b32.xlu2 %v3198_v31, %s2577_s12  ;;  %s2593_s16 = smov 14  }
 0x340   : > { %1376 = vrot.lane.b32.xlu1 %v3198_v31, %s2579_s17  ;;  %s2595_s17 = smov 84  }
 0x348   : > { %1379 = vrot.lane.b32.xlu1 %v3198_v31, %s2581_s20  ;;  %s2597_s20 = smov 28  }
 0x391   : > { %v1371_v4 = vpop.permute.xlu2 %1370 }
 0x392   : > { %v1408_v45 = vrot.slane %v1371_v4, 4 }
 0x399   : > { %v1362_v37 = vpop.permute.xlu2 %1361 }
 0x39a   : > { %v1396_v40 = vrot.slane %v1362_v37, 4 }
 0x3a9   : > { %v1368_v33 = vpop.permute.xlu0 %1367 }
 0x3aa   : > { %v1365_v32 = vpop.permute.xlu1 %1364  ;;  %v1394_v38 = vrot.slane %v1368_v33, 4  ;;  %v1397_v46 = vsel %vm1130_vm1, %v1368_v33, %v1396_v40 }
 0x3ab   : > { %v1385_v35 = vsel %vm1130_vm1, %v1365_v32, %v1384_v34  ;;  %v1382_v20 = vrot.slane %v1365_v32, 4  ;;  %v1405_v52 = vperm.slane %v1397_v46, %v3129_v15 }
 0x3ac   : > { %v1393_v39 = vperm.slane %v1385_v35, %v3129_v15  ;;  %v1395_v41 = vsel %vm1130_vm1, %v1394_v38, %v1362_v37 }
 0x3ad   : > { %v1383_v47 = vsel %vm1130_vm1, %v1382_v20, %v3198_v31  ;;  %v1401_v51 = vperm.slane %v1395_v41, %v3129_v15  ;;  %v1442_v32 = vrot.slane %v1405_v52, 4 }
 0x3ae   : > { %v1444_v49 = vrot.slane %v1393_v39, 4  ;;  %v1389_v53 = vperm.slane %v1383_v47, %v3129_v15 }
 0x3af   : > { %v1430_v58 = vrot.slane %v1401_v51, 4  ;;  %v1443_v20 = vsel %vm1130_vm1, %v1442_v32, %v1393_v39 }
 0x3b0   : > { %v1445_v57 = vsel %vm1130_vm1, %v1405_v52, %v1444_v49  ;;  %v1432_v60 = vrot.slane %v1389_v53, 4 }
 0x3b1   : > { %v1374_v54 = vpop.permute.xlu0 %1373  ;;  %v1453_v0 = vperm.slane %v1445_v57, %v3145_v36  ;;  %v1431_v5 = vsel %vm1130_vm1, %v1430_v58, %v1389_v53 }
 0x3b2   : > { %v1377_v44 = vpop.permute.xlu1 %1376  ;;  %v1420_v59 = vrot.slane %v1374_v54, 4  ;;  %v1433_v9 = vsel %vm1130_vm1, %v1401_v51, %v1432_v60  ;;  %v1437_v18 = vperm.slane %v1431_v5, %v3145_v36 }
 0x3b3   : > { %v1406_v48 = vrot.slane %v1377_v44, 4  ;;  %v1409_v43 = vsel %vm1130_vm1, %v1377_v44, %v1408_v45  ;;  %v1492_v11 = vrot.slane %v1453_v0, 4  ;;  %v1441_v19 = vperm.slane %v1433_v9, %v3145_v36 }
 0x3b4   : > { %v1417_v56 = vperm.slane %v1409_v43, %v3129_v15  ;;  %v1480_v30 = vrot.slane %v1437_v18, 4  ;;  %v1449_v45 = vperm.slane %v1443_v20, %v3145_v36 }
 0x3b5   : > { %v1407_v55 = vsel %vm1130_vm1, %v1406_v48, %v1371_v4  ;;  %v1484_v4 = vrot.slane %v1441_v19, 4 }
 0x3b6   : > { %v1413_v61 = vperm.slane %v1407_v55, %v3129_v15  ;;  %v1468_v1 = vrot.slane %v1417_v56, 4  ;;  %v1488_v43 = vrot.slane %v1449_v45, 4 }
 0x3b8   : > { %v1456_v6 = vrot.slane %v1413_v61, 4 }
 0x3ba   : > { %v1380_v62 = vpop.permute.xlu1 %1379 }
 0x3bb   : > { %v1418_v42 = vrot.slane %v1380_v62, 4  ;;  %v1421_v63 = vsel %vm1130_vm1, %v1380_v62, %v1420_v59 }
 0x3bc   : > { %v1429_v2 = vperm.slane %v1421_v63, %v3129_v15 }
 0x3bd   : > { %v1419_v3 = vsel %vm1130_vm1, %v1418_v42, %v1374_v54 }
 0x3be   : > { %v1425_v7 = vperm.slane %v1419_v3, %v3129_v15  ;;  %v1469_v8 = vsel %vm1130_vm1, %v1429_v2, %v1468_v1  ;;  %v1466_v13 = vrot.slane %v1429_v2, 4 }
 0x3bf   : > { %v1477_v10 = vperm.slane %v1469_v8, %v3145_v36 }
 0x3c0   : > { %v1454_v12 = vrot.slane %v1425_v7, 4  ;;  %v1457_v14 = vsel %vm1130_vm1, %v1425_v7, %v1456_v6  ;;  %v1467_v29 = vsel %vm1130_vm1, %v1466_v13, %v1417_v56 }
 0x3c1   : > { %v1493_v16 = vsel %vm1130_vm1, %v1477_v10, %v1492_v11  ;;  %v1490_v17 = vrot.slane %v1477_v10, 4  ;;  %v1465_v26 = vperm.slane %v1457_v14, %v3145_v36  ;;  %v1473_v35 = vperm.slane %v1467_v29, %v3145_v36 }
 0x3c2   : > { %v1554_v21 = vsel %vm461_vm0, %v1493_v16, -inf  ;;  %v1515_v22 = vsel %vm461_vm0, %v1493_v16, 0.0  ;;  %v1455_v23 = vsel %vm1130_vm1, %v1454_v12, %v1413_v61  ;;  %v2586_v61 = vmov 16.0  }
 0x3c3   : > { %1555 = vmax.xlane.f32.xlu1 %v1554_v21  ;;  %1516 = vadd.xlane.f32.xlu2 %v1515_v22  ;;  %v1491_v24 = vsel %vm1130_vm1, %v1490_v17, %v1453_v0  ;;  %v1461_v25 = vperm.slane %v1455_v23, %v3145_v36  ;;  %v1485_v34 = vsel %vm1130_vm1, %v1465_v26, %v1484_v4  ;;  %v1482_v40 = vrot.slane %v1465_v26, 4 }
 0x3c4   : > { %v1512_v28 = vsel %vm461_vm0, %v1491_v24, 0.0  ;;  %v1503_v38 = vsel %vm461_vm0, %v1485_v34, 0.0  ;;  %v1486_v41 = vrot.slane %v1473_v35, 4  ;;  %v1542_v44 = vsel %vm461_vm0, %v1485_v34, -inf }
 0x3c5   : > { %1513 = vadd.xlane.f32.xlu0 %v1512_v28  ;;  %v1481_v33 = vsel %vm1130_vm1, %v1461_v25, %v1480_v30  ;;  %v1483_v46 = vsel %vm1130_vm1, %v1482_v40, %v1441_v19  ;;  %v1478_v39 = vrot.slane %v1461_v25, 4  ;;  %v1551_v51 = vsel %vm461_vm0, %v1491_v24, -inf }
 0x3c6   : > { %v1497_v37 = vsel %vm461_vm0, %v1481_v33, 0.0  ;;  %v1487_v47 = vsel %vm1130_vm1, %v1486_v41, %v1449_v45  ;;  %v1500_v48 = vsel %vm461_vm0, %v1483_v46, 0.0  ;;  %v1489_v52 = vsel %vm1130_vm1, %v1473_v35, %v1488_v43 }
 0x3c7   : > { %v1506_v49 = vsel %vm461_vm0, %v1487_v47, 0.0  ;;  %v1479_v53 = vsel %vm1130_vm1, %v1478_v39, %v1437_v18  ;;  %v1509_v54 = vsel %vm461_vm0, %v1489_v52, 0.0  ;;  %v1539_v56 = vsel %vm461_vm0, %v1483_v46, -inf }
 0x3c8   : > { %v1494_v55 = vsel %vm461_vm0, %v1479_v53, 0.0  ;;  %v1536_v57 = vsel %vm461_vm0, %v1481_v33, -inf  ;;  %v1533_v58 = vsel %vm461_vm0, %v1479_v53, -inf  ;;  %v1548_v59 = vsel %vm461_vm0, %v1489_v52, -inf }
 0x3c9   : > { %v1545_v60 = vsel %vm461_vm0, %v1487_v47, -inf  ;;  %2561 = vrcp.f32 %v2586_v61  ;;  %vm1727_vm0 = vcmask 179248  }
 0x3cb   : > { %1498 = vadd.xlane.f32.xlu1 %v1497_v37  ;;  %1504 = vadd.xlane.f32.xlu2 %v1503_v38 }
 0x3cd   : > { %1543 = vmax.xlane.f32.xlu0 %v1542_v44 }
 0x3cf   : > { %v2562_v0 = vpop.eup %2561 }
 0x3d0   : > { %v1519_v1 = vmul.f32 16.0, %v2562_v0  ;;  %vm1523_vm6 = vweird.f32 %v2562_v0 }
 0x3d2   : > { %v1520_v6 = vsub.f32 1.0, %v1519_v1 }
 0x3d3   : > { %1501 = vadd.xlane.f32.xlu2 %v1500_v48  ;;  %1507 = vadd.xlane.f32.xlu1 %v1506_v49 }
 0x3d4   : > { %v1521_v7 = vmul.f32 %v2562_v0, %v1520_v6 }
 0x3d5   : > { %1552 = vmax.xlane.f32.xlu0 %v1551_v51 }
 0x3d6   : > { %v1522_v11 = vadd.f32 %v2562_v0, %v1521_v7 }
 0x3d8   : > { %v1524_v12 = vsel %vm1523_vm6, %v2562_v0, %v1522_v11 }
 0x3db   : > { %1510 = vadd.xlane.f32.xlu2 %v1509_v54  ;;  %1495 = vadd.xlane.f32.xlu1 %v1494_v55 }
 0x3dd   : > { %1540 = vmax.xlane.f32.xlu0 %v1539_v56 }
 0x3e3   : > { %1537 = vmax.xlane.f32.xlu2 %v1536_v57  ;;  %1534 = vmax.xlane.f32.xlu1 %v1533_v58 }
 0x3e5   : > { %1549 = vmax.xlane.f32.xlu0 %v1548_v59 }
 0x3eb   : > { %1546 = vmax.xlane.f32.xlu2 %v1545_v60 }
 0x436   : > { %v1556_v62 = vpop.xlane.xlu1 %1555  ;;  %v1517_v42 = vpop.xlane.xlu2 %1516 }
 0x437   : > { %v1532_v18 = vmul.f32 %v1524_v12, %v1517_v42 }
 0x438   : > { %v1514_v63 = vpop.xlane.xlu0 %1513 }
 0x439   : > { %v1565_v23 = vsel %vm1557_vm7, %v1532_v18, %v1556_v62  ;;  %v1531_v40 = vmul.f32 %v1524_v12, %v1514_v63 }
 0x43a   : > { %v1602_v34 = vrot.slane %v1565_v23, 4 }
 0x43e   : > { %v1499_v2 = vpop.xlane.xlu1 %1498  ;;  %v1505_v3 = vpop.xlane.xlu2 %1504 }
 0x43f   : > { %v1528_v16 = vmul.f32 %v1524_v12, %v1505_v3  ;;  %v1526_v24 = vmul.f32 %v1524_v12, %v1499_v2 }
 0x440   : > { %v1544_v5 = vpop.xlane.xlu0 %1543 }
 0x441   : > { %v1561_v21 = vsel %vm1557_vm7, %v1528_v16, %v1544_v5 }
 0x442   : > { %v1578_v26 = vrot.slane %v1561_v21, 4 }
 0x446   : > { %v1502_v8 = vpop.xlane.xlu2 %1501  ;;  %v1508_v9 = vpop.xlane.xlu1 %1507 }
 0x447   : > { %v1527_v19 = vmul.f32 %v1524_v12, %v1502_v8  ;;  %v1529_v52 = vmul.f32 %v1524_v12, %v1508_v9 }
 0x448   : > { %v1553_v10 = vpop.xlane.xlu0 %1552 }
 0x449   : > { %v1564_v49 = vsel %vm1557_vm7, %v1531_v40, %v1553_v10 }
 0x44a   : > { %v1590_v56 = vrot.slane %v1564_v49, 4 }
 0x44e   : > { %v1511_v13 = vpop.xlane.xlu2 %1510  ;;  %v1496_v14 = vpop.xlane.xlu1 %1495 }
 0x44f   : > { %v1525_v25 = vmul.f32 %v1524_v12, %v1496_v14  ;;  %v1530_v4 = vmul.f32 %v1524_v12, %v1511_v13 }
 0x450   : > { %v1541_v17 = vpop.xlane.xlu0 %1540 }
 0x451   : > { %v1560_v22 = vsel %vm1557_vm7, %v1527_v19, %v1541_v17 }
 0x452   : > { %v1566_v28 = vrot.slane %v1560_v22, 4 }
 0x456   : > { %v1538_v29 = vpop.xlane.xlu2 %1537  ;;  %v1535_v30 = vpop.xlane.xlu1 %1534 }
 0x457   : > { %v1559_v32 = vsel %vm1557_vm7, %v1526_v24, %v1538_v29  ;;  %v1558_v33 = vsel %vm1557_vm7, %v1525_v25, %v1535_v30 }
 0x458   : > { %v1579_v35 = vsel %vm1130_vm1, %v1578_v26, %v1559_v32  ;;  %v1580_v37 = vrot.slane %v1559_v32, 4  ;;  %v1567_v38 = vsel %vm1130_vm1, %v1566_v28, %v1558_v33  ;;  %v1550_v20 = vpop.xlane.xlu0 %1549  ;;  %v1568_v43 = vrot.slane %v1558_v33, 4 }
 0x459   : > { %v1585_v41 = vperm.slane %v1579_v35, %v3129_v15  ;;  %v1573_v44 = vperm.slane %v1567_v38, %v3129_v15  ;;  %v1563_v45 = vsel %vm1557_vm7, %v1530_v4, %v1550_v20 }
 0x45a   : > { %v1581_v46 = vsel %vm1130_vm1, %v1561_v21, %v1580_v37  ;;  %v1603_v47 = vsel %vm1130_vm1, %v1602_v34, %v1563_v45  ;;  %v1604_v48 = vrot.slane %v1563_v45, 4  ;;  %v1569_v61 = vsel %vm1130_vm1, %v1560_v22, %v1568_v43 }
 0x45b   : > { %v1614_v39 = vrot.slane %v1585_v41, 4  ;;  %v1616_v51 = vrot.slane %v1573_v44, 4  ;;  %v1589_v53 = vperm.slane %v1581_v46, %v3129_v15  ;;  %v1609_v54 = vperm.slane %v1603_v47, %v3129_v15 }
 0x45c   : > { %v1605_v57 = vsel %vm1130_vm1, %v1565_v23, %v1604_v48  ;;  %v1577_v7 = vperm.slane %v1569_v61, %v3129_v15 }
 0x45d   : > { %v1615_v55 = vsel %vm1130_vm1, %v1614_v39, %v1573_v44  ;;  %v1617_v60 = vsel %vm1130_vm1, %v1585_v41, %v1616_v51  ;;  %v1626_v0 = vrot.slane %v1589_v53, 4  ;;  %v1613_v1 = vperm.slane %v1605_v57, %v3129_v15 }
 0x45e   : > { %v1547_v58 = vpop.xlane.xlu2 %1546  ;;  %v1621_v63 = vperm.slane %v1615_v55, %v3145_v36  ;;  %v1638_v2 = vrot.slane %v1609_v54, 4  ;;  %v1625_v6 = vperm.slane %v1617_v60, %v3145_v36  ;;  %v1628_v23 = vrot.slane %v1577_v7, 4 }
 0x45f   : > { %v1562_v59 = vsel %vm1557_vm7, %v1529_v52, %v1547_v58  ;;  %v1650_v13 = vrot.slane %v1613_v1, 4  ;;  %v1627_v17 = vsel %vm1130_vm1, %v1626_v0, %v1577_v7  ;;  %v1796_v0 = vld [vmem:[%s3392_s7 + $0x60] sm:$0x3]  ;;  %v2520_v7 = vld [vmem:[%s3392_s7 + $0x58] sm:$0xff] }
 0x460   : > { %v1591_v62 = vsel %vm1130_vm1, %v1590_v56, %v1562_v59  ;;  %v1592_v42 = vrot.slane %v1562_v59, 4  ;;  %v1664_v12 = vrot.slane %v1621_v63, 4  ;;  %v1668_v22 = vrot.slane %v1625_v6, 4 }
 0x461   : > { %v1597_v3 = vperm.slane %v1591_v62, %v3129_v15  ;;  %v1633_v28 = vperm.slane %v1627_v17, %v3145_v36  ;;  %v1629_v33 = vsel %vm1130_vm1, %v1589_v53, %v1628_v23 }
 0x462   : > { %v1593_v5 = vsel %vm1130_vm1, %v1564_v49, %v1592_v42  ;;  %v1637_v38 = vperm.slane %v1629_v33, %v3145_v36 }
 0x463   : > { %v1601_v8 = vperm.slane %v1593_v5, %v3129_v15  ;;  %v1640_v9 = vrot.slane %v1597_v3, 4  ;;  %v1639_v10 = vsel %vm1130_vm1, %v1638_v2, %v1597_v3  ;;  %v1672_v34 = vrot.slane %v1633_v28, 4  ;;  %v2514_v3 = vld [vmem:[%s3392_s7 + $0x28] sm:$0xff] }
 0x464   : > { %v1645_v11 = vperm.slane %v1639_v10, %v3145_v36  ;;  %v1676_v44 = vrot.slane %v1637_v38, 4  ;;  %v1846_v2 = vunpack.c.l.b16 %v1796_v0  ;;  %v2512_v10 = vld [vmem:[%s3392_s7 + $0x18] sm:$0xff] }
 0x465   : > { %v1652_v14 = vrot.slane %v1601_v8, 4  ;;  %v1641_v16 = vsel %vm1130_vm1, %v1609_v54, %v1640_v9  ;;  %v1651_v15 = vsel %vm1130_vm1, %v1650_v13, %v1601_v8  ;;  %v2513_v8 = vld [vmem:[%s3392_s7 + $0x20] sm:$0xff]  ;;  %v2519_v9 = vld [vmem:[%s3392_s7 + $0x50] sm:$0xff] }
 0x466   : > { %v1662_v18 = vrot.slane %v1645_v11, 4  ;;  %v1665_v19 = vsel %vm1130_vm1, %v1645_v11, %v1664_v12  ;;  %v1649_v21 = vperm.slane %v1641_v16, %v3145_v36  ;;  %v1657_v32 = vperm.slane %v1651_v15, %v3145_v36  ;;  %v2518_v11 = vld [vmem:[%s3392_s7 + $0x48] sm:$0xff]  ;;  %v2517_v12 = vld [vmem:[%s3392_s7 + $0x40] sm:$0xff]  ;;  %v2511_v13 = vld [vmem:[%s3392_s7 + $0x10] sm:$0xff] }
 0x467   : > { %1679 = vrot.lane.b32.xlu2 %v1665_v19, %s2587_s9  ;;  %v1653_v24 = vsel %vm1130_vm1, %v1613_v1, %v1652_v14  ;;  %v2515_v1 = vld [vmem:[%s3392_s7 + $0x30] sm:$0xff]  ;;  %v1859_v5 = vpack.c.b16 %v1846_v2, %v1846_v2  ;;  %v2510_v14 = vld [vmem:[%s3392_s7 + $0x8] sm:$0xff]  ;;  %v2509_v16 = vld [vmem:[%s3392_s7] sm:$0xff] }
 0x468   : > { %v1669_v25 = vsel %vm1130_vm1, %v1649_v21, %v1668_v22  ;;  %v1666_v26 = vrot.slane %v1649_v21, 4  ;;  %v1661_v29 = vperm.slane %v1653_v24, %v3145_v36  ;;  %v1663_v30 = vsel %vm1130_vm1, %v1662_v18, %v1621_v63  ;;  %v2516_v63 = vld [vmem:[%s3392_s7 + $0x38] sm:$0xff] }
 0x469   : > { %1687 = vrot.lane.b32.xlu1 %v1669_v25, %s2588_s10  ;;  %v1673_v37 = vsel %vm1130_vm1, %v1657_v32, %v1672_v34  ;;  %v1670_v20 = vrot.slane %v1657_v32, 4  ;;  %1879 = vmatpush.bf16.msrb.mxu0 %v2516_v63 }
 0x46a   : > { %v1667_v4 = vsel %vm1130_vm1, %v1666_v26, %v1625_v6  ;;  %v1674_v35 = vrot.slane %v1661_v29, 4  ;;  %v1677_v45 = vsel %vm1130_vm1, %v1661_v29, %v1676_v44  ;;  %v1877_v6 = vsel %vm1329_vm2, %v1859_v5, 0 }
 0x46b   : > { %1683 = vrot.lane.b32.xlu0 %v1667_v4, %s2589_s11  ;;  %v1671_v41 = vsel %vm1130_vm1, %v1670_v20, %v1633_v28  ;;  %1895 = vmatpush.bf16.msrb.mxu2 %v1877_v6  ;;  %vm1872_vm2 = vcmask 556032  }
 0x46c   : > { %v1675_v40 = vsel %vm1130_vm1, %v1674_v35, %v1637_v38  ;;  %vm1768_vm1 = vcmask 326656  }
 0x46d   : > { %1880 = vmatpush.bf16.msrb.mxu0 %v2515_v1 }
 0x46f   : > { %1695 = vrot.lane.b32.xlu2 %v1673_v37, %s2590_s13  ;;  %1896 = vmatpush.bf16.msrb.mxu2 %v2520_v7  ;;  %s323_s13 = scalar_lea.vmem %s3393_s8, %s2430_s19 }
 0x471   : > { %1699 = vrot.lane.b32.xlu1 %v1675_v40, %s2591_s14  ;;  %1881 = vmatpush.bf16.msrb.mxu0 %v2514_v3 }
 0x473   : > { %1691 = vrot.lane.b32.xlu0 %v1671_v41, %s2592_s15  ;;  %1897 = vmatpush.bf16.msrb.mxu2 %v2519_v9 }
 0x475   : > { %1882 = vmatpush.bf16.msrb.mxu0 %v2513_v8 }
 0x477   : > { %1898 = vmatpush.bf16.msrb.mxu2 %v2518_v11 }
 0x479   : > { %1883 = vmatpush.bf16.msrb.mxu0 %v2512_v10 }
 0x47b   : > { %1703 = vrot.lane.b32.xlu0 %v1677_v45, %s2593_s16  ;;  %1899 = vmatpush.bf16.msrb.mxu2 %v2517_v12  ;;  %v2552_v45 = vld [vmem:[%s3389_s4 + $0x2] ss:$0 sm:$0xff] }
 0x47d   : > { %1884 = vmatpush.bf16.msrb.mxu0 %v2511_v13 }
 0x481   : > { %1885 = vmatpush.bf16.msrb.mxu0 %v2510_v14 }
 0x485   : > { %1886 = vmatpush.bf16.msrb.mxu0 %v2509_v16 }
 0x4c1   : > { %v1680_v46 = vpop.permute.xlu2 %1679 }
 0x4c2   : > { %v1706_v47 = vsel %vm1325_vm5, %v1663_v30, %v1680_v46  ;;  %vm1765_vm5 = vcmask 916480   ;;  %v860_v46 = vadd.f32 %v2552_v45, %v3102_v50 }
 0x4c9   : > { %v1696_v52 = vpop.permute.xlu2 %1695 }
 0x4db   : > { %v1688_v48 = vpop.permute.xlu1 %1687 }
 0x4dd   : > { %v1684_v36 = vpop.permute.xlu0 %1683 }
 0x4de   : > { %v1708_v49 = vsel %vm1707_vm10, %v1706_v47, %v1684_v36 }
 0x4df   : > { %v1710_v51 = vsel %vm1709_vm11, %v1708_v49, %v1688_v48 }
 0x4e3   : > { %v1700_v54 = vpop.permute.xlu1 %1699 }
 0x4e5   : > { %v1692_v39 = vpop.permute.xlu0 %1691 }
 0x4e6   : > { %v1712_v43 = vsel %vm1711_vm12, %v1710_v51, %v1692_v39 }
 0x4e7   : > { %v1714_v53 = vsel %vm1713_vm13, %v1712_v43, %v1696_v52 }
 0x4e8   : > { %v1716_v27 = vsel %vm1715_vm14, %v1714_v53, %v1700_v54 }
 0x4ed   : > { %v1704_v55 = vpop.permute.xlu0 %1703 }
 0x4ee   : > { %v1718_v56 = vsel %vm1717_vm15, %v1716_v27, %v1704_v55 }
 0x4ef   : > { %1724 = vrot.lane.b32.xlu2 %v1718_v56, %s2588_s10 }
 0x549   : > { %v1725_v57 = vpop.permute.xlu2 %1724 }
 0x54a   : > { %1728 = vst.msk [vmem:[#allocation3 + $0x3] sm:$0xff] %vm1727_vm0, %v1725_v57 }
 0x551   : > { %v1735_v58 = vld [vmem:[#allocation3 + $0x6] sm:$0xff] }
 0x552   : > { %v1734_v59 = vld [vmem:[#allocation3 + $0x5] sm:$0xff]  ;;  %1757 = vrot.lane.b32.xlu2 %v1735_v58, %s2594_s30 }
 0x553   : > { %v1733_v60 = vld [vmem:[#allocation3 + $0x4] sm:$0xff]  ;;  %1753 = vrot.lane.b32.xlu0 %v1734_v59, %s2591_s14 }
 0x554   : > { %1749 = vrot.lane.b32.xlu1 %v1733_v60, %s2577_s12  ;;  %v1732_v61 = vld [vmem:[#allocation3 + $0x3] sm:$0xff] }
 0x555   : > { %v1731_v62 = vld [vmem:[#allocation3 + $0x2] sm:$0xff] }
 0x556   : > { %v1730_v42 = vld [vmem:[#allocation3 + $0x1] sm:$0xff] }
 0x557   : > { %v1729_v25 = vld [vmem:[#allocation3] sm:$0xff] }
 0x55a   : > { %1745 = vrot.lane.b32.xlu2 %v1732_v61, %s2595_s17 }
 0x55b   : > { %1741 = vrot.lane.b32.xlu0 %v1731_v62, %s2596_s18 }
 0x55c   : > { %1737 = vrot.lane.b32.xlu1 %v1730_v42, %s2597_s20 }
 0x5ac   : > { %v1758_v18 = vpop.permute.xlu2 %1757 }
 0x5b4   : > { %v1746_v28 = vpop.permute.xlu2 %1745 }
 0x5c5   : > { %v1754_v17 = vpop.permute.xlu0 %1753 }
 0x5c6   : > { %v1750_v19 = vpop.permute.xlu1 %1749 }
 0x5c7   : > { %v1767_v21 = vsel %vm1715_vm14, %v1750_v19, %v1754_v17 }
 0x5c8   : > { %v1769_v22 = vsel %vm1768_vm1, %v1767_v21, %v1758_v18 }
 0x5c9   : > { %v1771_v23 = vpack.c.bf16 %v1769_v22, %v1769_v22 }
 0x5cb   : > { %2426 = vmatmul.msk.bf16.vlgmr.msrb.gmra.mxu2 %vm1872_vm2, %v1771_v23 }
 0x5cd   : > { %v1742_v15 = vpop.permute.xlu0 %1741 }
 0x5ce   : > { %v1738_v24 = vpop.permute.xlu1 %1737 }
 0x5cf   : > { %v1760_v26 = vsel %vm1719_vm8, %v1729_v25, %v1738_v24 }
 0x5d0   : > { %v1762_v29 = vsel %vm1761_vm3, %v1760_v26, %v1742_v15 }
 0x5d1   : > { %v1764_v30 = vsel %vm1763_vm4, %v1762_v29, %v1746_v28 }
 0x5d2   : > { %v1766_v4 = vsel %vm1765_vm5, %v1764_v30, %v1750_v19 }
 0x5d3   : > { %v1770_v32 = vpack.c.bf16 %v1766_v4, %v1766_v4 }
 0x5d5   : > { %1887 = vmatmul.bf16.vlgmr.msrb.gmra.mxu0 %v1770_v32 }
 0x64e   : > { %v1901_v33 = vpop.f32.mrf.mxu2 }
 0x652   : > { %v1888_v34 = vpop.f32.mrf.mxu0 }
 0x653   : > { %v1902_v35 = vadd.f32 %v1901_v33, %v1888_v34 }
 0x655   : > { %v1905_v37 = vsub.f32 0.0, %v1902_v35 }
 0x656   : > { %v1903_v38 = vpop.f32.mrf.mxu2 }
 0x657   : > { %v1906_v20 = vmul.f32 1.442695, %v1905_v37 }
 0x659   : > { %2563 = vpow2.f32 %v1906_v20 }
 0x65a   : > { %v1890_v40 = vpop.f32.mrf.mxu0 }
 0x65f   : > { %v2564_v41 = vpop.eup %2563 }
 0x660   : > { %v1908_v44 = vadd.f32 1.0, %v2564_v41 }
 0x662   : > { %2565 = vrcp.f32 %v1908_v44 }
 0x668   : > { %v2566_v36 = vpop.eup %2565 }
 0x669   : > { %v1910_v47 = vmul.f32 %v2566_v36, %v3198_v31 }
 0x66b   : > { %v1911_v48 = vadd.f32 %v1910_v47, %v860_v46 }
 0x66d   : > { %v1912_v49 = vmax.f32 %v1911_v48, 0.0 }
 0x66f   : > { %1913 = vst [vmem:[%s323_s13] sm:$0xff] %v1912_v49 }
 0x670 PF: > { %s18_s27 = sadd.s32 1, %s2573_s27  }
 0x671   : > { %p15_p4 = scmp.ge.s32.totalorder %s18_s27, 4  }
 0x673   :  { %17 = sbr.rel (!%p15_p4) target bundleno = 1 (0x1), region = 89 }

</bundles_post_ra>
